<compile_context>
chip_gen: v7x
topology: tpu7x:2x2x1
jax: 0.10.0
libtpu: 0.0.40
codegen_flags: <defaults>
</compile_context>

<pallas_src>
import jax
import jax.numpy as jnp
from jax.experimental import pallas as pl
from jax.experimental.pallas import tpu as pltpu

D = 768            # BERT hidden size
H2 = 100           # mlp2 output size (logical)
H2P = 128          # mlp2 output size padded to lane width
OUT = 2            # final output size (logical)
OUTP = 128         # final output size padded to lane width
NEG_SLOPE = 0.01   # nn.LeakyReLU default negative_slope
TB_MAX = 128       # max batch tile


def _leaky_relu(x):
    return jnp.where(x > 0, x, NEG_SLOPE * x)


def head_kernel(pooled_ref, emb_a_ref, emb_p_ref,
                w1a_ref, w1b_ref, b1_ref,
                w2a_ref, w2b_ref, b2_ref,
                w3_ref, b3_ref,
                out_ref):
    # MXU operands in bf16, f32 accumulation; elementwise math in f32.
    pooled = pooled_ref[...].astype(jnp.bfloat16)   # [TB, 768]
    emb_a = emb_a_ref[...].astype(jnp.bfloat16)     # [TB, 768]
    emb_p = emb_p_ref[...].astype(jnp.bfloat16)     # [TB, 768]

    # mlp1: concat([emb_a, emb_p], 1) @ W1 + b1  -> split matmul
    h1 = (jnp.dot(emb_a, w1a_ref[...], preferred_element_type=jnp.float32)
          + jnp.dot(emb_p, w1b_ref[...], preferred_element_type=jnp.float32)
          + b1_ref[...])                            # [TB, 768] f32
    h1 = _leaky_relu(h1)

    # mlp2: concat([pooled, h1], 1) @ W2 + b2    -> split matmul (padded to 128)
    h2 = (jnp.dot(pooled, w2a_ref[...], preferred_element_type=jnp.float32)
          + jnp.dot(h1.astype(jnp.bfloat16), w2b_ref[...],
                    preferred_element_type=jnp.float32)
          + b2_ref[...])                            # [TB, 128] f32, pad lanes == 0
    h2 = _leaky_relu(h2)

    # mlp: h2 @ W3 + b3, then sigmoid (tiny matmul, keep f32)
    logits = (jnp.dot(h2, w3_ref[...], preferred_element_type=jnp.float32)
              + b3_ref[...])                        # [TB, 128] (padded lanes junk,
                                                    #  sliced off in wrapper)
    out_ref[...] = jax.nn.sigmoid(logits)


def model_head(pooled, emb_author, emb_paper, kparams):
    B = pooled.shape[0]

    # Pick batch tile: multiples of 8, capped at 128; pad batch to fit grid.
    Bp = ((B + 7) // 8) * 8
    if Bp >= TB_MAX:
        TB = TB_MAX
        Bp = ((B + TB - 1) // TB) * TB
    else:
        TB = Bp
    pad = Bp - B
    if pad:
        pooled = jnp.pad(pooled, ((0, pad), (0, 0)))
        emb_author = jnp.pad(emb_author, ((0, pad), (0, 0)))
        emb_paper = jnp.pad(emb_paper, ((0, pad), (0, 0)))

    grid = (Bp // TB,)

    act_spec = pl.BlockSpec((TB, D), lambda i: (i, 0))
    w1_spec = pl.BlockSpec((D, D), lambda i: (0, 0))       # VMEM-resident weights
    b1_spec = pl.BlockSpec((1, D), lambda i: (0, 0))
    w2_spec = pl.BlockSpec((D, H2P), lambda i: (0, 0))
    b2_spec = pl.BlockSpec((1, H2P), lambda i: (0, 0))
    w3_spec = pl.BlockSpec((H2P, OUTP), lambda i: (0, 0))
    b3_spec = pl.BlockSpec((1, OUTP), lambda i: (0, 0))
    out_spec = pl.BlockSpec((TB, OUTP), lambda i: (i, 0))   # lane-dense output

    out = pl.pallas_call(
        head_kernel,
        out_shape=jax.ShapeDtypeStruct((Bp, OUTP), jnp.float32),
        grid=grid,
        in_specs=[act_spec, act_spec, act_spec,
                  w1_spec, w1_spec, b1_spec,
                  w2_spec, w2_spec, b2_spec,
                  w3_spec, b3_spec],
        out_specs=out_spec,
        compiler_params=pltpu.CompilerParams(
            dimension_semantics=("parallel",),
            vmem_limit_bytes=32 * 1024 * 1024,
        ),
    )(pooled, emb_author, emb_paper,
      kparams["w1a"], kparams["w1b"], kparams["b1"],
      kparams["w2a"], kparams["w2b"], kparams["b2"],
      kparams["w3"], kparams["b3"])
    return out[:B, :OUT]


def init_params(key):
    """Master f32 parameters in torch nn.Linear layout ([in, out] + [1, out])."""
    k1, k2, k3, k4, k5, k6 = jax.random.split(key, 6)

    def lin(kw, kb, fan_in, fan_out):
        bound = 1.0 / jnp.sqrt(fan_in)
        w = jax.random.uniform(kw, (fan_in, fan_out), jnp.float32, -bound, bound)
        b = jax.random.uniform(kb, (1, fan_out), jnp.float32, -bound, bound)
        return w, b

    w1, b1 = lin(k1, k2, 2 * D, D)      # nn.Linear(2*768, 768)
    w2, b2 = lin(k3, k4, 2 * D, H2)     # nn.Linear(2*768, 100)
    w3, b3 = lin(k5, k6, H2, OUT)       # nn.Linear(100, 2)
    return {"w1": w1, "b1": b1, "w2": w2, "b2": b2, "w3": w3, "b3": b3}


def prepare_kernel_params(p):
    """Split / pad / quantize master params into the kernel's layout."""
    w1a = p["w1"][:D, :].astype(jnp.bfloat16)                   # [768, 768] bf16
    w1b = p["w1"][D:, :].astype(jnp.bfloat16)                   # [768, 768] bf16
    b1 = p["b1"].astype(jnp.float32)                            # [1, 768]

    w2_pad = jnp.pad(p["w2"], ((0, 0), (0, H2P - H2)))          # [1536, 128]
    w2a = w2_pad[:D, :].astype(jnp.bfloat16)                    # [768, 128] bf16
    w2b = w2_pad[D:, :].astype(jnp.bfloat16)                    # [768, 128] bf16
    b2 = jnp.pad(p["b2"], ((0, 0), (0, H2P - H2))).astype(jnp.float32)   # [1, 128]

    # Pad both dims of W3 / b3 so the final matmul + output are full-lane.
    w3 = jnp.pad(p["w3"], ((0, H2P - H2), (0, OUTP - OUT))).astype(jnp.float32)  # [128, 128]
    b3 = jnp.pad(p["b3"], ((0, 0), (0, OUTP - OUT))).astype(jnp.float32)         # [1, 128]
    return {"w1a": w1a, "w1b": w1b, "b1": b1,
            "w2a": w2a, "w2b": w2b, "b2": b2,
            "w3": w3, "b3": b3}


def reference_head_bf16(pooled, emb_a, emb_p, kp):
    """Plain-JAX reference using the exact same bf16 weights / f32 accumulation."""
    def mm(x, w):
        return jnp.dot(x.astype(jnp.bfloat16), w, preferred_element_type=jnp.float32)

    h1 = _leaky_relu(mm(emb_a, kp["w1a"]) + mm(emb_p, kp["w1b"]) + kp["b1"])
    h2 = _leaky_relu(mm(pooled, kp["w2a"]) + mm(h1, kp["w2b"]) + kp["b2"])
    logits = jnp.dot(h2, kp["w3"], preferred_element_type=jnp.float32) + kp["b3"]
    return jax.nn.sigmoid(logits)[:, :OUT]


def reference_head_f32(pooled, emb_a, emb_p, p):
    """Full-precision reference matching the original PyTorch semantics."""
    h1 = jnp.concatenate([emb_a, emb_p], axis=1) @ p["w1"] + p["b1"]
    h1 = _leaky_relu(h1)
    x = jnp.concatenate([pooled, h1], axis=1)
    h2 = _leaky_relu(x @ p["w2"] + p["b2"])
    return jax.nn.sigmoid(h2 @ p["w3"] + p["b3"])


if __name__ == "__main__":
    # TODO(synk): bert_model / oagbert encoders are external submodules; their
    # pooled 768-d outputs are modeled as inputs rather than re-implemented.
    key = jax.random.PRNGKey(0)
    kp, ka, kb, kc = jax.random.split(key, 4)

    B = 8
    master = init_params(kp)
    kparams = prepare_kernel_params(master)

    pooled = jax.random.normal(ka, (B, D), jnp.float32)      # bert_model(...)[1]
    emb_author = jax.random.normal(kb, (B, D), jnp.float32)  # process_oag_token(oag_token)
    emb_paper = jax.random.normal(kc, (B, D), jnp.float32)   # process_oag_token(oag_token_paper)

    out = model_head(pooled, emb_author, emb_paper, kparams)
    out = jax.block_until_ready(out)
    assert out.shape == (B, OUT), out.shape

    # Tight check: same bf16-weight math in plain JAX.
    ref_bf16 = reference_head_bf16(pooled, emb_author, emb_paper, kparams)
    assert jnp.allclose(out, ref_bf16, atol=1e-4, rtol=1e-4), "mismatch vs bf16 reference"

    # Loose check: original full-f32 module semantics (bf16 weight rounding only).
    ref_f32 = reference_head_f32(pooled, emb_author, emb_paper, master)
    assert jnp.allclose(out, ref_f32, atol=5e-2), "mismatch vs f32 reference"

    print("KERNEL_OK")
</pallas_src>

<mosaic_0001>
module attributes {stable_mosaic.version = 11 : i64} {
  func.func @head_kernel(%arg0: i32, %arg1: memref<8x768xf32, #tpu.memory_space<vmem>>, %arg2: memref<8x768xf32, #tpu.memory_space<vmem>>, %arg3: memref<8x768xf32, #tpu.memory_space<vmem>>, %arg4: memref<768x768xbf16, #tpu.memory_space<vmem>>, %arg5: memref<768x768xbf16, #tpu.memory_space<vmem>>, %arg6: memref<1x768xf32, #tpu.memory_space<vmem>>, %arg7: memref<768x128xbf16, #tpu.memory_space<vmem>>, %arg8: memref<768x128xbf16, #tpu.memory_space<vmem>>, %arg9: memref<1x128xf32, #tpu.memory_space<vmem>>, %arg10: memref<128x128xf32, #tpu.memory_space<vmem>>, %arg11: memref<1x128xf32, #tpu.memory_space<vmem>>, %arg12: memref<8x128xf32, #tpu.memory_space<vmem>>) attributes {dimension_semantics = [#tpu.dimension_semantics<parallel>], iteration_bounds = array<i64: 1>, scalar_prefetch = 0 : i64, scratch_operands = 0 : i64, tpu.core_type = #tpu.core_type<tc>, window_params = [{transform_indices = @transform_0, window_bounds = array<i64: 8, 768>}, {transform_indices = @transform_1, window_bounds = array<i64: 8, 768>}, {transform_indices = @transform_2, window_bounds = array<i64: 8, 768>}, {pipeline_mode = #tpu.pipeline_mode<synchronous>, transform_indices = @transform_3, window_bounds = array<i64: 768, 768>}, {pipeline_mode = #tpu.pipeline_mode<synchronous>, transform_indices = @transform_4, window_bounds = array<i64: 768, 768>}, {pipeline_mode = #tpu.pipeline_mode<synchronous>, transform_indices = @transform_5, window_bounds = array<i64: 1, 768>}, {pipeline_mode = #tpu.pipeline_mode<synchronous>, transform_indices = @transform_6, window_bounds = array<i64: 768, 128>}, {pipeline_mode = #tpu.pipeline_mode<synchronous>, transform_indices = @transform_7, window_bounds = array<i64: 768, 128>}, {pipeline_mode = #tpu.pipeline_mode<synchronous>, transform_indices = @transform_8, window_bounds = array<i64: 1, 128>}, {pipeline_mode = #tpu.pipeline_mode<synchronous>, transform_indices = @transform_9, window_bounds = array<i64: 128, 128>}, {pipeline_mode = #tpu.pipeline_mode<synchronous>, transform_indices = @transform_10, window_bounds = array<i64: 1, 128>}, {transform_indices = @transform_11, window_bounds = array<i64: 8, 128>}]} {
    %c0 = arith.constant 0 : index
    %c0_0 = arith.constant 0 : index
    %0 = vector.load %arg1[%c0, %c0_0] : memref<8x768xf32, #tpu.memory_space<vmem>>, vector<8x768xf32>
    %1 = arith.truncf %0 : vector<8x768xf32> to vector<8x768xbf16>
    %c0_1 = arith.constant 0 : index
    %c0_2 = arith.constant 0 : index
    %2 = vector.load %arg2[%c0_1, %c0_2] : memref<8x768xf32, #tpu.memory_space<vmem>>, vector<8x768xf32>
    %3 = arith.truncf %2 : vector<8x768xf32> to vector<8x768xbf16>
    %c0_3 = arith.constant 0 : index
    %c0_4 = arith.constant 0 : index
    %4 = vector.load %arg3[%c0_3, %c0_4] : memref<8x768xf32, #tpu.memory_space<vmem>>, vector<8x768xf32>
    %5 = arith.truncf %4 : vector<8x768xf32> to vector<8x768xbf16>
    %c0_5 = arith.constant 0 : index
    %c0_6 = arith.constant 0 : index
    %6 = vector.load %arg4[%c0_5, %c0_6] : memref<768x768xbf16, #tpu.memory_space<vmem>>, vector<768x768xbf16>
    %cst = arith.constant dense<0.000000e+00> : vector<8x768xf32>
    %7 = tpu.matmul %3, %6, %cst {dimension_numbers = #tpu.dot_dimension_numbers<[1], [0], [0], [1], [0, 0, 1, 1], [], []>} : vector<8x768xbf16>, vector<768x768xbf16>, vector<8x768xf32> -> vector<8x768xf32>
    %c0_7 = arith.constant 0 : index
    %c0_8 = arith.constant 0 : index
    %8 = vector.load %arg5[%c0_7, %c0_8] : memref<768x768xbf16, #tpu.memory_space<vmem>>, vector<768x768xbf16>
    %cst_9 = arith.constant dense<0.000000e+00> : vector<8x768xf32>
    %9 = tpu.matmul %5, %8, %cst_9 {dimension_numbers = #tpu.dot_dimension_numbers<[1], [0], [0], [1], [0, 0, 1, 1], [], []>} : vector<8x768xbf16>, vector<768x768xbf16>, vector<8x768xf32> -> vector<8x768xf32>
    %10 = arith.addf %7, %9 : vector<8x768xf32>
    %c0_10 = arith.constant 0 : index
    %c0_11 = arith.constant 0 : index
    %11 = vector.load %arg6[%c0_10, %c0_11] : memref<1x768xf32, #tpu.memory_space<vmem>>, vector<1x768xf32>
    %12 = vector.broadcast %11 : vector<1x768xf32> to vector<8x768xf32>
    %13 = arith.addf %10, %12 : vector<8x768xf32>
    %cst_12 = arith.constant 0.000000e+00 : f32
    %14 = vector.broadcast %cst_12 : f32 to vector<8x768xf32>
    %15 = arith.cmpf ogt, %13, %14 : vector<8x768xf32>
    %cst_13 = arith.constant 0.00999999977 : f32
    %16 = vector.broadcast %cst_13 : f32 to vector<8x768xf32>
    %17 = arith.mulf %16, %13 : vector<8x768xf32>
    %18 = arith.select %15, %13, %17 : vector<8x768xi1>, vector<8x768xf32>
    %c0_14 = arith.constant 0 : index
    %c0_15 = arith.constant 0 : index
    %19 = vector.load %arg7[%c0_14, %c0_15] : memref<768x128xbf16, #tpu.memory_space<vmem>>, vector<768x128xbf16>
    %cst_16 = arith.constant dense<0.000000e+00> : vector<8x128xf32>
    %20 = tpu.matmul %1, %19, %cst_16 {dimension_numbers = #tpu.dot_dimension_numbers<[1], [0], [0], [1], [0, 0, 1, 1], [], []>} : vector<8x768xbf16>, vector<768x128xbf16>, vector<8x128xf32> -> vector<8x128xf32>
    %21 = arith.truncf %18 : vector<8x768xf32> to vector<8x768xbf16>
    %c0_17 = arith.constant 0 : index
    %c0_18 = arith.constant 0 : index
    %22 = vector.load %arg8[%c0_17, %c0_18] : memref<768x128xbf16, #tpu.memory_space<vmem>>, vector<768x128xbf16>
    %cst_19 = arith.constant dense<0.000000e+00> : vector<8x128xf32>
    %23 = tpu.matmul %21, %22, %cst_19 {dimension_numbers = #tpu.dot_dimension_numbers<[1], [0], [0], [1], [0, 0, 1, 1], [], []>} : vector<8x768xbf16>, vector<768x128xbf16>, vector<8x128xf32> -> vector<8x128xf32>
    %24 = arith.addf %20, %23 : vector<8x128xf32>
    %c0_20 = arith.constant 0 : index
    %c0_21 = arith.constant 0 : index
    %25 = vector.load %arg9[%c0_20, %c0_21] : memref<1x128xf32, #tpu.memory_space<vmem>>, vector<1x128xf32>
    %26 = vector.broadcast %25 : vector<1x128xf32> to vector<8x128xf32>
    %27 = arith.addf %24, %26 : vector<8x128xf32>
    %cst_22 = arith.constant 0.000000e+00 : f32
    %28 = vector.broadcast %cst_22 : f32 to vector<8x128xf32>
    %29 = arith.cmpf ogt, %27, %28 : vector<8x128xf32>
    %cst_23 = arith.constant 0.00999999977 : f32
    %30 = vector.broadcast %cst_23 : f32 to vector<8x128xf32>
    %31 = arith.mulf %30, %27 : vector<8x128xf32>
    %32 = arith.select %29, %27, %31 : vector<8x128xi1>, vector<8x128xf32>
    %c0_24 = arith.constant 0 : index
    %c0_25 = arith.constant 0 : index
    %33 = vector.load %arg10[%c0_24, %c0_25] : memref<128x128xf32, #tpu.memory_space<vmem>>, vector<128x128xf32>
    %cst_26 = arith.constant dense<0.000000e+00> : vector<8x128xf32>
    %34 = tpu.matmul %32, %33, %cst_26 {dimension_numbers = #tpu.dot_dimension_numbers<[1], [0], [0], [1], [0, 0, 1, 1], [], []>} : vector<8x128xf32>, vector<128x128xf32>, vector<8x128xf32> -> vector<8x128xf32>
    %c0_27 = arith.constant 0 : index
    %c0_28 = arith.constant 0 : index
    %35 = vector.load %arg11[%c0_27, %c0_28] : memref<1x128xf32, #tpu.memory_space<vmem>>, vector<1x128xf32>
    %36 = vector.broadcast %35 : vector<1x128xf32> to vector<8x128xf32>
    %37 = arith.addf %34, %36 : vector<8x128xf32>
    %38 = arith.negf %37 : vector<8x128xf32>
    %39 = math.exp %38 : vector<8x128xf32>
    %cst_29 = arith.constant 1.000000e+00 : f32
    %40 = vector.broadcast %cst_29 : f32 to vector<8x128xf32>
    %41 = arith.addf %40, %39 : vector<8x128xf32>
    %42 = arith.divf %40, %41 : vector<8x128xf32>
    %c0_30 = arith.constant 0 : index
    %c0_31 = arith.constant 0 : index
    %43 = vector.load %arg12[%c0_30, %c0_31] : memref<8x128xf32, #tpu.memory_space<vmem>>, vector<8x128xf32>
    tpu.vector_store %arg12[%c0_30, %c0_31], %42 {strides = array<i32>} : memref<8x128xf32, #tpu.memory_space<vmem>>, vector<8x128xf32>,
    return
  }
  func.func @transform_0(%arg0: i32) -> (i32, i32) {
    %c0_i32 = arith.constant 0 : i32
    %c0_i32_0 = arith.constant 0 : i32
    return %arg0, %c0_i32 : i32, i32
  }
  func.func @transform_1(%arg0: i32) -> (i32, i32) {
    %c0_i32 = arith.constant 0 : i32
    %c0_i32_0 = arith.constant 0 : i32
    return %arg0, %c0_i32 : i32, i32
  }
  func.func @transform_2(%arg0: i32) -> (i32, i32) {
    %c0_i32 = arith.constant 0 : i32
    %c0_i32_0 = arith.constant 0 : i32
    return %arg0, %c0_i32 : i32, i32
  }
  func.func @transform_3(%arg0: i32) -> (i32, i32) {
    %c0_i32 = arith.constant 0 : i32
    %c0_i32_0 = arith.constant 0 : i32
    %c0_i32_1 = arith.constant 0 : i32
    return %c0_i32, %c0_i32_0 : i32, i32
  }
  func.func @transform_4(%arg0: i32) -> (i32, i32) {
    %c0_i32 = arith.constant 0 : i32
    %c0_i32_0 = arith.constant 0 : i32
    %c0_i32_1 = arith.constant 0 : i32
    return %c0_i32, %c0_i32_0 : i32, i32
  }
  func.func @transform_5(%arg0: i32) -> (i32, i32) {
    %c0_i32 = arith.constant 0 : i32
    %c0_i32_0 = arith.constant 0 : i32
    %c0_i32_1 = arith.constant 0 : i32
    return %c0_i32, %c0_i32_0 : i32, i32
  }
  func.func @transform_6(%arg0: i32) -> (i32, i32) {
    %c0_i32 = arith.constant 0 : i32
    %c0_i32_0 = arith.constant 0 : i32
    %c0_i32_1 = arith.constant 0 : i32
    return %c0_i32, %c0_i32_0 : i32, i32
  }
  func.func @transform_7(%arg0: i32) -> (i32, i32) {
    %c0_i32 = arith.constant 0 : i32
    %c0_i32_0 = arith.constant 0 : i32
    %c0_i32_1 = arith.constant 0 : i32
    return %c0_i32, %c0_i32_0 : i32, i32
  }
  func.func @transform_8(%arg0: i32) -> (i32, i32) {
    %c0_i32 = arith.constant 0 : i32
    %c0_i32_0 = arith.constant 0 : i32
    %c0_i32_1 = arith.constant 0 : i32
    return %c0_i32, %c0_i32_0 : i32, i32
  }
  func.func @transform_9(%arg0: i32) -> (i32, i32) {
    %c0_i32 = arith.constant 0 : i32
    %c0_i32_0 = arith.constant 0 : i32
    %c0_i32_1 = arith.constant 0 : i32
    return %c0_i32, %c0_i32_0 : i32, i32
  }
  func.func @transform_10(%arg0: i32) -> (i32, i32) {
    %c0_i32 = arith.constant 0 : i32
    %c0_i32_0 = arith.constant 0 : i32
    %c0_i32_1 = arith.constant 0 : i32
    return %c0_i32, %c0_i32_0 : i32, i32
  }
  func.func @transform_11(%arg0: i32) -> (i32, i32) {
    %c0_i32 = arith.constant 0 : i32
    %c0_i32_0 = arith.constant 0 : i32
    return %arg0, %c0_i32 : i32, i32
  }
}

</mosaic_0001>

<bundles_post_ra>
// kernel: tpu_custom_call.1
= control target key start
LH: loop header
LB: loop body
LE: loop exit
PB: predicated region body
PF: predicated region fallthrough
CT: control target
= control target key end

     0   :  { %16 = vsyncpa [#allocation3], 0  ;;  %s8125_s0 = inlined_call_operand.hbm [shape: f32[8,768], index: 0, kind: input, shape index: {}]   ;;  %s8126_s1 = inlined_call_operand.hbm [shape: f32[8,768], index: 1, kind: input, shape index: {}]   ;;  %s8127_s2 = inlined_call_operand.hbm [shape: f32[8,768], index: 2, kind: input, shape index: {}]   ;;  %s8128_s3 = inlined_call_operand.hbm [shape: bf16[768,768], index: 3, kind: input, shape index: {}]   ;;  %s8129_s4 = inlined_call_operand.hbm [shape: bf16[768,768], index: 4, kind: input, shape index: {}]   ;;  %s8130_s5 = inlined_call_operand.hbm [shape: f32[1,768], index: 5, kind: input, shape index: {}]   ;;  %s8131_s6 = inlined_call_operand.hbm [shape: bf16[768,128], index: 6, kind: input, shape index: {}]   ;;  %s8132_s7 = inlined_call_operand.hbm [shape: bf16[768,128], index: 7, kind: input, shape index: {}]   ;;  %s8133_s8 = inlined_call_operand.hbm [shape: f32[1,128], index: 8, kind: input, shape index: {}]   ;;  %s8134_s9 = inlined_call_operand.hbm [shape: f32[128,128], index: 9, kind: input, shape index: {}]   ;;  %s8135_s10 = inlined_call_operand.hbm [shape: f32[1,128], index: 10, kind: input, shape index: {}]   ;;  %s8136_s11 = inlined_call_operand.hbm [shape: f32[8,128], index: 11, kind: output, shape index: {}]  }
   0x1   :  { %17 = vsyncpa [#allocation6], 0 }
   0x2   :  { %18 = vsyncpa [#allocation9], 0 }
   0x3   :  { %19 = vsyncpa [#allocation12], 0 }
   0x4   :  { %20 = vsyncpa [#allocation15], 0 }
   0x5   :  { %21 = vsyncpa [#allocation18], 0 }
   0x6   :  { %22 = vsyncpa [#allocation4], 0  ;;  %s7754_s17 = smov [#allocation5]   ;;  %s7755_s19 = smov [#allocation8]  }
   0x7   :  { %s39_s18 = sshll.u32 %s7754_s17, 4  ;;  %s58_s20 = sshll.u32 %s7755_s19, 4  ;;  %s40_s18 = int_to_ptr.vmem [resolvable:$true] %s39_s18  ;;  %s7835_s20 = int_to_ptr.vmem [resolvable:$true] %s58_s20 }
   0x8   :  { %s7476_s23 = scalar_lea.hbm %s8126_s1, 768 }
   0x9   :  { %p7477_p0 = scmp.ne.s32.totalorder %s8126_s1, %s7476_s23  ;;  %p7480_p1 = scmp.lt.u32.totalorder %s7476_s23, %s8126_s1 }
   0xb   :  { %p7482_p2 = pnand %p7480_p1, %p7477_p0 }
   0xd   :  { %7485 = shalt.err (!%p7482_p2)
}
   0xe   :  { %s7486_s28 = scalar_lea.vmem %s40_s18, 768  ;;  %p7491_p4 = scmp.lt.s32.totalorder %s40_s18, %s40_s18 }
   0xf   :  { %p7487_p3 = scmp.ne.s32.totalorder %s40_s18, %s7486_s28  ;;  %p7492_p5 = scmp.lt.s32.totalorder %s7486_s28, %s7486_s28 }
  0x11   :  { %p7493_p6 = por %p7492_p5, %p7491_p4 }
  0x13   :  { %p7494_p7 = pnand %p7493_p6, %p7487_p3 }
  0x15   :  { %7497 = shalt.err (!%p7494_p7)
}
  0x16   :  { %42 = dma.hbm_to_vmem [thread:$0]  %s8126_s1, 768, %s40_s18, [#allocation6]  }
  0x17   :  { %s7498_s14 = scalar_lea.hbm %s8128_s3, 36864 }
  0x18   :  { %p7499_p8 = scmp.ne.s32.totalorder %s8128_s3, %s7498_s14  ;;  %p7502_p9 = scmp.lt.u32.totalorder %s7498_s14, %s8128_s3 }
  0x1a   :  { %p7504_p10 = pnand %p7502_p9, %p7499_p8 }
  0x1c   :  { %7507 = shalt.err (!%p7504_p10)
}
  0x1d   :  { %s7508_s21 = scalar_lea.vmem %s7835_s20, 36864  ;;  %p7513_p12 = scmp.lt.s32.totalorder %s7835_s20, %s7835_s20 }
  0x1e   :  { %p7509_p11 = scmp.ne.s32.totalorder %s7835_s20, %s7508_s21  ;;  %p7514_p13 = scmp.lt.s32.totalorder %s7508_s21, %s7508_s21 }
  0x20   :  { %p7515_p0 = por %p7514_p13, %p7513_p12 }
  0x22   :  { %p7516_p1 = pnand %p7515_p0, %p7509_p11 }
  0x24   :  { %7519 = shalt.err (!%p7516_p1)
}
  0x25   :  { %s7756_s1 = smov 384   ;;  %s7757_s18 = smov 24  }
  0x26   :  { %64 = dma.hbm_to_vmem [thread:$0]  %s8128_s3, 36864, %s7835_s20, [#allocation9], %s7756_s1, %s7756_s1, %s7757_s18  }
  0x27   :  { %s7758_s24 = smov [#allocation11]   ;;  %s7520_s28 = scalar_lea.hbm %s8130_s5, 96 }
  0x28   :  { %s83_s25 = sshll.u32 %s7758_s24, 4  ;;  %p7521_p2 = scmp.ne.s32.totalorder %s8130_s5, %s7520_s28  ;;  %s84_s25 = int_to_ptr.vmem [resolvable:$true] %s83_s25 }
  0x29   :  { %p7524_p3 = scmp.lt.u32.totalorder %s7520_s28, %s8130_s5 }
  0x2b   :  { %p7526_p4 = pnand %p7524_p3, %p7521_p2 }
  0x2d   :  { %7529 = shalt.err (!%p7526_p4)
}
  0x2e   :  { %s7530_s14 = scalar_lea.vmem %s84_s25, 96  ;;  %p7535_p6 = scmp.lt.s32.totalorder %s84_s25, %s84_s25 }
  0x2f   :  { %p7531_p5 = scmp.ne.s32.totalorder %s84_s25, %s7530_s14  ;;  %p7536_p7 = scmp.lt.s32.totalorder %s7530_s14, %s7530_s14 }
  0x31   :  { %p7537_p8 = por %p7536_p7, %p7535_p6 }
  0x33   :  { %p7538_p9 = pnand %p7537_p8, %p7531_p5 }
  0x35   :  { %7541 = shalt.err (!%p7538_p9)
}
  0x36   :  { %86 = dma.hbm_to_vmem [thread:$0]  %s8130_s5, 96, %s84_s25, [#allocation12]  }
  0x37   :  { %s7759_s15 = smov [#allocation14]   ;;  %s7760_s17 = smov [#allocation17]  }
  0x38   :  { %s104_s16 = sshll.u32 %s7759_s15, 4  ;;  %s126_s19 = sshll.u32 %s7760_s17, 4  ;;  %s105_s16 = int_to_ptr.vmem [resolvable:$true] %s104_s16  ;;  %s127_s19 = int_to_ptr.vmem [resolvable:$true] %s126_s19 }
  0x39   :  { %s7542_s23 = scalar_lea.hbm %s8132_s7, 6144 }
  0x3a   :  { %p7543_p10 = scmp.ne.s32.totalorder %s8132_s7, %s7542_s23  ;;  %p7546_p11 = scmp.lt.u32.totalorder %s7542_s23, %s8132_s7 }
  0x3c   :  { %p7548_p12 = pnand %p7546_p11, %p7543_p10 }
  0x3e   :  { %7551 = shalt.err (!%p7548_p12)
}
  0x3f   :  { %s7552_s5 = scalar_lea.vmem %s105_s16, 6144  ;;  %p7557_p0 = scmp.lt.s32.totalorder %s105_s16, %s105_s16 }
  0x40   :  { %p7553_p13 = scmp.ne.s32.totalorder %s105_s16, %s7552_s5  ;;  %p7558_p1 = scmp.lt.s32.totalorder %s7552_s5, %s7552_s5 }
  0x42   :  { %p7559_p2 = por %p7558_p1, %p7557_p0 }
  0x44   :  { %p7560_p3 = pnand %p7559_p2, %p7553_p13 }
  0x46   :  { %7563 = shalt.err (!%p7560_p3)
}
  0x47   :  { %s7761_s25 = smov 64   ;;  %s7762_s29 = smov 4  }
  0x48   :  { %110 = dma.hbm_to_vmem [thread:$0]  %s8132_s7, 6144, %s105_s16, [#allocation15], %s7761_s25, %s7761_s25, %s7762_s29  }
  0x49   :  { %s7564_s3 = scalar_lea.hbm %s8134_s9, 2048 }
  0x4a   :  { %p7565_p4 = scmp.ne.s32.totalorder %s8134_s9, %s7564_s3  ;;  %p7568_p5 = scmp.lt.u32.totalorder %s7564_s3, %s8134_s9 }
  0x4c   :  { %p7570_p6 = pnand %p7568_p5, %p7565_p4 }
  0x4e   :  { %7573 = shalt.err (!%p7570_p6)
}
  0x4f   :  { %s7574_s22 = scalar_lea.vmem %s127_s19, 2048  ;;  %p7579_p8 = scmp.lt.s32.totalorder %s127_s19, %s127_s19 }
  0x50   :  { %p7575_p7 = scmp.ne.s32.totalorder %s127_s19, %s7574_s22  ;;  %p7580_p9 = scmp.lt.s32.totalorder %s7574_s22, %s7574_s22 }
  0x52   :  { %p7581_p10 = por %p7580_p9, %p7579_p8 }
  0x54   :  { %p7582_p11 = pnand %p7581_p10, %p7575_p7 }
  0x56   :  { %7585 = shalt.err (!%p7582_p11)
}
  0x57   :  { %s7763_s7 = smov 128   ;;  %s7764_s16 = smov 8  }
  0x58   :  { %132 = dma.hbm_to_vmem [thread:$0]  %s8134_s9, 2048, %s127_s19, [#allocation18], %s7763_s7, %s7763_s7, %s7764_s16  }
  0x59   :  { %s7765_s26 = smov [#allocation2]   ;;  %s7766_s28 = smov [#allocation7]  }
  0x5a   :  { %s29_s27 = sshll.u32 %s7765_s26, 4  ;;  %s49_s5 = sshll.u32 %s7766_s28, 4  ;;  %s30_s27 = int_to_ptr.vmem [resolvable:$true] %s29_s27  ;;  %s50_s5 = int_to_ptr.vmem [resolvable:$true] %s49_s5 }
  0x5b   :  { %s7586_s13 = scalar_lea.hbm %s8125_s0, 768 }
  0x5c   :  { %p7587_p12 = scmp.ne.s32.totalorder %s8125_s0, %s7586_s13  ;;  %p7590_p13 = scmp.lt.u32.totalorder %s7586_s13, %s8125_s0 }
  0x5e   :  { %p7592_p0 = pnand %p7590_p13, %p7587_p12 }
  0x60   :  { %7595 = shalt.err (!%p7592_p0)
}
  0x61   :  { %s7596_s9 = scalar_lea.vmem %s30_s27, 768  ;;  %p7601_p2 = scmp.lt.s32.totalorder %s30_s27, %s30_s27 }
  0x62   :  { %p7597_p1 = scmp.ne.s32.totalorder %s30_s27, %s7596_s9  ;;  %p7602_p3 = scmp.lt.s32.totalorder %s7596_s9, %s7596_s9 }
  0x64   :  { %p7603_p4 = por %p7602_p3, %p7601_p2 }
  0x66   :  { %p7604_p5 = pnand %p7603_p4, %p7597_p1 }
  0x68   :  { %7607 = shalt.err (!%p7604_p5)
}
  0x69   :  { %32 = dma.hbm_to_vmem [thread:$0]  %s8125_s0, 768, %s30_s27, [#allocation3]  }
  0x6a   :  { %s7608_s7 = scalar_lea.hbm %s8127_s2, 768 }
  0x6b   :  { %p7609_p6 = scmp.ne.s32.totalorder %s8127_s2, %s7608_s7  ;;  %p7612_p7 = scmp.lt.u32.totalorder %s7608_s7, %s8127_s2 }
  0x6d   :  { %p7614_p8 = pnand %p7612_p7, %p7609_p6 }
  0x6f   :  { %7617 = shalt.err (!%p7614_p8)
}
  0x70   :  { %s7618_s28 = scalar_lea.vmem %s50_s5, 768  ;;  %p7623_p10 = scmp.lt.s32.totalorder %s50_s5, %s50_s5 }
  0x71   :  { %p7619_p9 = scmp.ne.s32.totalorder %s50_s5, %s7618_s28  ;;  %p7624_p11 = scmp.lt.s32.totalorder %s7618_s28, %s7618_s28 }
  0x73   :  { %p7625_p12 = por %p7624_p11, %p7623_p10 }
  0x75   :  { %p7626_p13 = pnand %p7625_p12, %p7619_p9 }
  0x77   :  { %7629 = shalt.err (!%p7626_p13)
}
  0x78   :  { %52 = dma.hbm_to_vmem [thread:$0]  %s8127_s2, 768, %s50_s5, [#allocation6]  }
  0x79   :  { %s7767_s30 = smov [#allocation10]   ;;  %s7768_s13 = smov [#allocation13]  }
  0x7a   :  { %s70_s12 = sshll.u32 %s7767_s30, 4  ;;  %s92_s14 = sshll.u32 %s7768_s13, 4  ;;  %s71_s12 = int_to_ptr.vmem [resolvable:$true] %s70_s12  ;;  %s93_s14 = int_to_ptr.vmem [resolvable:$true] %s92_s14 }
  0x7b   :  { %s7630_s15 = scalar_lea.hbm %s8129_s4, 36864 }
  0x7c   :  { %p7631_p0 = scmp.ne.s32.totalorder %s8129_s4, %s7630_s15  ;;  %p7634_p1 = scmp.lt.u32.totalorder %s7630_s15, %s8129_s4 }
  0x7e   :  { %p7636_p2 = pnand %p7634_p1, %p7631_p0 }
  0x80   :  { %7639 = shalt.err (!%p7636_p2)
}
  0x81   :  { %s7640_s2 = scalar_lea.vmem %s71_s12, 36864  ;;  %p7645_p4 = scmp.lt.s32.totalorder %s71_s12, %s71_s12 }
  0x82   :  { %p7641_p3 = scmp.ne.s32.totalorder %s71_s12, %s7640_s2  ;;  %p7646_p5 = scmp.lt.s32.totalorder %s7640_s2, %s7640_s2 }
  0x84   :  { %p7647_p6 = por %p7646_p5, %p7645_p4 }
  0x86   :  { %p7648_p7 = pnand %p7647_p6, %p7641_p3 }
  0x88   :  { %7651 = shalt.err (!%p7648_p7)
}
  0x89   :  { %76 = dma.hbm_to_vmem [thread:$0]  %s8129_s4, 36864, %s71_s12, [#allocation9], %s7756_s1, %s7756_s1, %s7757_s18  }
  0x8a   :  { %s7652_s23 = scalar_lea.hbm %s8131_s6, 6144 }
  0x8b   :  { %p7653_p8 = scmp.ne.s32.totalorder %s8131_s6, %s7652_s23  ;;  %p7656_p9 = scmp.lt.u32.totalorder %s7652_s23, %s8131_s6 }
  0x8d   :  { %p7658_p10 = pnand %p7656_p9, %p7653_p8 }
  0x8f   :  { %7661 = shalt.err (!%p7658_p10)
}
  0x90   :  { %s7662_s27 = scalar_lea.vmem %s93_s14, 6144  ;;  %p7667_p12 = scmp.lt.s32.totalorder %s93_s14, %s93_s14 }
  0x91   :  { %p7663_p11 = scmp.ne.s32.totalorder %s93_s14, %s7662_s27  ;;  %p7668_p13 = scmp.lt.s32.totalorder %s7662_s27, %s7662_s27 }
  0x93   :  { %p7669_p0 = por %p7668_p13, %p7667_p12 }
  0x95   :  { %p7670_p1 = pnand %p7669_p0, %p7663_p11 }
  0x97   :  { %7673 = shalt.err (!%p7670_p1)
}
  0x98   :  { %98 = dma.hbm_to_vmem [thread:$0]  %s8131_s6, 6144, %s93_s14, [#allocation12], %s7761_s25, %s7761_s25, %s7762_s29  }
  0x99   :  { %s7769_s18 = smov [#allocation16]   ;;  %s7770_s12 = smov [#allocation19]  }
  0x9a   :  { %s117_s30 = sshll.u32 %s7769_s18, 4  ;;  %s139_s13 = sshll.u32 %s7770_s12, 4  ;;  %s118_s30 = int_to_ptr.vmem [resolvable:$true] %s117_s30  ;;  %s140_s13 = int_to_ptr.vmem [resolvable:$true] %s139_s13 }
  0x9b   :  { %s7674_s15 = scalar_lea.hbm %s8133_s8, 16 }
  0x9c   :  { %p7675_p2 = scmp.ne.s32.totalorder %s8133_s8, %s7674_s15  ;;  %p7678_p3 = scmp.lt.u32.totalorder %s7674_s15, %s8133_s8 }
  0x9e   :  { %p7680_p4 = pnand %p7678_p3, %p7675_p2 }
  0xa0   :  { %7683 = shalt.err (!%p7680_p4)
}
  0xa1   :  { %s7684_s6 = scalar_lea.vmem %s118_s30, 16  ;;  %s7688_s25 = scalar_lea.vmem %s118_s30, 32 }
  0xa2   :  { %p7685_p5 = scmp.ne.s32.totalorder %s118_s30, %s7684_s6  ;;  %p7689_p6 = scmp.lt.s32.totalorder %s118_s30, %s118_s30 }
  0xa3   :  { %p7690_p7 = scmp.lt.s32.totalorder %s7688_s25, %s7684_s6 }
  0xa5   :  { %p7691_p8 = por %p7690_p7, %p7689_p6 }
  0xa7   :  { %p7692_p9 = pnand %p7691_p8, %p7685_p5 }
  0xa9   :  { %7695 = shalt.err (!%p7692_p9)
}
  0xaa   :  { %120 = dma.hbm_to_vmem [thread:$0]  %s8133_s8, 16, %s118_s30, [#allocation15]  }
  0xab   :  { %s7696_s22 = scalar_lea.hbm %s8135_s10, 16 }
  0xac   :  { %p7697_p10 = scmp.ne.s32.totalorder %s8135_s10, %s7696_s22  ;;  %p7700_p11 = scmp.lt.u32.totalorder %s7696_s22, %s8135_s10 }
  0xae   :  { %p7702_p12 = pnand %p7700_p11, %p7697_p10 }
  0xb0   :  { %7705 = shalt.err (!%p7702_p12)
}
  0xb1   :  { %s7706_s26 = scalar_lea.vmem %s140_s13, 16  ;;  %s7710_s28 = scalar_lea.vmem %s140_s13, 32 }
  0xb2   :  { %p7707_p13 = scmp.ne.s32.totalorder %s140_s13, %s7706_s26  ;;  %p7711_p0 = scmp.lt.s32.totalorder %s140_s13, %s140_s13 }
  0xb3   :  { %p7712_p1 = scmp.lt.s32.totalorder %s7710_s28, %s7706_s26 }
  0xb5   :  { %p7713_p2 = por %p7712_p1, %p7711_p0 }
  0xb7   :  { %p7714_p3 = pnand %p7713_p2, %p7707_p13 }
  0xb9   :  { %7717 = shalt.err (!%p7714_p3)
}
  0xba   :  { %142 = dma.hbm_to_vmem [thread:$0]  %s8135_s10, 16, %s140_s13, [#allocation18]  }
  0xbb   :  { %7740 = dma.done.wait [#allocation3], 768  }
  0xbc   :  { %7741 = vsyncadd [#allocation3], 4294966528 }
  0xbd   :  { %7742 = dma.done.wait [#allocation6], 1536  }
  0xbe   :  { %7743 = vsyncadd [#allocation6], 4294965760 }
  0xbf   :  { %7744 = dma.done.wait [#allocation9], 73728  }
  0xc0   :  { %7745 = vsyncadd [#allocation9], 4294893568 }
  0xc1   :  { %7746 = dma.done.wait [#allocation12], 6240  }
  0xc2   :  { %7747 = vsyncadd [#allocation12], 4294961056 }
  0xc3   :  { %7748 = dma.done.wait [#allocation15], 6160  }
  0xc4   :  { %7749 = vsyncadd [#allocation15], 4294961136 }
  0xc5   :  { %7750 = dma.done.wait [#allocation18], 2064  }
  0xc6   :  { %7751 = vsyncadd [#allocation18], 4294965232  ;;  %v6512_v0 = vld [vmem:[#allocation10 + $0x4] ss:$24 sps:$4 sm:$0xff]   ;;  %v6516_v2 = vld [vmem:[#allocation10] ss:$24 sps:$4 sm:$0xff]  }
  0xc7   :  { %v6514_v1 = vld [vmem:[#allocation10 + $0x304] ss:$24 sps:$4 sm:$0xff]   ;;  %2229 = vmatprep.subr.bf16.mxu0 %v6512_v0  ;;  %v6517_v3 = vld [vmem:[#allocation10 + $0x300] ss:$24 sps:$4 sm:$0xff]   ;;  %v6518_v4 = vld [vmem:[#allocation10 + $0x34] ss:$24 sps:$4 sm:$0xff]  }
  0xc8   :  { %2270 = vmatprep.subr.bf16.mxu1 %v6514_v1  ;;  %2230 = vmatpush1.bf16.msra.mxu0 %v6516_v2  ;;  %v6520_v5 = vld [vmem:[#allocation10 + $0x334] ss:$24 sps:$4 sm:$0xff]   ;;  %v6522_v6 = vld [vmem:[#allocation10 + $0x30] ss:$24 sps:$4 sm:$0xff]   ;;  %v6524_v8 = vld [vmem:[#allocation10 + $0x64] ss:$24 sps:$4 sm:$0xff]  }
  0xc9   :  { %2271 = vmatpush1.bf16.msra.mxu1 %v6517_v3  ;;  %2231 = vmatprep.subr.bf16.mxu0 %v6518_v4  ;;  %v6523_v7 = vld [vmem:[#allocation10 + $0x330] ss:$24 sps:$4 sm:$0xff]   ;;  %v6526_v9 = vld [vmem:[#allocation10 + $0x364] ss:$24 sps:$4 sm:$0xff]   ;;  %v6528_v10 = vld [vmem:[#allocation10 + $0x60] ss:$24 sps:$4 sm:$0xff]  }
  0xca   :  { %2272 = vmatprep.subr.bf16.mxu1 %v6520_v5  ;;  %v6529_v11 = vld [vmem:[#allocation10 + $0x360] ss:$24 sps:$4 sm:$0xff]   ;;  %v6530_v12 = vld [vmem:[#allocation10 + $0x94] ss:$24 sps:$4 sm:$0xff]   ;;  %v6534_v14 = vld [vmem:[#allocation10 + $0x90] ss:$24 sps:$4 sm:$0xff]  }
  0xcb   :  { %v6532_v13 = vld [vmem:[#allocation10 + $0x394] ss:$24 sps:$4 sm:$0xff]   ;;  %v6535_v15 = vld [vmem:[#allocation10 + $0x390] ss:$24 sps:$4 sm:$0xff]   ;;  %v6536_v16 = vld [vmem:[#allocation10 + $0xc4] ss:$24 sps:$4 sm:$0xff]  }
  0xcc   :  { %2232 = vmatpush1.bf16.msra.mxu0 %v6522_v6  ;;  %v6538_v17 = vld [vmem:[#allocation10 + $0x3c4] ss:$24 sps:$4 sm:$0xff]   ;;  %v6540_v18 = vld [vmem:[#allocation10 + $0xc0] ss:$24 sps:$4 sm:$0xff]   ;;  %v6542_v20 = vld [vmem:[#allocation10 + $0xf4] ss:$24 sps:$4 sm:$0xff]  }
  0xcd   :  { %2273 = vmatpush1.bf16.msra.mxu1 %v6523_v7  ;;  %2233 = vmatprep.subr.bf16.mxu0 %v6524_v8  ;;  %v6541_v19 = vld [vmem:[#allocation10 + $0x3c0] ss:$24 sps:$4 sm:$0xff]   ;;  %v6544_v21 = vld [vmem:[#allocation10 + $0x3f4] ss:$24 sps:$4 sm:$0xff]   ;;  %v6546_v22 = vld [vmem:[#allocation10 + $0xf0] ss:$24 sps:$4 sm:$0xff]  }
  0xce   :  { %2274 = vmatprep.subr.bf16.mxu1 %v6526_v9  ;;  %v6547_v23 = vld [vmem:[#allocation10 + $0x3f0] ss:$24 sps:$4 sm:$0xff]   ;;  %v6548_v24 = vld [vmem:[#allocation10 + $0x124] ss:$24 sps:$4 sm:$0xff]   ;;  %v6552_v26 = vld [vmem:[#allocation10 + $0x120] ss:$24 sps:$4 sm:$0xff]  }
  0xcf   :  { %v6550_v25 = vld [vmem:[#allocation10 + $0x424] ss:$24 sps:$4 sm:$0xff]   ;;  %v6553_v27 = vld [vmem:[#allocation10 + $0x420] ss:$24 sps:$4 sm:$0xff]   ;;  %v6554_v28 = vld [vmem:[#allocation10 + $0x154] ss:$24 sps:$4 sm:$0xff]  }
  0xd0   :  { %2234 = vmatpush1.bf16.msra.mxu0 %v6528_v10  ;;  %v6556_v29 = vld [vmem:[#allocation10 + $0x454] ss:$24 sps:$4 sm:$0xff]   ;;  %v6558_v30 = vld [vmem:[#allocation10 + $0x150] ss:$24 sps:$4 sm:$0xff]   ;;  %v6560_v32 = vld [vmem:[#allocation10 + $0x184] ss:$24 sps:$4 sm:$0xff]  }
  0xd1   :  { %2275 = vmatpush1.bf16.msra.mxu1 %v6529_v11  ;;  %2235 = vmatprep.subr.bf16.mxu0 %v6530_v12  ;;  %v6559_v31 = vld [vmem:[#allocation10 + $0x450] ss:$24 sps:$4 sm:$0xff]   ;;  %v6562_v33 = vld [vmem:[#allocation10 + $0x484] ss:$24 sps:$4 sm:$0xff]   ;;  %v6564_v34 = vld [vmem:[#allocation10 + $0x180] ss:$24 sps:$4 sm:$0xff]  }
  0xd2   :  { %2276 = vmatprep.subr.bf16.mxu1 %v6532_v13  ;;  %v6565_v35 = vld [vmem:[#allocation10 + $0x480] ss:$24 sps:$4 sm:$0xff]   ;;  %v6566_v36 = vld [vmem:[#allocation10 + $0x1b4] ss:$24 sps:$4 sm:$0xff]   ;;  %v6570_v38 = vld [vmem:[#allocation10 + $0x1b0] ss:$24 sps:$4 sm:$0xff]  }
  0xd3   :  { %v6568_v37 = vld [vmem:[#allocation10 + $0x4b4] ss:$24 sps:$4 sm:$0xff]   ;;  %v6571_v39 = vld [vmem:[#allocation10 + $0x4b0] ss:$24 sps:$4 sm:$0xff]   ;;  %v6572_v40 = vld [vmem:[#allocation10 + $0x1e4] ss:$24 sps:$4 sm:$0xff]  }
  0xd4   :  { %2236 = vmatpush1.bf16.msra.mxu0 %v6534_v14  ;;  %v6574_v41 = vld [vmem:[#allocation10 + $0x4e4] ss:$24 sps:$4 sm:$0xff]   ;;  %v6576_v42 = vld [vmem:[#allocation10 + $0x1e0] ss:$24 sps:$4 sm:$0xff]   ;;  %v6578_v44 = vld [vmem:[#allocation10 + $0x214] ss:$24 sps:$4 sm:$0xff]  }
  0xd5   :  { %2277 = vmatpush1.bf16.msra.mxu1 %v6535_v15  ;;  %2237 = vmatprep.subr.bf16.mxu0 %v6536_v16  ;;  %v6577_v43 = vld [vmem:[#allocation10 + $0x4e0] ss:$24 sps:$4 sm:$0xff]   ;;  %v6580_v45 = vld [vmem:[#allocation10 + $0x514] ss:$24 sps:$4 sm:$0xff]   ;;  %v6582_v47 = vld [vmem:[#allocation10 + $0x210] ss:$24 sps:$4 sm:$0xff]  }
  0xd6   :  { %2278 = vmatprep.subr.bf16.mxu1 %v6538_v17  ;;  %v202_v46 = vld [vmem:[#allocation7 + $0x8] sm:$0xff]  ;;  %v6583_v48 = vld [vmem:[#allocation10 + $0x510] ss:$24 sps:$4 sm:$0xff]   ;;  %v6590_v56 = vld [vmem:[#allocation10 + $0x274] ss:$24 sps:$4 sm:$0xff]   ;;  %vm7772_vm6 = vmmov 0  }
  0xd7   :  { %v7986_v49 = vpack.c.bf16 %v202_v46, %v202_v46  ;;  %v204_v50 = vld [vmem:[#allocation7 + $0x18] sm:$0xff]  ;;  %v6584_v51 = vld [vmem:[#allocation10 + $0x244] ss:$24 sps:$4 sm:$0xff]   ;;  %v6588_v54 = vld [vmem:[#allocation10 + $0x240] ss:$24 sps:$4 sm:$0xff]   ;;  %s7774_s10 = smov [#allocation20]  }
  0xd8   :  { %2238 = vmatpush1.bf16.msra.mxu0 %v6540_v18  ;;  %v7988_v52 = vpack.c.bf16 %v204_v50, %v204_v50  ;;  %v6586_v53 = vld [vmem:[#allocation10 + $0x544] ss:$24 sps:$4 sm:$0xff]   ;;  %v6589_v55 = vld [vmem:[#allocation10 + $0x540] ss:$24 sps:$4 sm:$0xff]   ;;  %v6592_v57 = vld [vmem:[#allocation10 + $0x574] ss:$24 sps:$4 sm:$0xff]  }
  0xd9   :  { %2279 = vmatpush1.bf16.msra.mxu1 %v6541_v19  ;;  %2239 = vmatprep.subr.bf16.mxu0 %v6542_v20  ;;  %v6594_v58 = vld [vmem:[#allocation10 + $0x270] ss:$24 sps:$4 sm:$0xff]   ;;  %v6596_v60 = vld [vmem:[#allocation10 + $0x2a4] ss:$24 sps:$4 sm:$0xff]   ;;  %v6600_v62 = vld [vmem:[#allocation10 + $0x2a0] ss:$24 sps:$4 sm:$0xff]  }
  0xda   :  { %2280 = vmatprep.subr.bf16.mxu1 %v6544_v21  ;;  %2261 = vmatprep.mubr.bf16.mxu0 %v7986_v49  ;;  %v6595_v59 = vld [vmem:[#allocation10 + $0x570] ss:$24 sps:$4 sm:$0xff]   ;;  %v6598_v61 = vld [vmem:[#allocation10 + $0x5a4] ss:$24 sps:$4 sm:$0xff]   ;;  %v6601_v63 = vld [vmem:[#allocation10 + $0x5a0] ss:$24 sps:$4 sm:$0xff]  }
  0xdb   :  { %2302 = vmatprep.mubr.bf16.mxu1 %v7988_v52  ;;  %v6602_v0 = vld [vmem:[#allocation10 + $0x2d4] ss:$24 sps:$4 sm:$0xff]   ;;  %v6606_v2 = vld [vmem:[#allocation10 + $0x2d0] ss:$24 sps:$4 sm:$0xff]   ;;  %v203_v5 = vld [vmem:[#allocation7 + $0x10] sm:$0xff]  ;;  %s5594_s27 = sshll.u32 %s7774_s10, 4  ;;  %s5595_s27 = int_to_ptr.vmem [resolvable:$true] %s5594_s27 }
  0xdc   :  { %2240 = vmatpush1.bf16.msra.mxu0 %v6546_v22  ;;  %v6604_v1 = vld [vmem:[#allocation10 + $0x5d4] ss:$24 sps:$4 sm:$0xff]   ;;  %v6607_v3 = vld [vmem:[#allocation10 + $0x5d0] ss:$24 sps:$4 sm:$0xff]   ;;  %v6610_v6 = vld [vmem:[#allocation10 + $0x604] ss:$24 sps:$4 sm:$0xff]   ;;  %v7994_v9 = vpack.c.bf16 %v203_v5, %v203_v5  ;;  %p7723_p5 = scmp.lt.s32.totalorder %s5595_s27, %s5595_s27 }
  0xdd   :  { %2281 = vmatpush1.bf16.msra.mxu1 %v6547_v23  ;;  %2241 = vmatprep.subr.bf16.mxu0 %v6548_v24  ;;  %v201_v4 = vld [vmem:[#allocation7] sm:$0xff]  ;;  %v6613_v7 = vld [vmem:[#allocation10 + $0xc] ss:$24 sps:$4 sm:$0xff]   ;;  %v6608_v10 = vld [vmem:[#allocation10 + $0x600] ss:$24 sps:$4 sm:$0xff]   ;;  %s7718_s4 = scalar_lea.vmem %s5595_s27, 128 }
  0xde   :  { %2282 = vmatprep.subr.bf16.mxu1 %v6550_v25  ;;  %v7992_v8 = vpack.c.bf16 %v201_v4, %v201_v4  ;;  %v6611_v11 = vld [vmem:[#allocation10 + $0x8] ss:$24 sps:$4 sm:$0xff]   ;;  %v6616_v12 = vld [vmem:[#allocation10 + $0x634] ss:$24 sps:$4 sm:$0xff]   ;;  %v6617_v15 = vld [vmem:[#allocation10 + $0x38] ss:$24 sps:$4 sm:$0xff]   ;;  %p7719_p4 = scmp.ne.s32.totalorder %s5595_s27, %s7718_s4  ;;  %p7724_p6 = scmp.lt.s32.totalorder %s7718_s4, %s7718_s4 }
  0xdf   :  { %v6619_v13 = vld [vmem:[#allocation10 + $0x3c] ss:$24 sps:$4 sm:$0xff]   ;;  %v6614_v14 = vld [vmem:[#allocation10 + $0x630] ss:$24 sps:$4 sm:$0xff]   ;;  %v6625_v17 = vld [vmem:[#allocation10 + $0x6c] ss:$24 sps:$4 sm:$0xff]  }
  0xe0   :  { %2242 = vmatpush1.bf16.msra.mxu0 %v6552_v26  ;;  %v6622_v16 = vld [vmem:[#allocation10 + $0x664] ss:$24 sps:$4 sm:$0xff]   ;;  %v6620_v18 = vld [vmem:[#allocation10 + $0x660] ss:$24 sps:$4 sm:$0xff]   ;;  %v6628_v20 = vld [vmem:[#allocation10 + $0x694] ss:$24 sps:$4 sm:$0xff]   ;;  %p7725_p7 = por %p7724_p6, %p7723_p5 }
  0xe1   :  { %2283 = vmatpush1.bf16.msra.mxu1 %v6553_v27  ;;  %2243 = vmatprep.subr.bf16.mxu0 %v6554_v28  ;;  %v6623_v19 = vld [vmem:[#allocation10 + $0x68] ss:$24 sps:$4 sm:$0xff]   ;;  %v6631_v21 = vld [vmem:[#allocation10 + $0x9c] ss:$24 sps:$4 sm:$0xff]   ;;  %v6629_v23 = vld [vmem:[#allocation10 + $0x98] ss:$24 sps:$4 sm:$0xff]  }
  0xe2   :  { %2284 = vmatprep.subr.bf16.mxu1 %v6556_v29  ;;  %v6626_v22 = vld [vmem:[#allocation10 + $0x690] ss:$24 sps:$4 sm:$0xff]   ;;  %v6634_v24 = vld [vmem:[#allocation10 + $0x6c4] ss:$24 sps:$4 sm:$0xff]   ;;  %v6632_v26 = vld [vmem:[#allocation10 + $0x6c0] ss:$24 sps:$4 sm:$0xff]   ;;  %p7726_p8 = pnand %p7725_p7, %p7719_p4 }
  0xe3   :  { %v6637_v25 = vld [vmem:[#allocation10 + $0xcc] ss:$24 sps:$4 sm:$0xff]   ;;  %v6635_v27 = vld [vmem:[#allocation10 + $0xc8] ss:$24 sps:$4 sm:$0xff]   ;;  %v6643_v29 = vld [vmem:[#allocation10 + $0xfc] ss:$24 sps:$4 sm:$0xff]  }
  0xe4   :  { %2244 = vmatpush1.bf16.msra.mxu0 %v6558_v30  ;;  %v6640_v28 = vld [vmem:[#allocation10 + $0x6f4] ss:$24 sps:$4 sm:$0xff]   ;;  %v6638_v30 = vld [vmem:[#allocation10 + $0x6f0] ss:$24 sps:$4 sm:$0xff]   ;;  %v6694_v4 = vld [vmem:[#allocation10 + $0x8a4] ss:$24 sps:$4 sm:$0xff]  }
  0xe5   :  { %2285 = vmatpush1.bf16.msra.mxu1 %v6559_v31  ;;  %2245 = vmatprep.subr.bf16.mxu0 %v6560_v32  ;;  %v6641_v31 = vld [vmem:[#allocation10 + $0xf8] ss:$24 sps:$4 sm:$0xff]   ;;  %v6646_v32 = vld [vmem:[#allocation10 + $0x724] ss:$24 sps:$4 sm:$0xff]   ;;  %v6664_v46 = vld [vmem:[#allocation10 + $0x7b4] ss:$24 sps:$4 sm:$0xff]  }
  0xe6   :  { %2286 = vmatprep.subr.bf16.mxu1 %v6562_v33  ;;  %v6649_v33 = vld [vmem:[#allocation10 + $0x12c] ss:$24 sps:$4 sm:$0xff]   ;;  %v6665_v50 = vld [vmem:[#allocation10 + $0x1b8] ss:$24 sps:$4 sm:$0xff]  }
  0xe7   :  { %v6697_v5 = vld [vmem:[#allocation10 + $0x2ac] ss:$24 sps:$4 sm:$0xff]  }
  0xe8   :  { %2246 = vmatpush1.bf16.msra.mxu0 %v6564_v34  ;;  %v206_v34 = vld [vmem:[#allocation7 + $0x28] sm:$0xff] }
  0xe9   :  { %2287 = vmatpush1.bf16.msra.mxu1 %v6565_v35  ;;  %2247 = vmatprep.subr.bf16.mxu0 %v6566_v36  ;;  %v7999_v35 = vpack.c.bf16 %v206_v34, %v206_v34  ;;  %v6644_v36 = vld [vmem:[#allocation10 + $0x720] ss:$24 sps:$4 sm:$0xff]  }
  0xea   :  { %2288 = vmatprep.subr.bf16.mxu1 %v6568_v37  ;;  %v6647_v37 = vld [vmem:[#allocation10 + $0x128] ss:$24 sps:$4 sm:$0xff]  }
  0xeb   :  { %v6728_v34 = vld [vmem:[#allocation10 + $0x3c8] ss:$24 sps:$4 sm:$0xff]  }
  0xec   :  { %2248 = vmatpush1.bf16.msra.mxu0 %v6570_v38  ;;  %v6652_v38 = vld [vmem:[#allocation10 + $0x754] ss:$24 sps:$4 sm:$0xff]  }
  0xed   :  { %2289 = vmatpush1.bf16.msra.mxu1 %v6571_v39  ;;  %2249 = vmatprep.subr.bf16.mxu0 %v6572_v40  ;;  %v6655_v39 = vld [vmem:[#allocation10 + $0x15c] ss:$24 sps:$4 sm:$0xff]   ;;  %v6650_v40 = vld [vmem:[#allocation10 + $0x750] ss:$24 sps:$4 sm:$0xff]  }
  0xee   :  { %2290 = vmatprep.subr.bf16.mxu1 %v6574_v41  ;;  %v6653_v41 = vld [vmem:[#allocation10 + $0x158] ss:$24 sps:$4 sm:$0xff]  }
  0xf0   :  { %2250 = vmatpush1.bf16.msra.mxu0 %v6576_v42  ;;  %v6658_v42 = vld [vmem:[#allocation10 + $0x784] ss:$24 sps:$4 sm:$0xff]  }
  0xf1   :  { %2291 = vmatpush1.bf16.msra.mxu1 %v6577_v43  ;;  %2251 = vmatprep.subr.bf16.mxu0 %v6578_v44  ;;  %v6661_v43 = vld [vmem:[#allocation10 + $0x18c] ss:$24 sps:$4 sm:$0xff]   ;;  %v6656_v44 = vld [vmem:[#allocation10 + $0x780] ss:$24 sps:$4 sm:$0xff]  }
  0xf2   :  { %2292 = vmatprep.subr.bf16.mxu1 %v6580_v45  ;;  %v6659_v45 = vld [vmem:[#allocation10 + $0x188] ss:$24 sps:$4 sm:$0xff]  }
  0xf4   :  { %2252 = vmatpush1.bf16.msra.mxu0 %v6582_v47  ;;  %v6667_v47 = vld [vmem:[#allocation10 + $0x1bc] ss:$24 sps:$4 sm:$0xff]  }
  0xf5   :  { %2293 = vmatpush1.bf16.msra.mxu1 %v6583_v48  ;;  %2253 = vmatprep.subr.bf16.mxu0 %v6584_v51  ;;  %v6662_v48 = vld [vmem:[#allocation10 + $0x7b0] ss:$24 sps:$4 sm:$0xff]   ;;  %v6670_v51 = vld [vmem:[#allocation10 + $0x7e4] ss:$24 sps:$4 sm:$0xff]  }
  0xf6   :  { %2294 = vmatprep.subr.bf16.mxu1 %v6586_v53  ;;  %v6673_v53 = vld [vmem:[#allocation10 + $0x1ec] ss:$24 sps:$4 sm:$0xff]  }
  0xf8   :  { %2254 = vmatpush1.bf16.msra.mxu0 %v6588_v54  ;;  %v6668_v54 = vld [vmem:[#allocation10 + $0x7e0] ss:$24 sps:$4 sm:$0xff]  }
  0xf9   :  { %2295 = vmatpush1.bf16.msra.mxu1 %v6589_v55  ;;  %2255 = vmatprep.subr.bf16.mxu0 %v6590_v56  ;;  %v6671_v55 = vld [vmem:[#allocation10 + $0x1e8] ss:$24 sps:$4 sm:$0xff]   ;;  %v6676_v56 = vld [vmem:[#allocation10 + $0x814] ss:$24 sps:$4 sm:$0xff]  }
  0xfa   :  { %2296 = vmatprep.subr.bf16.mxu1 %v6592_v57  ;;  %v6679_v57 = vld [vmem:[#allocation10 + $0x21c] ss:$24 sps:$4 sm:$0xff]  }
  0xfc   :  { %2256 = vmatpush1.bf16.msra.mxu0 %v6594_v58  ;;  %v6674_v58 = vld [vmem:[#allocation10 + $0x810] ss:$24 sps:$4 sm:$0xff]  }
  0xfd   :  { %2297 = vmatpush1.bf16.msra.mxu1 %v6595_v59  ;;  %2257 = vmatprep.subr.bf16.mxu0 %v6596_v60  ;;  %v6677_v59 = vld [vmem:[#allocation10 + $0x218] ss:$24 sps:$4 sm:$0xff]   ;;  %v6682_v60 = vld [vmem:[#allocation10 + $0x844] ss:$24 sps:$4 sm:$0xff]  }
  0xfe   :  { %2298 = vmatprep.subr.bf16.mxu1 %v6598_v61  ;;  %v6685_v61 = vld [vmem:[#allocation10 + $0x24c] ss:$24 sps:$4 sm:$0xff]  }
 0x100   :  { %2258 = vmatpush1.bf16.msra.mxu0 %v6600_v62  ;;  %v6680_v62 = vld [vmem:[#allocation10 + $0x840] ss:$24 sps:$4 sm:$0xff]  }
 0x101   :  { %2299 = vmatpush1.bf16.msra.mxu1 %v6601_v63  ;;  %2259 = vmatprep.subr.bf16.mxu0 %v6602_v0  ;;  %v6683_v63 = vld [vmem:[#allocation10 + $0x248] ss:$24 sps:$4 sm:$0xff]   ;;  %v6688_v0 = vld [vmem:[#allocation10 + $0x874] ss:$24 sps:$4 sm:$0xff]  }
 0x102   :  { %2300 = vmatprep.subr.bf16.mxu1 %v6604_v1  ;;  %v6691_v1 = vld [vmem:[#allocation10 + $0x27c] ss:$24 sps:$4 sm:$0xff]  }
 0x104   :  { %2260 = vmatpush1.bf16.msra.mxu0 %v6606_v2  ;;  %v6686_v2 = vld [vmem:[#allocation10 + $0x870] ss:$24 sps:$4 sm:$0xff]  }
 0x105   :  { %2301 = vmatpush1.bf16.msra.mxu1 %v6607_v3  ;;  %2311 = vmatprep.subr.bf16.mxu0 %v6610_v6  ;;  %v6689_v3 = vld [vmem:[#allocation10 + $0x278] ss:$24 sps:$4 sm:$0xff]  }
 0x106   :  { %2352 = vmatprep.subr.bf16.mxu1 %v6613_v7  ;;  %v6692_v6 = vld [vmem:[#allocation10 + $0x8a0] ss:$24 sps:$4 sm:$0xff]  }
 0x107   :  { %2262 = vmatmul.mubr.bf16.vlgmr.msra.gmra.mrb[0].mxu0 %v7992_v8  ;;  %v6695_v7 = vld [vmem:[#allocation10 + $0x2a8] ss:$24 sps:$4 sm:$0xff]  }
 0x108   :  { %2303 = vmatmul.mubr.bf16.vlgmr.msra.gmra.mrb[0].mxu1 %v7994_v9  ;;  %2312 = vmatpush1.bf16.msra.mxu0 %v6608_v10  ;;  %v6700_v10 = vld [vmem:[#allocation10 + $0x8d4] ss:$24 sps:$4 sm:$0xff]  }
 0x109   :  { %2353 = vmatpush1.bf16.msra.mxu1 %v6611_v11  ;;  %2313 = vmatprep.subr.bf16.mxu0 %v6616_v12  ;;  %v6703_v11 = vld [vmem:[#allocation10 + $0x2dc] ss:$24 sps:$4 sm:$0xff]   ;;  %v6698_v12 = vld [vmem:[#allocation10 + $0x8d0] ss:$24 sps:$4 sm:$0xff]  }
 0x10a   :  { %2354 = vmatprep.subr.bf16.mxu1 %v6619_v13  ;;  %2384 = vmatprep.mubr.bf16.mxu1 %v7986_v49  ;;  %v6701_v13 = vld [vmem:[#allocation10 + $0x2d8] ss:$24 sps:$4 sm:$0xff]  }
 0x10b   :  { %2343 = vmatprep.mubr.bf16.mxu0 %v7999_v35 }
 0x10c   :  { %2314 = vmatpush1.bf16.msra.mxu0 %v6614_v14  ;;  %v205_v14 = vld [vmem:[#allocation7 + $0x20] sm:$0xff] }
 0x10d   :  { %2355 = vmatpush1.bf16.msra.mxu1 %v6617_v15  ;;  %2315 = vmatprep.subr.bf16.mxu0 %v6622_v16  ;;  %v6706_v15 = vld [vmem:[#allocation10 + $0x30c] ss:$24 sps:$4 sm:$0xff]  }
 0x10e   :  { %2356 = vmatprep.subr.bf16.mxu1 %v6625_v17  ;;  %v6709_v16 = vld [vmem:[#allocation10 + $0x60c] ss:$24 sps:$4 sm:$0xff]   ;;  %v8002_v17 = vpack.c.bf16 %v205_v14, %v205_v14 }
 0x10f   :  { %v6793_v14 = vld [vmem:[#allocation10 + $0x8ac] ss:$24 sps:$4 sm:$0xff]  }
 0x110   :  { %2316 = vmatpush1.bf16.msra.mxu0 %v6620_v18  ;;  %v6704_v18 = vld [vmem:[#allocation10 + $0x308] ss:$24 sps:$4 sm:$0xff]  }
 0x111   :  { %2357 = vmatpush1.bf16.msra.mxu1 %v6623_v19  ;;  %2317 = vmatprep.subr.bf16.mxu0 %v6628_v20  ;;  %v6707_v19 = vld [vmem:[#allocation10 + $0x608] ss:$24 sps:$4 sm:$0xff]   ;;  %v6712_v20 = vld [vmem:[#allocation10 + $0x33c] ss:$24 sps:$4 sm:$0xff]  }
 0x112   :  { %2358 = vmatprep.subr.bf16.mxu1 %v6631_v21  ;;  %v6715_v21 = vld [vmem:[#allocation10 + $0x63c] ss:$24 sps:$4 sm:$0xff]  }
 0x114   :  { %2318 = vmatpush1.bf16.msra.mxu0 %v6626_v22  ;;  %v6710_v22 = vld [vmem:[#allocation10 + $0x338] ss:$24 sps:$4 sm:$0xff]  }
 0x115   :  { %2359 = vmatpush1.bf16.msra.mxu1 %v6629_v23  ;;  %2319 = vmatprep.subr.bf16.mxu0 %v6634_v24  ;;  %v6713_v23 = vld [vmem:[#allocation10 + $0x638] ss:$24 sps:$4 sm:$0xff]   ;;  %v6718_v24 = vld [vmem:[#allocation10 + $0x36c] ss:$24 sps:$4 sm:$0xff]  }
 0x116   :  { %2360 = vmatprep.subr.bf16.mxu1 %v6637_v25  ;;  %v6721_v25 = vld [vmem:[#allocation10 + $0x66c] ss:$24 sps:$4 sm:$0xff]  }
 0x118   :  { %2320 = vmatpush1.bf16.msra.mxu0 %v6632_v26  ;;  %v6716_v26 = vld [vmem:[#allocation10 + $0x368] ss:$24 sps:$4 sm:$0xff]  }
 0x119   :  { %2361 = vmatpush1.bf16.msra.mxu1 %v6635_v27  ;;  %2321 = vmatprep.subr.bf16.mxu0 %v6640_v28  ;;  %v6719_v27 = vld [vmem:[#allocation10 + $0x668] ss:$24 sps:$4 sm:$0xff]   ;;  %v6724_v28 = vld [vmem:[#allocation10 + $0x39c] ss:$24 sps:$4 sm:$0xff]  }
 0x11a   :  { %2362 = vmatprep.subr.bf16.mxu1 %v6643_v29  ;;  %v6727_v29 = vld [vmem:[#allocation10 + $0x69c] ss:$24 sps:$4 sm:$0xff]  }
 0x11c   :  { %2322 = vmatpush1.bf16.msra.mxu0 %v6638_v30  ;;  %v6722_v30 = vld [vmem:[#allocation10 + $0x398] ss:$24 sps:$4 sm:$0xff]  }
 0x11d   :  { %2363 = vmatpush1.bf16.msra.mxu1 %v6641_v31  ;;  %2323 = vmatprep.subr.bf16.mxu0 %v6646_v32  ;;  %v6725_v31 = vld [vmem:[#allocation10 + $0x698] ss:$24 sps:$4 sm:$0xff]   ;;  %v6730_v32 = vld [vmem:[#allocation10 + $0x3cc] ss:$24 sps:$4 sm:$0xff]  }
 0x11e   :  { %2364 = vmatprep.subr.bf16.mxu1 %v6649_v33  ;;  %v6733_v33 = vld [vmem:[#allocation10 + $0x6cc] ss:$24 sps:$4 sm:$0xff]  }
 0x120   :  { %2324 = vmatpush1.bf16.msra.mxu0 %v6644_v36  ;;  %v6731_v36 = vld [vmem:[#allocation10 + $0x6c8] ss:$24 sps:$4 sm:$0xff]  }
 0x121   :  { %2365 = vmatpush1.bf16.msra.mxu1 %v6647_v37  ;;  %2325 = vmatprep.subr.bf16.mxu0 %v6652_v38  ;;  %v6736_v37 = vld [vmem:[#allocation10 + $0x3fc] ss:$24 sps:$4 sm:$0xff]  }
 0x122   :  { %2366 = vmatprep.subr.bf16.mxu1 %v6655_v39  ;;  %v6739_v38 = vld [vmem:[#allocation10 + $0x6fc] ss:$24 sps:$4 sm:$0xff]   ;;  %v6734_v39 = vld [vmem:[#allocation10 + $0x3f8] ss:$24 sps:$4 sm:$0xff]  }
 0x124   :  { %2326 = vmatpush1.bf16.msra.mxu0 %v6650_v40  ;;  %v6737_v40 = vld [vmem:[#allocation10 + $0x6f8] ss:$24 sps:$4 sm:$0xff]  }
 0x125   :  { %2367 = vmatpush1.bf16.msra.mxu1 %v6653_v41  ;;  %2327 = vmatprep.subr.bf16.mxu0 %v6658_v42  ;;  %v6742_v41 = vld [vmem:[#allocation10 + $0x42c] ss:$24 sps:$4 sm:$0xff]  }
 0x126   :  { %2368 = vmatprep.subr.bf16.mxu1 %v6661_v43  ;;  %v6745_v42 = vld [vmem:[#allocation10 + $0x72c] ss:$24 sps:$4 sm:$0xff]   ;;  %v6740_v43 = vld [vmem:[#allocation10 + $0x428] ss:$24 sps:$4 sm:$0xff]  }
 0x128   :  { %2328 = vmatpush1.bf16.msra.mxu0 %v6656_v44  ;;  %v6743_v44 = vld [vmem:[#allocation10 + $0x728] ss:$24 sps:$4 sm:$0xff]  }
 0x129   :  { %2369 = vmatpush1.bf16.msra.mxu1 %v6659_v45  ;;  %2329 = vmatprep.subr.bf16.mxu0 %v6664_v46  ;;  %v6748_v45 = vld [vmem:[#allocation10 + $0x45c] ss:$24 sps:$4 sm:$0xff]  }
 0x12a   :  { %2370 = vmatprep.subr.bf16.mxu1 %v6667_v47  ;;  %v6751_v46 = vld [vmem:[#allocation10 + $0x75c] ss:$24 sps:$4 sm:$0xff]   ;;  %v6746_v47 = vld [vmem:[#allocation10 + $0x458] ss:$24 sps:$4 sm:$0xff]  }
 0x12c   :  { %2330 = vmatpush1.bf16.msra.mxu0 %v6662_v48  ;;  %v6749_v48 = vld [vmem:[#allocation10 + $0x758] ss:$24 sps:$4 sm:$0xff]  }
 0x12d   :  { %2371 = vmatpush1.bf16.msra.mxu1 %v6665_v50  ;;  %2331 = vmatprep.subr.bf16.mxu0 %v6670_v51  ;;  %v6754_v50 = vld [vmem:[#allocation10 + $0x48c] ss:$24 sps:$4 sm:$0xff]  }
 0x12e   :  { %2372 = vmatprep.subr.bf16.mxu1 %v6673_v53  ;;  %v6757_v51 = vld [vmem:[#allocation10 + $0x78c] ss:$24 sps:$4 sm:$0xff]   ;;  %v6752_v53 = vld [vmem:[#allocation10 + $0x488] ss:$24 sps:$4 sm:$0xff]  }
 0x130   :  { %2332 = vmatpush1.bf16.msra.mxu0 %v6668_v54  ;;  %v6755_v54 = vld [vmem:[#allocation10 + $0x788] ss:$24 sps:$4 sm:$0xff]  }
 0x131   :  { %2373 = vmatpush1.bf16.msra.mxu1 %v6671_v55  ;;  %2333 = vmatprep.subr.bf16.mxu0 %v6676_v56  ;;  %v6760_v55 = vld [vmem:[#allocation10 + $0x4bc] ss:$24 sps:$4 sm:$0xff]  }
 0x132   :  { %2374 = vmatprep.subr.bf16.mxu1 %v6679_v57  ;;  %v6763_v56 = vld [vmem:[#allocation10 + $0x7bc] ss:$24 sps:$4 sm:$0xff]   ;;  %v6758_v57 = vld [vmem:[#allocation10 + $0x4b8] ss:$24 sps:$4 sm:$0xff]  }
 0x134   :  { %2334 = vmatpush1.bf16.msra.mxu0 %v6674_v58  ;;  %v6761_v58 = vld [vmem:[#allocation10 + $0x7b8] ss:$24 sps:$4 sm:$0xff]  }
 0x135   :  { %2375 = vmatpush1.bf16.msra.mxu1 %v6677_v59  ;;  %2335 = vmatprep.subr.bf16.mxu0 %v6682_v60  ;;  %v6766_v59 = vld [vmem:[#allocation10 + $0x4ec] ss:$24 sps:$4 sm:$0xff]  }
 0x136   :  { %2376 = vmatprep.subr.bf16.mxu1 %v6685_v61  ;;  %v6769_v60 = vld [vmem:[#allocation10 + $0x7ec] ss:$24 sps:$4 sm:$0xff]   ;;  %v6764_v61 = vld [vmem:[#allocation10 + $0x4e8] ss:$24 sps:$4 sm:$0xff]  }
 0x138   :  { %2336 = vmatpush1.bf16.msra.mxu0 %v6680_v62  ;;  %v6767_v62 = vld [vmem:[#allocation10 + $0x7e8] ss:$24 sps:$4 sm:$0xff]  }
 0x139   :  { %2377 = vmatpush1.bf16.msra.mxu1 %v6683_v63  ;;  %2337 = vmatprep.subr.bf16.mxu0 %v6688_v0  ;;  %v6772_v63 = vld [vmem:[#allocation10 + $0x51c] ss:$24 sps:$4 sm:$0xff]  }
 0x13a   :  { %2378 = vmatprep.subr.bf16.mxu1 %v6691_v1  ;;  %v6775_v0 = vld [vmem:[#allocation10 + $0x81c] ss:$24 sps:$4 sm:$0xff]   ;;  %v6770_v1 = vld [vmem:[#allocation10 + $0x518] ss:$24 sps:$4 sm:$0xff]  }
 0x13c   :  { %2338 = vmatpush1.bf16.msra.mxu0 %v6686_v2  ;;  %v6773_v2 = vld [vmem:[#allocation10 + $0x818] ss:$24 sps:$4 sm:$0xff]  }
 0x13d   :  { %2379 = vmatpush1.bf16.msra.mxu1 %v6689_v3  ;;  %2339 = vmatprep.subr.bf16.mxu0 %v6694_v4  ;;  %v6778_v3 = vld [vmem:[#allocation10 + $0x54c] ss:$24 sps:$4 sm:$0xff]  }
 0x13e   :  { %2380 = vmatprep.subr.bf16.mxu1 %v6697_v5  ;;  %v6781_v4 = vld [vmem:[#allocation10 + $0x84c] ss:$24 sps:$4 sm:$0xff]   ;;  %v6776_v5 = vld [vmem:[#allocation10 + $0x548] ss:$24 sps:$4 sm:$0xff]  }
 0x140   :  { %2340 = vmatpush1.bf16.msra.mxu0 %v6692_v6  ;;  %v6779_v6 = vld [vmem:[#allocation10 + $0x848] ss:$24 sps:$4 sm:$0xff]  }
 0x141   :  { %2381 = vmatpush1.bf16.msra.mxu1 %v6695_v7  ;;  %2341 = vmatprep.subr.bf16.mxu0 %v6700_v10  ;;  %v6784_v7 = vld [vmem:[#allocation10 + $0x57c] ss:$24 sps:$4 sm:$0xff]  }
 0x142   :  { %2382 = vmatprep.subr.bf16.mxu1 %v6703_v11  ;;  %v6787_v10 = vld [vmem:[#allocation10 + $0x87c] ss:$24 sps:$4 sm:$0xff]   ;;  %v6782_v11 = vld [vmem:[#allocation10 + $0x578] ss:$24 sps:$4 sm:$0xff]  }
 0x144   :  { %2342 = vmatpush1.bf16.msra.mxu0 %v6698_v12  ;;  %v6785_v12 = vld [vmem:[#allocation10 + $0x878] ss:$24 sps:$4 sm:$0xff]  }
 0x145   :  { %2383 = vmatpush1.bf16.msra.mxu1 %v6701_v13  ;;  %2393 = vmatprep.subr.bf16.mxu0 %v6706_v15  ;;  %v6790_v13 = vld [vmem:[#allocation10 + $0x5ac] ss:$24 sps:$4 sm:$0xff]   ;;  %v6788_v15 = vld [vmem:[#allocation10 + $0x5a8] ss:$24 sps:$4 sm:$0xff]  }
 0x146   :  { %2434 = vmatprep.subr.bf16.mxu1 %v6709_v16  ;;  %v6791_v16 = vld [vmem:[#allocation10 + $0x8a8] ss:$24 sps:$4 sm:$0xff]  }
 0x147   :  { %2344 = vmatmul.mubr.bf16.vlgmr.msra.gmra.mrb[4].mxu0 %v8002_v17 }
 0x148   :  { %2385 = vmatmul.mubr.bf16.vlgmr.msra.gmra.mrb[4].mxu1 %v7992_v8  ;;  %2394 = vmatpush1.bf16.msra.mxu0 %v6704_v18  ;;  %v6796_v18 = vld [vmem:[#allocation10 + $0x5dc] ss:$24 sps:$4 sm:$0xff]  }
 0x149   :  { %2435 = vmatpush1.bf16.msra.mxu1 %v6707_v19  ;;  %2395 = vmatprep.subr.bf16.mxu0 %v6712_v20  ;;  %v6799_v19 = vld [vmem:[#allocation10 + $0x8dc] ss:$24 sps:$4 sm:$0xff]   ;;  %v6794_v20 = vld [vmem:[#allocation10 + $0x5d8] ss:$24 sps:$4 sm:$0xff]  }
 0x14a   :  { %2436 = vmatprep.subr.bf16.mxu1 %v6715_v21  ;;  %2425 = vmatprep.mubr.bf16.mxu0 %v7988_v52  ;;  %v6797_v21 = vld [vmem:[#allocation10 + $0x8d8] ss:$24 sps:$4 sm:$0xff]  }
 0x14b   :  { %2466 = vmatprep.mubr.bf16.mxu1 %v7999_v35 }
 0x14c   :  { %2396 = vmatpush1.bf16.msra.mxu0 %v6710_v22  ;;  %v6802_v22 = vld [vmem:[#allocation10 + $0x14] ss:$24 sps:$4 sm:$0xff]  }
 0x14d   :  { %2437 = vmatpush1.bf16.msra.mxu1 %v6713_v23  ;;  %2397 = vmatprep.subr.bf16.mxu0 %v6718_v24  ;;  %v6805_v23 = vld [vmem:[#allocation10 + $0x314] ss:$24 sps:$4 sm:$0xff]   ;;  %v6800_v24 = vld [vmem:[#allocation10 + $0x10] ss:$24 sps:$4 sm:$0xff]  }
 0x14e   :  { %2438 = vmatprep.subr.bf16.mxu1 %v6721_v25  ;;  %v6803_v25 = vld [vmem:[#allocation10 + $0x310] ss:$24 sps:$4 sm:$0xff]  }
 0x150   :  { %2398 = vmatpush1.bf16.msra.mxu0 %v6716_v26  ;;  %v6808_v26 = vld [vmem:[#allocation10 + $0x44] ss:$24 sps:$4 sm:$0xff]  }
 0x151   :  { %2439 = vmatpush1.bf16.msra.mxu1 %v6719_v27  ;;  %2399 = vmatprep.subr.bf16.mxu0 %v6724_v28  ;;  %v6811_v27 = vld [vmem:[#allocation10 + $0x344] ss:$24 sps:$4 sm:$0xff]   ;;  %v6806_v28 = vld [vmem:[#allocation10 + $0x40] ss:$24 sps:$4 sm:$0xff]  }
 0x152   :  { %2440 = vmatprep.subr.bf16.mxu1 %v6727_v29  ;;  %v6809_v29 = vld [vmem:[#allocation10 + $0x340] ss:$24 sps:$4 sm:$0xff]  }
 0x154   :  { %2400 = vmatpush1.bf16.msra.mxu0 %v6722_v30  ;;  %v6814_v30 = vld [vmem:[#allocation10 + $0x74] ss:$24 sps:$4 sm:$0xff]  }
 0x155   :  { %2441 = vmatpush1.bf16.msra.mxu1 %v6725_v31  ;;  %2401 = vmatprep.subr.bf16.mxu0 %v6730_v32  ;;  %v6817_v31 = vld [vmem:[#allocation10 + $0x374] ss:$24 sps:$4 sm:$0xff]   ;;  %v6812_v32 = vld [vmem:[#allocation10 + $0x70] ss:$24 sps:$4 sm:$0xff]  }
 0x156   :  { %2442 = vmatprep.subr.bf16.mxu1 %v6733_v33  ;;  %v6815_v33 = vld [vmem:[#allocation10 + $0x370] ss:$24 sps:$4 sm:$0xff]  }
 0x158   :  { %2402 = vmatpush1.bf16.msra.mxu0 %v6728_v34  ;;  %v6820_v34 = vld [vmem:[#allocation10 + $0xa4] ss:$24 sps:$4 sm:$0xff]  }
 0x159   :  { %2443 = vmatpush1.bf16.msra.mxu1 %v6731_v36  ;;  %2403 = vmatprep.subr.bf16.mxu0 %v6736_v37  ;;  %v6823_v36 = vld [vmem:[#allocation10 + $0x3a4] ss:$24 sps:$4 sm:$0xff]   ;;  %v6818_v37 = vld [vmem:[#allocation10 + $0xa0] ss:$24 sps:$4 sm:$0xff]  }
 0x15a   :  { %2444 = vmatprep.subr.bf16.mxu1 %v6739_v38  ;;  %v6821_v38 = vld [vmem:[#allocation10 + $0x3a0] ss:$24 sps:$4 sm:$0xff]  }
 0x15c   :  { %2404 = vmatpush1.bf16.msra.mxu0 %v6734_v39  ;;  %v6826_v39 = vld [vmem:[#allocation10 + $0xd4] ss:$24 sps:$4 sm:$0xff]  }
 0x15d   :  { %2445 = vmatpush1.bf16.msra.mxu1 %v6737_v40  ;;  %2405 = vmatprep.subr.bf16.mxu0 %v6742_v41  ;;  %v6829_v40 = vld [vmem:[#allocation10 + $0x3d4] ss:$24 sps:$4 sm:$0xff]   ;;  %v6832_v41 = vld [vmem:[#allocation10 + $0x104] ss:$24 sps:$4 sm:$0xff]  }
 0x15e   :  { %2446 = vmatprep.subr.bf16.mxu1 %v6745_v42  ;;  %v6835_v42 = vld [vmem:[#allocation10 + $0x404] ss:$24 sps:$4 sm:$0xff]  }
 0x160   :  { %2406 = vmatpush1.bf16.msra.mxu0 %v6740_v43  ;;  %v6830_v43 = vld [vmem:[#allocation10 + $0x100] ss:$24 sps:$4 sm:$0xff]  }
 0x161   :  { %2447 = vmatpush1.bf16.msra.mxu1 %v6743_v44  ;;  %2407 = vmatprep.subr.bf16.mxu0 %v6748_v45  ;;  %v6833_v44 = vld [vmem:[#allocation10 + $0x400] ss:$24 sps:$4 sm:$0xff]   ;;  %v6838_v45 = vld [vmem:[#allocation10 + $0x134] ss:$24 sps:$4 sm:$0xff]  }
 0x162   :  { %2448 = vmatprep.subr.bf16.mxu1 %v6751_v46  ;;  %v6841_v46 = vld [vmem:[#allocation10 + $0x434] ss:$24 sps:$4 sm:$0xff]  }
 0x164   :  { %2408 = vmatpush1.bf16.msra.mxu0 %v6746_v47  ;;  %v6836_v47 = vld [vmem:[#allocation10 + $0x130] ss:$24 sps:$4 sm:$0xff]  }
 0x165   :  { %2449 = vmatpush1.bf16.msra.mxu1 %v6749_v48  ;;  %2409 = vmatprep.subr.bf16.mxu0 %v6754_v50  ;;  %v6839_v48 = vld [vmem:[#allocation10 + $0x430] ss:$24 sps:$4 sm:$0xff]   ;;  %v6844_v50 = vld [vmem:[#allocation10 + $0x164] ss:$24 sps:$4 sm:$0xff]  }
 0x166   :  { %2450 = vmatprep.subr.bf16.mxu1 %v6757_v51  ;;  %v6847_v51 = vld [vmem:[#allocation10 + $0x464] ss:$24 sps:$4 sm:$0xff]  }
 0x168   :  { %2410 = vmatpush1.bf16.msra.mxu0 %v6752_v53  ;;  %v6842_v53 = vld [vmem:[#allocation10 + $0x160] ss:$24 sps:$4 sm:$0xff]  }
 0x169   :  { %2451 = vmatpush1.bf16.msra.mxu1 %v6755_v54  ;;  %2411 = vmatprep.subr.bf16.mxu0 %v6760_v55  ;;  %v6845_v54 = vld [vmem:[#allocation10 + $0x460] ss:$24 sps:$4 sm:$0xff]   ;;  %v6850_v55 = vld [vmem:[#allocation10 + $0x194] ss:$24 sps:$4 sm:$0xff]  }
 0x16a   :  { %2452 = vmatprep.subr.bf16.mxu1 %v6763_v56  ;;  %v6853_v56 = vld [vmem:[#allocation10 + $0x494] ss:$24 sps:$4 sm:$0xff]  }
 0x16c   :  { %2412 = vmatpush1.bf16.msra.mxu0 %v6758_v57  ;;  %v6848_v57 = vld [vmem:[#allocation10 + $0x190] ss:$24 sps:$4 sm:$0xff]  }
 0x16d   :  { %2453 = vmatpush1.bf16.msra.mxu1 %v6761_v58  ;;  %2413 = vmatprep.subr.bf16.mxu0 %v6766_v59  ;;  %v6851_v58 = vld [vmem:[#allocation10 + $0x490] ss:$24 sps:$4 sm:$0xff]   ;;  %v6856_v59 = vld [vmem:[#allocation10 + $0x1c4] ss:$24 sps:$4 sm:$0xff]  }
 0x16e   :  { %2454 = vmatprep.subr.bf16.mxu1 %v6769_v60  ;;  %v6859_v60 = vld [vmem:[#allocation10 + $0x4c4] ss:$24 sps:$4 sm:$0xff]  }
 0x170   :  { %2414 = vmatpush1.bf16.msra.mxu0 %v6764_v61  ;;  %v6854_v61 = vld [vmem:[#allocation10 + $0x1c0] ss:$24 sps:$4 sm:$0xff]  }
 0x171   :  { %2455 = vmatpush1.bf16.msra.mxu1 %v6767_v62  ;;  %2415 = vmatprep.subr.bf16.mxu0 %v6772_v63  ;;  %v6857_v62 = vld [vmem:[#allocation10 + $0x4c0] ss:$24 sps:$4 sm:$0xff]   ;;  %v6862_v63 = vld [vmem:[#allocation10 + $0x1f4] ss:$24 sps:$4 sm:$0xff]  }
 0x172   :  { %2456 = vmatprep.subr.bf16.mxu1 %v6775_v0  ;;  %v6865_v0 = vld [vmem:[#allocation10 + $0x4f4] ss:$24 sps:$4 sm:$0xff]  }
 0x174   :  { %2416 = vmatpush1.bf16.msra.mxu0 %v6770_v1  ;;  %v6860_v1 = vld [vmem:[#allocation10 + $0x1f0] ss:$24 sps:$4 sm:$0xff]  }
 0x175   :  { %2457 = vmatpush1.bf16.msra.mxu1 %v6773_v2  ;;  %2417 = vmatprep.subr.bf16.mxu0 %v6778_v3  ;;  %v6863_v2 = vld [vmem:[#allocation10 + $0x4f0] ss:$24 sps:$4 sm:$0xff]   ;;  %v6868_v3 = vld [vmem:[#allocation10 + $0x224] ss:$24 sps:$4 sm:$0xff]  }
 0x176   :  { %2458 = vmatprep.subr.bf16.mxu1 %v6781_v4  ;;  %v6871_v4 = vld [vmem:[#allocation10 + $0x524] ss:$24 sps:$4 sm:$0xff]  }
 0x178   :  { %2418 = vmatpush1.bf16.msra.mxu0 %v6776_v5  ;;  %v6866_v5 = vld [vmem:[#allocation10 + $0x220] ss:$24 sps:$4 sm:$0xff]  }
 0x179   :  { %2459 = vmatpush1.bf16.msra.mxu1 %v6779_v6  ;;  %2419 = vmatprep.subr.bf16.mxu0 %v6784_v7  ;;  %v6869_v6 = vld [vmem:[#allocation10 + $0x520] ss:$24 sps:$4 sm:$0xff]   ;;  %v6874_v7 = vld [vmem:[#allocation10 + $0x254] ss:$24 sps:$4 sm:$0xff]  }
 0x17a   :  { %2460 = vmatprep.subr.bf16.mxu1 %v6787_v10  ;;  %v6877_v10 = vld [vmem:[#allocation10 + $0x554] ss:$24 sps:$4 sm:$0xff]  }
 0x17c   :  { %2420 = vmatpush1.bf16.msra.mxu0 %v6782_v11  ;;  %v6872_v11 = vld [vmem:[#allocation10 + $0x250] ss:$24 sps:$4 sm:$0xff]  }
 0x17d   :  { %2461 = vmatpush1.bf16.msra.mxu1 %v6785_v12  ;;  %2421 = vmatprep.subr.bf16.mxu0 %v6790_v13  ;;  %v6875_v12 = vld [vmem:[#allocation10 + $0x550] ss:$24 sps:$4 sm:$0xff]   ;;  %v6880_v13 = vld [vmem:[#allocation10 + $0x284] ss:$24 sps:$4 sm:$0xff]  }
 0x17e   :  { %2462 = vmatprep.subr.bf16.mxu1 %v6793_v14  ;;  %v6883_v14 = vld [vmem:[#allocation10 + $0x584] ss:$24 sps:$4 sm:$0xff]  }
 0x180   :  { %2422 = vmatpush1.bf16.msra.mxu0 %v6788_v15  ;;  %v6878_v15 = vld [vmem:[#allocation10 + $0x280] ss:$24 sps:$4 sm:$0xff]  }
 0x181   :  { %2463 = vmatpush1.bf16.msra.mxu1 %v6791_v16  ;;  %2423 = vmatprep.subr.bf16.mxu0 %v6796_v18  ;;  %v6881_v16 = vld [vmem:[#allocation10 + $0x580] ss:$24 sps:$4 sm:$0xff]   ;;  %v6886_v18 = vld [vmem:[#allocation10 + $0x2b4] ss:$24 sps:$4 sm:$0xff]  }
 0x182   :  { %2464 = vmatprep.subr.bf16.mxu1 %v6799_v19  ;;  %v6889_v19 = vld [vmem:[#allocation10 + $0x5b4] ss:$24 sps:$4 sm:$0xff]  }
 0x184   :  { %2424 = vmatpush1.bf16.msra.mxu0 %v6794_v20  ;;  %v6884_v20 = vld [vmem:[#allocation10 + $0x2b0] ss:$24 sps:$4 sm:$0xff]  }
 0x185   :  { %2465 = vmatpush1.bf16.msra.mxu1 %v6797_v21  ;;  %2475 = vmatprep.subr.bf16.mxu0 %v6802_v22  ;;  %v6887_v21 = vld [vmem:[#allocation10 + $0x5b0] ss:$24 sps:$4 sm:$0xff]   ;;  %v6892_v22 = vld [vmem:[#allocation10 + $0x2e4] ss:$24 sps:$4 sm:$0xff]  }
 0x186   :  { %2516 = vmatprep.subr.bf16.mxu1 %v6805_v23  ;;  %v6895_v23 = vld [vmem:[#allocation10 + $0x5e4] ss:$24 sps:$4 sm:$0xff]  }
 0x187   :  { %2426 = vmatmul.mubr.bf16.vlgmr.msra.gmra.mrb[8].mxu0 %v7994_v9 }
 0x188   :  { %2467 = vmatmul.mubr.bf16.vlgmr.msra.gmra.mrb[8].mxu1 %v8002_v17  ;;  %2476 = vmatpush1.bf16.msra.mxu0 %v6800_v24  ;;  %v6890_v24 = vld [vmem:[#allocation10 + $0x2e0] ss:$24 sps:$4 sm:$0xff]  }
 0x189   :  { %2517 = vmatpush1.bf16.msra.mxu1 %v6803_v25  ;;  %2477 = vmatprep.subr.bf16.mxu0 %v6808_v26  ;;  %v6893_v25 = vld [vmem:[#allocation10 + $0x5e0] ss:$24 sps:$4 sm:$0xff]   ;;  %v6898_v26 = vld [vmem:[#allocation10 + $0x614] ss:$24 sps:$4 sm:$0xff]  }
 0x18a   :  { %2518 = vmatprep.subr.bf16.mxu1 %v6811_v27  ;;  %2507 = vmatprep.mubr.bf16.mxu0 %v7986_v49  ;;  %v6824_v49 = vld [vmem:[#allocation10 + $0xd0] ss:$24 sps:$4 sm:$0xff]   ;;  %v6901_v27 = vld [vmem:[#allocation8 + $0x4] ss:$24 sps:$4 sm:$0xff]  }
 0x18b   :  { %2548 = vmatprep.mubr.bf16.mxu1 %v7988_v52  ;;  %v6827_v52 = vld [vmem:[#allocation10 + $0x3d0] ss:$24 sps:$4 sm:$0xff]  }
 0x18c   :  { %2478 = vmatpush1.bf16.msra.mxu0 %v6806_v28  ;;  %v6896_v28 = vld [vmem:[#allocation10 + $0x610] ss:$24 sps:$4 sm:$0xff]  }
 0x18d   :  { %2519 = vmatpush1.bf16.msra.mxu1 %v6809_v29  ;;  %2479 = vmatprep.subr.bf16.mxu0 %v6814_v30  ;;  %v6899_v29 = vld [vmem:[#allocation8] ss:$24 sps:$4 sm:$0xff]   ;;  %v190_v30 = vld [vmem:[#allocation5 + $0x8] sm:$0xff] }
 0x18e   :  { %2520 = vmatprep.subr.bf16.mxu1 %v6817_v31  ;;  %v6904_v31 = vld [vmem:[#allocation10 + $0x644] ss:$24 sps:$4 sm:$0xff]  }
 0x190   :  { %2480 = vmatpush1.bf16.msra.mxu0 %v6812_v32  ;;  %v6907_v32 = vld [vmem:[#allocation8 + $0x34] ss:$24 sps:$4 sm:$0xff]  }
 0x191   :  { %2521 = vmatpush1.bf16.msra.mxu1 %v6815_v33  ;;  %2481 = vmatprep.subr.bf16.mxu0 %v6820_v34  ;;  %v8012_v33 = vpack.c.bf16 %v190_v30, %v190_v30  ;;  %v6902_v34 = vld [vmem:[#allocation10 + $0x640] ss:$24 sps:$4 sm:$0xff]   ;;  %v6977_v30 = vld [vmem:[#allocation8 + $0x270] ss:$24 sps:$4 sm:$0xff]  }
 0x192   :  { %2522 = vmatprep.subr.bf16.mxu1 %v6823_v36  ;;  %v6905_v36 = vld [vmem:[#allocation8 + $0x30] ss:$24 sps:$4 sm:$0xff]  }
 0x194   :  { %2482 = vmatpush1.bf16.msra.mxu0 %v6818_v37  ;;  %v6910_v37 = vld [vmem:[#allocation10 + $0x674] ss:$24 sps:$4 sm:$0xff]  }
 0x195   :  { %2523 = vmatpush1.bf16.msra.mxu1 %v6821_v38  ;;  %2483 = vmatprep.subr.bf16.mxu0 %v6826_v39  ;;  %v6913_v38 = vld [vmem:[#allocation8 + $0x64] ss:$24 sps:$4 sm:$0xff]   ;;  %v6908_v39 = vld [vmem:[#allocation10 + $0x670] ss:$24 sps:$4 sm:$0xff]  }
 0x196   :  { %2524 = vmatprep.subr.bf16.mxu1 %v6829_v40  ;;  %v6911_v40 = vld [vmem:[#allocation8 + $0x60] ss:$24 sps:$4 sm:$0xff]  }
 0x198   :  { %2484 = vmatpush1.bf16.msra.mxu0 %v6824_v49  ;;  %v6916_v49 = vld [vmem:[#allocation10 + $0x6a4] ss:$24 sps:$4 sm:$0xff]  }
 0x199   :  { %2525 = vmatpush1.bf16.msra.mxu1 %v6827_v52  ;;  %2485 = vmatprep.subr.bf16.mxu0 %v6832_v41  ;;  %v6917_v52 = vld [vmem:[#allocation8 + $0x90] ss:$24 sps:$4 sm:$0xff]   ;;  %v6922_v41 = vld [vmem:[#allocation10 + $0x6d4] ss:$24 sps:$4 sm:$0xff]  }
 0x19a   :  { %2526 = vmatprep.subr.bf16.mxu1 %v6835_v42  ;;  %v6925_v42 = vld [vmem:[#allocation8 + $0xc4] ss:$24 sps:$4 sm:$0xff]  }
 0x19c   :  { %2486 = vmatpush1.bf16.msra.mxu0 %v6830_v43  ;;  %v6923_v43 = vld [vmem:[#allocation8 + $0xc0] ss:$24 sps:$4 sm:$0xff]  }
 0x19d   :  { %2527 = vmatpush1.bf16.msra.mxu1 %v6833_v44  ;;  %2487 = vmatprep.subr.bf16.mxu0 %v6838_v45  ;;  %v6928_v44 = vld [vmem:[#allocation10 + $0x704] ss:$24 sps:$4 sm:$0xff]   ;;  %v6931_v45 = vld [vmem:[#allocation8 + $0xf4] ss:$24 sps:$4 sm:$0xff]  }
 0x19e   :  { %2528 = vmatprep.subr.bf16.mxu1 %v6841_v46  ;;  %v6926_v46 = vld [vmem:[#allocation10 + $0x700] ss:$24 sps:$4 sm:$0xff]  }
 0x1a0   :  { %2488 = vmatpush1.bf16.msra.mxu0 %v6836_v47  ;;  %v6929_v47 = vld [vmem:[#allocation8 + $0xf0] ss:$24 sps:$4 sm:$0xff]  }
 0x1a1   :  { %2529 = vmatpush1.bf16.msra.mxu1 %v6839_v48  ;;  %2489 = vmatprep.subr.bf16.mxu0 %v6844_v50  ;;  %v6934_v48 = vld [vmem:[#allocation10 + $0x734] ss:$24 sps:$4 sm:$0xff]   ;;  %v6937_v50 = vld [vmem:[#allocation8 + $0x124] ss:$24 sps:$4 sm:$0xff]  }
 0x1a2   :  { %2530 = vmatprep.subr.bf16.mxu1 %v6847_v51 }
 0x1a4   :  { %2490 = vmatpush1.bf16.msra.mxu0 %v6842_v53 }
 0x1a5   :  { %2531 = vmatpush1.bf16.msra.mxu1 %v6845_v54  ;;  %2491 = vmatprep.subr.bf16.mxu0 %v6850_v55  ;;  %v6932_v54 = vld [vmem:[#allocation10 + $0x730] ss:$24 sps:$4 sm:$0xff]   ;;  %v6935_v55 = vld [vmem:[#allocation8 + $0x120] ss:$24 sps:$4 sm:$0xff]  }
 0x1a6   :  { %2532 = vmatprep.subr.bf16.mxu1 %v6853_v56 }
 0x1a8   :  { %2492 = vmatpush1.bf16.msra.mxu0 %v6848_v57 }
 0x1a9   :  { %2533 = vmatpush1.bf16.msra.mxu1 %v6851_v58  ;;  %2493 = vmatprep.subr.bf16.mxu0 %v6856_v59 }
 0x1aa   :  { %2534 = vmatprep.subr.bf16.mxu1 %v6859_v60 }
 0x1ac   :  { %2494 = vmatpush1.bf16.msra.mxu0 %v6854_v61 }
 0x1ad   :  { %2535 = vmatpush1.bf16.msra.mxu1 %v6857_v62  ;;  %2495 = vmatprep.subr.bf16.mxu0 %v6862_v63 }
 0x1ae   :  { %2536 = vmatprep.subr.bf16.mxu1 %v6865_v0  ;;  %v6940_v0 = vld [vmem:[#allocation10 + $0x764] ss:$24 sps:$4 sm:$0xff]  }
 0x1b0   :  { %2496 = vmatpush1.bf16.msra.mxu0 %v6860_v1  ;;  %v6943_v1 = vld [vmem:[#allocation8 + $0x154] ss:$24 sps:$4 sm:$0xff]  }
 0x1b1   :  { %2537 = vmatpush1.bf16.msra.mxu1 %v6863_v2  ;;  %2497 = vmatprep.subr.bf16.mxu0 %v6868_v3  ;;  %v6938_v2 = vld [vmem:[#allocation10 + $0x760] ss:$24 sps:$4 sm:$0xff]   ;;  %v6941_v3 = vld [vmem:[#allocation8 + $0x150] ss:$24 sps:$4 sm:$0xff]  }
 0x1b2   :  { %2538 = vmatprep.subr.bf16.mxu1 %v6871_v4  ;;  %v6946_v4 = vld [vmem:[#allocation10 + $0x794] ss:$24 sps:$4 sm:$0xff]  }
 0x1b4   :  { %2498 = vmatpush1.bf16.msra.mxu0 %v6866_v5  ;;  %v6949_v5 = vld [vmem:[#allocation8 + $0x184] ss:$24 sps:$4 sm:$0xff]  }
 0x1b5   :  { %2539 = vmatpush1.bf16.msra.mxu1 %v6869_v6  ;;  %2499 = vmatprep.subr.bf16.mxu0 %v6874_v7  ;;  %v6944_v6 = vld [vmem:[#allocation10 + $0x790] ss:$24 sps:$4 sm:$0xff]   ;;  %v6947_v7 = vld [vmem:[#allocation8 + $0x180] ss:$24 sps:$4 sm:$0xff]  }
 0x1b6   :  { %2540 = vmatprep.subr.bf16.mxu1 %v6877_v10  ;;  %v6952_v10 = vld [vmem:[#allocation10 + $0x7c4] ss:$24 sps:$4 sm:$0xff]  }
 0x1b8   :  { %2500 = vmatpush1.bf16.msra.mxu0 %v6872_v11  ;;  %v6955_v11 = vld [vmem:[#allocation8 + $0x1b4] ss:$24 sps:$4 sm:$0xff]  }
 0x1b9   :  { %2541 = vmatpush1.bf16.msra.mxu1 %v6875_v12  ;;  %2501 = vmatprep.subr.bf16.mxu0 %v6880_v13  ;;  %v6950_v12 = vld [vmem:[#allocation10 + $0x7c0] ss:$24 sps:$4 sm:$0xff]   ;;  %v6953_v13 = vld [vmem:[#allocation8 + $0x1b0] ss:$24 sps:$4 sm:$0xff]  }
 0x1ba   :  { %2542 = vmatprep.subr.bf16.mxu1 %v6883_v14  ;;  %v6958_v14 = vld [vmem:[#allocation10 + $0x7f4] ss:$24 sps:$4 sm:$0xff]  }
 0x1bc   :  { %2502 = vmatpush1.bf16.msra.mxu0 %v6878_v15  ;;  %v6961_v15 = vld [vmem:[#allocation8 + $0x1e4] ss:$24 sps:$4 sm:$0xff]  }
 0x1bd   :  { %2543 = vmatpush1.bf16.msra.mxu1 %v6881_v16  ;;  %2503 = vmatprep.subr.bf16.mxu0 %v6886_v18  ;;  %v6956_v16 = vld [vmem:[#allocation10 + $0x7f0] ss:$24 sps:$4 sm:$0xff]   ;;  %v6959_v18 = vld [vmem:[#allocation8 + $0x1e0] ss:$24 sps:$4 sm:$0xff]  }
 0x1be   :  { %2544 = vmatprep.subr.bf16.mxu1 %v6889_v19  ;;  %v6964_v19 = vld [vmem:[#allocation10 + $0x824] ss:$24 sps:$4 sm:$0xff]  }
 0x1c0   :  { %2504 = vmatpush1.bf16.msra.mxu0 %v6884_v20  ;;  %v6967_v20 = vld [vmem:[#allocation8 + $0x214] ss:$24 sps:$4 sm:$0xff]  }
 0x1c1   :  { %2545 = vmatpush1.bf16.msra.mxu1 %v6887_v21  ;;  %2505 = vmatprep.subr.bf16.mxu0 %v6892_v22  ;;  %v6962_v21 = vld [vmem:[#allocation10 + $0x820] ss:$24 sps:$4 sm:$0xff]   ;;  %v6965_v22 = vld [vmem:[#allocation8 + $0x210] ss:$24 sps:$4 sm:$0xff]  }
 0x1c2   :  { %2546 = vmatprep.subr.bf16.mxu1 %v6895_v23  ;;  %v6970_v23 = vld [vmem:[#allocation10 + $0x854] ss:$24 sps:$4 sm:$0xff]  }
 0x1c4   :  { %2506 = vmatpush1.bf16.msra.mxu0 %v6890_v24  ;;  %v6973_v24 = vld [vmem:[#allocation8 + $0x244] ss:$24 sps:$4 sm:$0xff]  }
 0x1c5   :  { %2547 = vmatpush1.bf16.msra.mxu1 %v6893_v25  ;;  %2557 = vmatprep.subr.bf16.mxu0 %v6898_v26  ;;  %v6968_v25 = vld [vmem:[#allocation10 + $0x850] ss:$24 sps:$4 sm:$0xff]   ;;  %v6971_v26 = vld [vmem:[#allocation8 + $0x240] ss:$24 sps:$4 sm:$0xff]  }
 0x1c6   :  { %4038 = vmatprep.subr.bf16.mxu1 %v6901_v27  ;;  %v6976_v27 = vld [vmem:[#allocation10 + $0x884] ss:$24 sps:$4 sm:$0xff]  }
 0x1c7   :  { %2508 = vmatmul.mubr.bf16.vlgmr.msra.gmra.mrb[12].mxu0 %v7992_v8  ;;  %v6919_v8 = vld [vmem:[#allocation8 + $0x94] ss:$24 sps:$4 sm:$0xff]  }
 0x1c8   :  { %2549 = vmatmul.mubr.bf16.vlgmr.msra.gmra.mrb[12].mxu1 %v7994_v9  ;;  %2558 = vmatpush1.bf16.msra.mxu0 %v6896_v28  ;;  %v6914_v9 = vld [vmem:[#allocation10 + $0x6a0] ss:$24 sps:$4 sm:$0xff]   ;;  %v6979_v28 = vld [vmem:[#allocation8 + $0x274] ss:$24 sps:$4 sm:$0xff]  }
 0x1c9   :  { %4039 = vmatpush1.bf16.msra.mxu1 %v6899_v29  ;;  %2559 = vmatprep.subr.bf16.mxu0 %v6904_v31  ;;  %v6974_v29 = vld [vmem:[#allocation10 + $0x880] ss:$24 sps:$4 sm:$0xff]   ;;  %v6982_v31 = vld [vmem:[#allocation10 + $0x8b4] ss:$24 sps:$4 sm:$0xff]  }
 0x1ca   :  { %4040 = vmatprep.subr.bf16.mxu1 %v6907_v32  ;;  %2589 = vmatprep.mubr.bf16.mxu0 %v7999_v35  ;;  %v6920_v35 = vld [vmem:[#allocation10 + $0x6d0] ss:$24 sps:$4 sm:$0xff]   ;;  %v6985_v32 = vld [vmem:[#allocation8 + $0x2a4] ss:$24 sps:$4 sm:$0xff]  }
 0x1cb   :  { %4070 = vmatprep.mubr.bf16.mxu1 %v8012_v33 }
 0x1cc   :  { %2560 = vmatpush1.bf16.msra.mxu0 %v6902_v34  ;;  %v6980_v34 = vld [vmem:[#allocation10 + $0x8b0] ss:$24 sps:$4 sm:$0xff]  }
 0x1cd   :  { %4041 = vmatpush1.bf16.msra.mxu1 %v6905_v36  ;;  %2561 = vmatprep.subr.bf16.mxu0 %v6910_v37  ;;  %v6983_v36 = vld [vmem:[#allocation8 + $0x2a0] ss:$24 sps:$4 sm:$0xff]   ;;  %v6988_v37 = vld [vmem:[#allocation10 + $0x8e4] ss:$24 sps:$4 sm:$0xff]  }
 0x1ce   :  { %4042 = vmatprep.subr.bf16.mxu1 %v6913_v38  ;;  %v6991_v38 = vld [vmem:[#allocation8 + $0x2d4] ss:$24 sps:$4 sm:$0xff]  }
 0x1d0   :  { %2562 = vmatpush1.bf16.msra.mxu0 %v6908_v39  ;;  %v6986_v39 = vld [vmem:[#allocation10 + $0x8e0] ss:$24 sps:$4 sm:$0xff]  }
 0x1d1   :  { %4043 = vmatpush1.bf16.msra.mxu1 %v6911_v40  ;;  %2563 = vmatprep.subr.bf16.mxu0 %v6916_v49  ;;  %v6989_v40 = vld [vmem:[#allocation8 + $0x2d0] ss:$24 sps:$4 sm:$0xff]   ;;  %v189_v49 = vld [vmem:[#allocation5] sm:$0xff] }
 0x1d2   :  { %4044 = vmatprep.subr.bf16.mxu1 %v6919_v8  ;;  %v6994_v8 = vld [vmem:[#allocation8 + $0x304] ss:$24 sps:$4 sm:$0xff]  }
 0x1d4   :  { %2564 = vmatpush1.bf16.msra.mxu0 %v6914_v9  ;;  %v6997_v9 = vld [vmem:[#allocation8 + $0x604] ss:$24 sps:$4 sm:$0xff]  }
 0x1d5   :  { %4045 = vmatpush1.bf16.msra.mxu1 %v6917_v52  ;;  %2565 = vmatprep.subr.bf16.mxu0 %v6922_v41  ;;  %v192_v52 = vld [vmem:[#allocation5 + $0x18] sm:$0xff]  ;;  %v194_v41 = vld [vmem:[#allocation5 + $0x28] sm:$0xff] }
 0x1d6   :  { %4046 = vmatprep.subr.bf16.mxu1 %v6925_v42  ;;  %v6992_v42 = vld [vmem:[#allocation8 + $0x300] ss:$24 sps:$4 sm:$0xff]  }
 0x1d8   :  { %2566 = vmatpush1.bf16.msra.mxu0 %v6920_v35  ;;  %v6995_v35 = vld [vmem:[#allocation8 + $0x600] ss:$24 sps:$4 sm:$0xff]  }
 0x1d9   :  { %4047 = vmatpush1.bf16.msra.mxu1 %v6923_v43  ;;  %2567 = vmatprep.subr.bf16.mxu0 %v6928_v44  ;;  %v8022_v43 = vpack.c.bf16 %v189_v49, %v189_v49  ;;  %v7000_v44 = vld [vmem:[#allocation8 + $0x334] ss:$24 sps:$4 sm:$0xff]   ;;  %v7061_v49 = vld [vmem:[#allocation8 + $0x810] ss:$24 sps:$4 sm:$0xff]  }
 0x1da   :  { %4048 = vmatprep.subr.bf16.mxu1 %v6931_v45  ;;  %v2263_v51 = vpop.f32.mrb[0].mxu0  ;;  %v7003_v45 = vld [vmem:[#allocation8 + $0x634] ss:$24 sps:$4 sm:$0xff]  }
 0x1db   :  { %v2304_v53 = vpop.f32.mrb[0].mxu1  ;;  %v2265_v57 = vpop.f32.mrb[1].mxu0 }
 0x1dc   :  { %v8018_v56 = vadd.f32 %v2304_v53, %v2263_v51  ;;  %v2306_v58 = vpop.f32.mrb[1].mxu1  ;;  %v2267_v60 = vpop.f32.mrb[2].mxu0  ;;  %2568 = vmatpush1.bf16.msra.mxu0 %v6926_v46  ;;  %v8024_v46 = vpack.c.bf16 %v192_v52, %v192_v52  ;;  %v7006_v51 = vld [vmem:[#allocation8 + $0x364] ss:$24 sps:$4 sm:$0xff]   ;;  %v7064_v52 = vld [vmem:[#allocation8 + $0x540] ss:$24 sps:$4 sm:$0xff]  }
 0x1dd   :  { %v8020_v59 = vadd.f32 %v2306_v58, %v2265_v57  ;;  %v2308_v61 = vpop.f32.mrb[2].mxu1  ;;  %4049 = vmatpush1.bf16.msra.mxu1 %v6929_v47  ;;  %v2268_v62 = vpop.f32.mrb[3].mxu0  ;;  %2569 = vmatprep.subr.bf16.mxu0 %v6934_v48  ;;  %v8026_v47 = vpack.c.bf16 %v194_v41, %v194_v41  ;;  %v6998_v48 = vld [vmem:[#allocation8 + $0x330] ss:$24 sps:$4 sm:$0xff]   ;;  %v7009_v53 = vld [vmem:[#allocation8 + $0x664] ss:$24 sps:$4 sm:$0xff]  }
 0x1de   :  { %v2309_v63 = vpop.f32.mrb[3].mxu1  ;;  %4050 = vmatprep.subr.bf16.mxu1 %v6937_v50  ;;  %v7001_v50 = vld [vmem:[#allocation8 + $0x630] ss:$24 sps:$4 sm:$0xff]   ;;  %v7015_v57 = vld [vmem:[#allocation8 + $0x694] ss:$24 sps:$4 sm:$0xff]  }
 0x1df   :  { %v7010_v58 = vld [vmem:[#allocation8 + $0x390] ss:$24 sps:$4 sm:$0xff]   ;;  %v7018_v61 = vld [vmem:[#allocation8 + $0x3c4] ss:$24 sps:$4 sm:$0xff]   ;;  %v7016_v63 = vld [vmem:[#allocation8 + $0x3c0] ss:$24 sps:$4 sm:$0xff]  }
 0x1e0   :  { %2570 = vmatpush1.bf16.msra.mxu0 %v6932_v54  ;;  %v7004_v54 = vld [vmem:[#allocation8 + $0x360] ss:$24 sps:$4 sm:$0xff]   ;;  %v7013_v60 = vld [vmem:[#allocation8 + $0x690] ss:$24 sps:$4 sm:$0xff]   ;;  %v7021_v62 = vld [vmem:[#allocation8 + $0x6c4] ss:$24 sps:$4 sm:$0xff]  }
 0x1e1   :  { %4051 = vmatpush1.bf16.msra.mxu1 %v6935_v55  ;;  %2571 = vmatprep.subr.bf16.mxu0 %v6940_v0  ;;  %v7007_v55 = vld [vmem:[#allocation8 + $0x660] ss:$24 sps:$4 sm:$0xff]  }
 0x1e2   :  { %4052 = vmatprep.subr.bf16.mxu1 %v6943_v1  ;;  %v7019_v0 = vld [vmem:[#allocation8 + $0x6c0] ss:$24 sps:$4 sm:$0xff]   ;;  %v7024_v1 = vld [vmem:[#allocation8 + $0x3f4] ss:$24 sps:$4 sm:$0xff]  }
 0x1e3   :  { %v7067_v41 = vld [vmem:[#allocation8 + $0x840] ss:$24 sps:$4 sm:$0xff]  }
 0x1e4   :  { %2572 = vmatpush1.bf16.msra.mxu0 %v6938_v2  ;;  %v7027_v2 = vld [vmem:[#allocation8 + $0x6f4] ss:$24 sps:$4 sm:$0xff]  }
 0x1e5   :  { %4053 = vmatpush1.bf16.msra.mxu1 %v6941_v3  ;;  %2573 = vmatprep.subr.bf16.mxu0 %v6946_v4  ;;  %v7022_v3 = vld [vmem:[#allocation8 + $0x3f0] ss:$24 sps:$4 sm:$0xff]  }
 0x1e6   :  { %4054 = vmatprep.subr.bf16.mxu1 %v6949_v5  ;;  %v7025_v4 = vld [vmem:[#allocation8 + $0x6f0] ss:$24 sps:$4 sm:$0xff]   ;;  %v7030_v5 = vld [vmem:[#allocation8 + $0x424] ss:$24 sps:$4 sm:$0xff]  }
 0x1e8   :  { %2574 = vmatpush1.bf16.msra.mxu0 %v6944_v6  ;;  %v7033_v6 = vld [vmem:[#allocation8 + $0x724] ss:$24 sps:$4 sm:$0xff]  }
 0x1e9   :  { %4055 = vmatpush1.bf16.msra.mxu1 %v6947_v7  ;;  %2575 = vmatprep.subr.bf16.mxu0 %v6952_v10 }
 0x1ea   :  { %4056 = vmatprep.subr.bf16.mxu1 %v6955_v11  ;;  %v7028_v11 = vld [vmem:[#allocation8 + $0x420] ss:$24 sps:$4 sm:$0xff]  }
 0x1ec   :  { %2576 = vmatpush1.bf16.msra.mxu0 %v6950_v12  ;;  %v7031_v12 = vld [vmem:[#allocation8 + $0x720] ss:$24 sps:$4 sm:$0xff]  }
 0x1ed   :  { %4057 = vmatpush1.bf16.msra.mxu1 %v6953_v13  ;;  %2577 = vmatprep.subr.bf16.mxu0 %v6958_v14 }
 0x1ee   :  { %4058 = vmatprep.subr.bf16.mxu1 %v6961_v15 }
 0x1f0   :  { %2578 = vmatpush1.bf16.msra.mxu0 %v6956_v16 }
 0x1f1   :  { %4059 = vmatpush1.bf16.msra.mxu1 %v6959_v18  ;;  %2579 = vmatprep.subr.bf16.mxu0 %v6964_v19 }
 0x1f2   :  { %4060 = vmatprep.subr.bf16.mxu1 %v6967_v20 }
 0x1f4   :  { %2580 = vmatpush1.bf16.msra.mxu0 %v6962_v21 }
 0x1f5   :  { %4061 = vmatpush1.bf16.msra.mxu1 %v6965_v22  ;;  %2581 = vmatprep.subr.bf16.mxu0 %v6970_v23  ;;  %v7036_v22 = vld [vmem:[#allocation8 + $0x454] ss:$24 sps:$4 sm:$0xff]  }
 0x1f6   :  { %4062 = vmatprep.subr.bf16.mxu1 %v6973_v24  ;;  %v7039_v23 = vld [vmem:[#allocation8 + $0x754] ss:$24 sps:$4 sm:$0xff]   ;;  %v7037_v24 = vld [vmem:[#allocation8 + $0x750] ss:$24 sps:$4 sm:$0xff]  }
 0x1f8   :  { %2582 = vmatpush1.bf16.msra.mxu0 %v6968_v25  ;;  %v7042_v25 = vld [vmem:[#allocation8 + $0x484] ss:$24 sps:$4 sm:$0xff]  }
 0x1f9   :  { %4063 = vmatpush1.bf16.msra.mxu1 %v6971_v26  ;;  %2583 = vmatprep.subr.bf16.mxu0 %v6976_v27  ;;  %v7045_v26 = vld [vmem:[#allocation8 + $0x784] ss:$24 sps:$4 sm:$0xff]   ;;  %v7043_v27 = vld [vmem:[#allocation8 + $0x780] ss:$24 sps:$4 sm:$0xff]  }
 0x1fa   :  { %4064 = vmatprep.subr.bf16.mxu1 %v6979_v28  ;;  %v7048_v28 = vld [vmem:[#allocation8 + $0x4b4] ss:$24 sps:$4 sm:$0xff]  }
 0x1fc   :  { %2584 = vmatpush1.bf16.msra.mxu0 %v6974_v29  ;;  %v7051_v29 = vld [vmem:[#allocation8 + $0x7b4] ss:$24 sps:$4 sm:$0xff]  }
 0x1fd   :  { %4065 = vmatpush1.bf16.msra.mxu1 %v6977_v30  ;;  %2585 = vmatprep.subr.bf16.mxu0 %v6982_v31  ;;  %v7046_v30 = vld [vmem:[#allocation8 + $0x4b0] ss:$24 sps:$4 sm:$0xff]  }
 0x1fe   :  { %4066 = vmatprep.subr.bf16.mxu1 %v6985_v32  ;;  %v7049_v31 = vld [vmem:[#allocation8 + $0x7b0] ss:$24 sps:$4 sm:$0xff]   ;;  %v7054_v32 = vld [vmem:[#allocation8 + $0x4e4] ss:$24 sps:$4 sm:$0xff]  }
 0x200   :  { %2586 = vmatpush1.bf16.msra.mxu0 %v6980_v34  ;;  %v7057_v34 = vld [vmem:[#allocation8 + $0x7e4] ss:$24 sps:$4 sm:$0xff]  }
 0x201   :  { %4067 = vmatpush1.bf16.msra.mxu1 %v6983_v36  ;;  %2587 = vmatprep.subr.bf16.mxu0 %v6988_v37  ;;  %v7052_v36 = vld [vmem:[#allocation8 + $0x4e0] ss:$24 sps:$4 sm:$0xff]  }
 0x202   :  { %4068 = vmatprep.subr.bf16.mxu1 %v6991_v38  ;;  %v7055_v37 = vld [vmem:[#allocation8 + $0x7e0] ss:$24 sps:$4 sm:$0xff]   ;;  %v7060_v38 = vld [vmem:[#allocation8 + $0x514] ss:$24 sps:$4 sm:$0xff]  }
 0x204   :  { %2588 = vmatpush1.bf16.msra.mxu0 %v6986_v39  ;;  %v7063_v39 = vld [vmem:[#allocation8 + $0x814] ss:$24 sps:$4 sm:$0xff]  }
 0x205   :  { %4069 = vmatpush1.bf16.msra.mxu1 %v6989_v40  ;;  %4079 = vmatprep.subr.bf16.mxu0 %v6994_v8  ;;  %v7058_v40 = vld [vmem:[#allocation8 + $0x510] ss:$24 sps:$4 sm:$0xff]   ;;  %v7066_v8 = vld [vmem:[#allocation8 + $0x544] ss:$24 sps:$4 sm:$0xff]  }
 0x206   :  { %4120 = vmatprep.subr.bf16.mxu1 %v6997_v9  ;;  %v7069_v9 = vld [vmem:[#allocation8 + $0x844] ss:$24 sps:$4 sm:$0xff]  }
 0x207   :  { %2590 = vmatmul.mubr.bf16.vlgmr.msra.gmra.mrb[16].mxu0 %v8002_v17  ;;  %v7012_v17 = vld [vmem:[#allocation8 + $0x394] ss:$24 sps:$4 sm:$0xff]  }
 0x208   :  { %4071 = vmatmul.mubr.bf16.vlgmr.msra.gmra.mrb[16].mxu1 %v8022_v43  ;;  %4080 = vmatpush1.bf16.msra.mxu0 %v6992_v42  ;;  %v7072_v42 = vld [vmem:[#allocation8 + $0x574] ss:$24 sps:$4 sm:$0xff]  }
 0x209   :  { %4121 = vmatpush1.bf16.msra.mxu1 %v6995_v35  ;;  %4081 = vmatprep.subr.bf16.mxu0 %v7000_v44  ;;  %v7075_v35 = vld [vmem:[#allocation8 + $0x874] ss:$24 sps:$4 sm:$0xff]   ;;  %v7070_v44 = vld [vmem:[#allocation8 + $0x570] ss:$24 sps:$4 sm:$0xff]  }
 0x20a   :  { %4122 = vmatprep.subr.bf16.mxu1 %v7003_v45  ;;  %4111 = vmatprep.mubr.bf16.mxu0 %v8024_v46  ;;  %v7073_v45 = vld [vmem:[#allocation8 + $0x870] ss:$24 sps:$4 sm:$0xff]  }
 0x20b   :  { %4152 = vmatprep.mubr.bf16.mxu1 %v8026_v47 }
 0x20c   :  { %4082 = vmatpush1.bf16.msra.mxu0 %v6998_v48  ;;  %v7078_v48 = vld [vmem:[#allocation8 + $0x5a4] ss:$24 sps:$4 sm:$0xff]  }
 0x20d   :  { %4123 = vmatpush1.bf16.msra.mxu1 %v7001_v50  ;;  %4083 = vmatprep.subr.bf16.mxu0 %v7006_v51  ;;  %v7081_v50 = vld [vmem:[#allocation8 + $0x8a4] ss:$24 sps:$4 sm:$0xff]   ;;  %v7076_v51 = vld [vmem:[#allocation8 + $0x5a0] ss:$24 sps:$4 sm:$0xff]  }
 0x20e   :  { %4124 = vmatprep.subr.bf16.mxu1 %v7009_v53  ;;  %v7079_v53 = vld [vmem:[#allocation8 + $0x8a0] ss:$24 sps:$4 sm:$0xff]  }
 0x210   :  { %4084 = vmatpush1.bf16.msra.mxu0 %v7004_v54  ;;  %v7084_v54 = vld [vmem:[#allocation8 + $0x5d4] ss:$24 sps:$4 sm:$0xff]  }
 0x211   :  { %4125 = vmatpush1.bf16.msra.mxu1 %v7007_v55  ;;  %4085 = vmatprep.subr.bf16.mxu0 %v7012_v17  ;;  %v7087_v55 = vld [vmem:[#allocation8 + $0x8d4] ss:$24 sps:$4 sm:$0xff]   ;;  %v7082_v17 = vld [vmem:[#allocation8 + $0x5d0] ss:$24 sps:$4 sm:$0xff]  }
 0x212   :  { %4126 = vmatprep.subr.bf16.mxu1 %v7015_v57  ;;  %v7085_v57 = vld [vmem:[#allocation8 + $0x8d0] ss:$24 sps:$4 sm:$0xff]  }
 0x214   :  { %4086 = vmatpush1.bf16.msra.mxu0 %v7010_v58  ;;  %v191_v58 = vld [vmem:[#allocation5 + $0x10] sm:$0xff] }
 0x215   :  { %4127 = vmatpush1.bf16.msra.mxu1 %v7013_v60  ;;  %4087 = vmatprep.subr.bf16.mxu0 %v7018_v61  ;;  %v193_v60 = vld [vmem:[#allocation5 + $0x20] sm:$0xff] }
 0x216   :  { %4128 = vmatprep.subr.bf16.mxu1 %v7021_v62  ;;  %v7090_v61 = vld [vmem:[#allocation8 + $0xc] ss:$24 sps:$4 sm:$0xff]  }
 0x217   :  { %v7093_v62 = vld [vmem:[#allocation8 + $0x30c] ss:$24 sps:$4 sm:$0xff]  }
 0x218   :  { %4088 = vmatpush1.bf16.msra.mxu0 %v7016_v63  ;;  %v7088_v63 = vld [vmem:[#allocation8 + $0x8] ss:$24 sps:$4 sm:$0xff]  }
 0x219   :  { %4129 = vmatpush1.bf16.msra.mxu1 %v7019_v0  ;;  %4089 = vmatprep.subr.bf16.mxu0 %v7024_v1  ;;  %v7091_v0 = vld [vmem:[#allocation8 + $0x308] ss:$24 sps:$4 sm:$0xff]   ;;  %v8042_v1 = vpack.c.bf16 %v191_v58, %v191_v58 }
 0x21a   :  { %4130 = vmatprep.subr.bf16.mxu1 %v7027_v2  ;;  %v2345_v7 = vpop.f32.mrb[4].mxu0  ;;  %v8044_v2 = vpack.c.bf16 %v193_v60, %v193_v60  ;;  %v7148_v58 = vld [vmem:[#allocation8 + $0x1e8] ss:$24 sps:$4 sm:$0xff]  }
 0x21b   :  { %v8032_v10 = vpop.f32.mrb[4].mxu1  ;;  %v8035_v13 = vadd.f32 %v2345_v7, %v8018_v56  ;;  %v2347_v14 = vpop.f32.mrb[5].mxu0  ;;  %v7034_v56 = vld [vmem:[#allocation8 + $0x450] ss:$24 sps:$4 sm:$0xff]   ;;  %v7102_v7 = vld [vmem:[#allocation8 + $0x6c] ss:$24 sps:$4 sm:$0xff]  }
 0x21c   :  { %v8037_v15 = vpop.f32.mrb[5].mxu1  ;;  %v8040_v16 = vadd.f32 %v2347_v14, %v8020_v59  ;;  %v2349_v18 = vpop.f32.mrb[6].mxu0  ;;  %4090 = vmatpush1.bf16.msra.mxu0 %v7022_v3  ;;  %v7040_v59 = vld [vmem:[#allocation8 + $0x480] ss:$24 sps:$4 sm:$0xff]   ;;  %v7096_v3 = vld [vmem:[#allocation8 + $0x3c] ss:$24 sps:$4 sm:$0xff]  }
 0x21d   :  { %v2390_v19 = vpop.f32.mrb[6].mxu1  ;;  %4131 = vmatpush1.bf16.msra.mxu1 %v7025_v4  ;;  %v2350_v20 = vpop.f32.mrb[7].mxu0  ;;  %4091 = vmatprep.subr.bf16.mxu0 %v7030_v5  ;;  %v7099_v4 = vld [vmem:[#allocation8 + $0x33c] ss:$24 sps:$4 sm:$0xff]   ;;  %v7094_v5 = vld [vmem:[#allocation8 + $0x38] ss:$24 sps:$4 sm:$0xff]  }
 0x21e   :  { %v2391_v21 = vpop.f32.mrb[7].mxu1  ;;  %4132 = vmatprep.subr.bf16.mxu1 %v7033_v6  ;;  %v7097_v6 = vld [vmem:[#allocation8 + $0x338] ss:$24 sps:$4 sm:$0xff]   ;;  %v7103_v14 = vld [vmem:[#allocation8 + $0x368] ss:$24 sps:$4 sm:$0xff]  }
 0x21f   :  { %v7108_v18 = vld [vmem:[#allocation8 + $0x9c] ss:$24 sps:$4 sm:$0xff]   ;;  %v7106_v20 = vld [vmem:[#allocation8 + $0x98] ss:$24 sps:$4 sm:$0xff]   ;;  %v7151_v60 = vld [vmem:[#allocation8 + $0x4e8] ss:$24 sps:$4 sm:$0xff]  }
 0x220   :  { %4092 = vmatpush1.bf16.msra.mxu0 %v7028_v11  ;;  %v7105_v11 = vld [vmem:[#allocation8 + $0x36c] ss:$24 sps:$4 sm:$0xff]   ;;  %v7111_v19 = vld [vmem:[#allocation8 + $0x39c] ss:$24 sps:$4 sm:$0xff]   ;;  %v7109_v21 = vld [vmem:[#allocation8 + $0x398] ss:$24 sps:$4 sm:$0xff]  }
 0x221   :  { %4133 = vmatpush1.bf16.msra.mxu1 %v7031_v12  ;;  %4093 = vmatprep.subr.bf16.mxu0 %v7036_v22  ;;  %v7100_v12 = vld [vmem:[#allocation8 + $0x68] ss:$24 sps:$4 sm:$0xff]   ;;  %v7114_v22 = vld [vmem:[#allocation8 + $0xcc] ss:$24 sps:$4 sm:$0xff]  }
 0x222   :  { %4134 = vmatprep.subr.bf16.mxu1 %v7039_v23  ;;  %v7117_v23 = vld [vmem:[#allocation8 + $0x3cc] ss:$24 sps:$4 sm:$0xff]  }
 0x224   :  { %4094 = vmatpush1.bf16.msra.mxu0 %v7034_v56  ;;  %v7112_v56 = vld [vmem:[#allocation8 + $0xc8] ss:$24 sps:$4 sm:$0xff]  }
 0x225   :  { %4135 = vmatpush1.bf16.msra.mxu1 %v7037_v24  ;;  %4095 = vmatprep.subr.bf16.mxu0 %v7042_v25  ;;  %v7115_v24 = vld [vmem:[#allocation8 + $0x3c8] ss:$24 sps:$4 sm:$0xff]   ;;  %v7120_v25 = vld [vmem:[#allocation8 + $0xfc] ss:$24 sps:$4 sm:$0xff]  }
 0x226   :  { %4136 = vmatprep.subr.bf16.mxu1 %v7045_v26  ;;  %v7123_v26 = vld [vmem:[#allocation8 + $0x3fc] ss:$24 sps:$4 sm:$0xff]  }
 0x228   :  { %4096 = vmatpush1.bf16.msra.mxu0 %v7040_v59  ;;  %v7118_v59 = vld [vmem:[#allocation8 + $0xf8] ss:$24 sps:$4 sm:$0xff]  }
 0x229   :  { %4137 = vmatpush1.bf16.msra.mxu1 %v7043_v27  ;;  %4097 = vmatprep.subr.bf16.mxu0 %v7048_v28  ;;  %v7121_v27 = vld [vmem:[#allocation8 + $0x3f8] ss:$24 sps:$4 sm:$0xff]   ;;  %v7126_v28 = vld [vmem:[#allocation8 + $0x12c] ss:$24 sps:$4 sm:$0xff]  }
 0x22a   :  { %4138 = vmatprep.subr.bf16.mxu1 %v7051_v29  ;;  %v7129_v29 = vld [vmem:[#allocation8 + $0x42c] ss:$24 sps:$4 sm:$0xff]  }
 0x22c   :  { %4098 = vmatpush1.bf16.msra.mxu0 %v7046_v30 }
 0x22d   :  { %4139 = vmatpush1.bf16.msra.mxu1 %v7049_v31  ;;  %4099 = vmatprep.subr.bf16.mxu0 %v7054_v32  ;;  %v7124_v32 = vld [vmem:[#allocation8 + $0x128] ss:$24 sps:$4 sm:$0xff]  }
 0x22e   :  { %4140 = vmatprep.subr.bf16.mxu1 %v7057_v34  ;;  %v7127_v34 = vld [vmem:[#allocation8 + $0x428] ss:$24 sps:$4 sm:$0xff]  }
 0x230   :  { %4100 = vmatpush1.bf16.msra.mxu0 %v7052_v36 }
 0x231   :  { %4141 = vmatpush1.bf16.msra.mxu1 %v7055_v37  ;;  %4101 = vmatprep.subr.bf16.mxu0 %v7060_v38 }
 0x232   :  { %4142 = vmatprep.subr.bf16.mxu1 %v7063_v39 }
 0x234   :  { %4102 = vmatpush1.bf16.msra.mxu0 %v7058_v40 }
 0x235   :  { %4143 = vmatpush1.bf16.msra.mxu1 %v7061_v49  ;;  %4103 = vmatprep.subr.bf16.mxu0 %v7066_v8 }
 0x236   :  { %4144 = vmatprep.subr.bf16.mxu1 %v7069_v9 }
 0x238   :  { %4104 = vmatpush1.bf16.msra.mxu0 %v7064_v52 }
 0x239   :  { %4145 = vmatpush1.bf16.msra.mxu1 %v7067_v41  ;;  %4105 = vmatprep.subr.bf16.mxu0 %v7072_v42  ;;  %v7132_v41 = vld [vmem:[#allocation8 + $0x15c] ss:$24 sps:$4 sm:$0xff]  }
 0x23a   :  { %4146 = vmatprep.subr.bf16.mxu1 %v7075_v35  ;;  %v7135_v42 = vld [vmem:[#allocation8 + $0x45c] ss:$24 sps:$4 sm:$0xff]  }
 0x23c   :  { %4106 = vmatpush1.bf16.msra.mxu0 %v7070_v44  ;;  %v7133_v44 = vld [vmem:[#allocation8 + $0x458] ss:$24 sps:$4 sm:$0xff]  }
 0x23d   :  { %4147 = vmatpush1.bf16.msra.mxu1 %v7073_v45  ;;  %4107 = vmatprep.subr.bf16.mxu0 %v7078_v48  ;;  %v7141_v45 = vld [vmem:[#allocation8 + $0x48c] ss:$24 sps:$4 sm:$0xff]   ;;  %v7136_v48 = vld [vmem:[#allocation8 + $0x188] ss:$24 sps:$4 sm:$0xff]  }
 0x23e   :  { %4148 = vmatprep.subr.bf16.mxu1 %v7081_v50  ;;  %v7139_v50 = vld [vmem:[#allocation8 + $0x488] ss:$24 sps:$4 sm:$0xff]  }
 0x240   :  { %4108 = vmatpush1.bf16.msra.mxu0 %v7076_v51  ;;  %v7144_v51 = vld [vmem:[#allocation8 + $0x1bc] ss:$24 sps:$4 sm:$0xff]  }
 0x241   :  { %4149 = vmatpush1.bf16.msra.mxu1 %v7079_v53  ;;  %4109 = vmatprep.subr.bf16.mxu0 %v7084_v54  ;;  %v7147_v53 = vld [vmem:[#allocation8 + $0x4bc] ss:$24 sps:$4 sm:$0xff]   ;;  %v7142_v54 = vld [vmem:[#allocation8 + $0x1b8] ss:$24 sps:$4 sm:$0xff]  }
 0x242   :  { %4150 = vmatprep.subr.bf16.mxu1 %v7087_v55  ;;  %v7145_v55 = vld [vmem:[#allocation8 + $0x4b8] ss:$24 sps:$4 sm:$0xff]  }
 0x244   :  { %4110 = vmatpush1.bf16.msra.mxu0 %v7082_v17  ;;  %v7150_v17 = vld [vmem:[#allocation8 + $0x1ec] ss:$24 sps:$4 sm:$0xff]  }
 0x245   :  { %4151 = vmatpush1.bf16.msra.mxu1 %v7085_v57  ;;  %4161 = vmatprep.subr.bf16.mxu0 %v7090_v61  ;;  %v7153_v57 = vld [vmem:[#allocation8 + $0x4ec] ss:$24 sps:$4 sm:$0xff]   ;;  %v7156_v61 = vld [vmem:[#allocation8 + $0x21c] ss:$24 sps:$4 sm:$0xff]  }
 0x246   :  { %4202 = vmatprep.subr.bf16.mxu1 %v7093_v62  ;;  %v7159_v62 = vld [vmem:[#allocation8 + $0x51c] ss:$24 sps:$4 sm:$0xff]  }
 0x247   :  { %4112 = vmatmul.mubr.bf16.vlgmr.msra.gmra.mrb[20].mxu0 %v8042_v1 }
 0x248   :  { %4153 = vmatmul.mubr.bf16.vlgmr.msra.gmra.mrb[20].mxu1 %v8044_v2  ;;  %4162 = vmatpush1.bf16.msra.mxu0 %v7088_v63  ;;  %v7154_v63 = vld [vmem:[#allocation8 + $0x218] ss:$24 sps:$4 sm:$0xff]  }
 0x249   :  { %4203 = vmatpush1.bf16.msra.mxu1 %v7091_v0  ;;  %4163 = vmatprep.subr.bf16.mxu0 %v7096_v3  ;;  %v7157_v0 = vld [vmem:[#allocation8 + $0x518] ss:$24 sps:$4 sm:$0xff]   ;;  %v7162_v3 = vld [vmem:[#allocation8 + $0x24c] ss:$24 sps:$4 sm:$0xff]  }
 0x24a   :  { %4204 = vmatprep.subr.bf16.mxu1 %v7099_v4  ;;  %4193 = vmatprep.mubr.bf16.mxu0 %v8012_v33  ;;  %v7165_v4 = vld [vmem:[#allocation8 + $0x54c] ss:$24 sps:$4 sm:$0xff]  }
 0x24b   :  { %4234 = vmatprep.mubr.bf16.mxu1 %v8024_v46 }
 0x24c   :  { %4164 = vmatpush1.bf16.msra.mxu0 %v7094_v5  ;;  %v7160_v5 = vld [vmem:[#allocation8 + $0x248] ss:$24 sps:$4 sm:$0xff]  }
 0x24d   :  { %4205 = vmatpush1.bf16.msra.mxu1 %v7097_v6  ;;  %4165 = vmatprep.subr.bf16.mxu0 %v7102_v7  ;;  %v7163_v6 = vld [vmem:[#allocation8 + $0x548] ss:$24 sps:$4 sm:$0xff]   ;;  %v7168_v7 = vld [vmem:[#allocation8 + $0x27c] ss:$24 sps:$4 sm:$0xff]  }
 0x24e   :  { %4206 = vmatprep.subr.bf16.mxu1 %v7105_v11  ;;  %v7171_v11 = vld [vmem:[#allocation8 + $0x57c] ss:$24 sps:$4 sm:$0xff]  }
 0x250   :  { %4166 = vmatpush1.bf16.msra.mxu0 %v7100_v12  ;;  %v7166_v12 = vld [vmem:[#allocation8 + $0x278] ss:$24 sps:$4 sm:$0xff]  }
 0x251   :  { %4207 = vmatpush1.bf16.msra.mxu1 %v7103_v14  ;;  %4167 = vmatprep.subr.bf16.mxu0 %v7108_v18  ;;  %v7169_v14 = vld [vmem:[#allocation8 + $0x578] ss:$24 sps:$4 sm:$0xff]   ;;  %v7174_v18 = vld [vmem:[#allocation8 + $0x2ac] ss:$24 sps:$4 sm:$0xff]  }
 0x252   :  { %4208 = vmatprep.subr.bf16.mxu1 %v7111_v19  ;;  %v7177_v19 = vld [vmem:[#allocation8 + $0x5ac] ss:$24 sps:$4 sm:$0xff]  }
 0x254   :  { %4168 = vmatpush1.bf16.msra.mxu0 %v7106_v20  ;;  %v7172_v20 = vld [vmem:[#allocation8 + $0x2a8] ss:$24 sps:$4 sm:$0xff]  }
 0x255   :  { %4209 = vmatpush1.bf16.msra.mxu1 %v7109_v21  ;;  %4169 = vmatprep.subr.bf16.mxu0 %v7114_v22  ;;  %v7175_v21 = vld [vmem:[#allocation8 + $0x5a8] ss:$24 sps:$4 sm:$0xff]   ;;  %v7180_v22 = vld [vmem:[#allocation8 + $0x2dc] ss:$24 sps:$4 sm:$0xff]  }
 0x256   :  { %4210 = vmatprep.subr.bf16.mxu1 %v7117_v23  ;;  %v7183_v23 = vld [vmem:[#allocation8 + $0x5dc] ss:$24 sps:$4 sm:$0xff]  }
 0x258   :  { %4170 = vmatpush1.bf16.msra.mxu0 %v7112_v56  ;;  %v7178_v56 = vld [vmem:[#allocation8 + $0x2d8] ss:$24 sps:$4 sm:$0xff]  }
 0x259   :  { %4211 = vmatpush1.bf16.msra.mxu1 %v7115_v24  ;;  %4171 = vmatprep.subr.bf16.mxu0 %v7120_v25  ;;  %v7181_v24 = vld [vmem:[#allocation8 + $0x5d8] ss:$24 sps:$4 sm:$0xff]   ;;  %v7186_v25 = vld [vmem:[#allocation8 + $0x60c] ss:$24 sps:$4 sm:$0xff]  }
 0x25a   :  { %4212 = vmatprep.subr.bf16.mxu1 %v7123_v26  ;;  %v2427_v30 = vpop.f32.mrb[8].mxu0  ;;  %v7189_v26 = vld [vmem:[#allocation8 + $0x14] ss:$24 sps:$4 sm:$0xff]  }
 0x25b   :  { %v2468_v31 = vpop.f32.mrb[8].mxu1  ;;  %v2428_v36 = vadd.f32 %v2427_v30, %v8032_v10  ;;  %v2429_v37 = vpop.f32.mrb[9].mxu0  ;;  %v7130_v10 = vld [vmem:[#allocation8 + $0x158] ss:$24 sps:$4 sm:$0xff]  }
 0x25c   :  { %v2470_v38 = vpop.f32.mrb[9].mxu1  ;;  %v2430_v39 = vadd.f32 %v2429_v37, %v8037_v15  ;;  %v2431_v40 = vpop.f32.mrb[10].mxu0  ;;  %4172 = vmatpush1.bf16.msra.mxu0 %v7118_v59  ;;  %v7138_v15 = vld [vmem:[#allocation8 + $0x18c] ss:$24 sps:$4 sm:$0xff]   ;;  %v7184_v59 = vld [vmem:[#allocation8 + $0x608] ss:$24 sps:$4 sm:$0xff]  }
 0x25d   :  { %v2472_v49 = vpop.f32.mrb[10].mxu1  ;;  %4213 = vmatpush1.bf16.msra.mxu1 %v7121_v27  ;;  %v8052_v8 = vadd.f32 %v2468_v31, %v2428_v36  ;;  %v2432_v9 = vpop.f32.mrb[11].mxu0  ;;  %4173 = vmatprep.subr.bf16.mxu0 %v7126_v28  ;;  %v7187_v27 = vld [vmem:[#allocation8 + $0x10] ss:$24 sps:$4 sm:$0xff]   ;;  %v7192_v28 = vld [vmem:[#allocation8 + $0x63c] ss:$24 sps:$4 sm:$0xff]  }
 0x25e   :  { %v2473_v52 = vpop.f32.mrb[11].mxu1  ;;  %4214 = vmatprep.subr.bf16.mxu1 %v7129_v29  ;;  %v8054_v35 = vadd.f32 %v2470_v38, %v2430_v39  ;;  %v7195_v29 = vld [vmem:[#allocation8 + $0x44] ss:$24 sps:$4 sm:$0xff]   ;;  %v7190_v30 = vld [vmem:[#allocation8 + $0x638] ss:$24 sps:$4 sm:$0xff]  }
 0x25f   :  { %v7193_v31 = vld [vmem:[#allocation8 + $0x40] ss:$24 sps:$4 sm:$0xff]   ;;  %v7199_v37 = vld [vmem:[#allocation8 + $0x70] ss:$24 sps:$4 sm:$0xff]   ;;  %v7204_v38 = vld [vmem:[#allocation8 + $0x69c] ss:$24 sps:$4 sm:$0xff]  }
 0x260   :  { %4174 = vmatpush1.bf16.msra.mxu0 %v7124_v32  ;;  %v7198_v32 = vld [vmem:[#allocation8 + $0x66c] ss:$24 sps:$4 sm:$0xff]   ;;  %v7196_v36 = vld [vmem:[#allocation8 + $0x668] ss:$24 sps:$4 sm:$0xff]   ;;  %v7202_v40 = vld [vmem:[#allocation8 + $0x698] ss:$24 sps:$4 sm:$0xff]  }
 0x261   :  { %4215 = vmatpush1.bf16.msra.mxu1 %v7127_v34  ;;  %4175 = vmatprep.subr.bf16.mxu0 %v7132_v41  ;;  %v7201_v34 = vld [vmem:[#allocation8 + $0x74] ss:$24 sps:$4 sm:$0xff]   ;;  %v7207_v39 = vld [vmem:[#allocation8 + $0xa4] ss:$24 sps:$4 sm:$0xff]   ;;  %v7205_v49 = vld [vmem:[#allocation8 + $0xa0] ss:$24 sps:$4 sm:$0xff]  }
 0x262   :  { %4216 = vmatprep.subr.bf16.mxu1 %v7135_v42  ;;  %v7210_v9 = vld [vmem:[#allocation8 + $0x6cc] ss:$24 sps:$4 sm:$0xff]   ;;  %v7208_v41 = vld [vmem:[#allocation8 + $0x6c8] ss:$24 sps:$4 sm:$0xff]   ;;  %v7216_v42 = vld [vmem:[#allocation8 + $0x6fc] ss:$24 sps:$4 sm:$0xff]  }
 0x263   :  { %v7213_v52 = vld [vmem:[#allocation8 + $0xd4] ss:$24 sps:$4 sm:$0xff]  }
 0x264   :  { %4176 = vmatpush1.bf16.msra.mxu0 %v7130_v10  ;;  %v7219_v10 = vld [vmem:[#allocation8 + $0x104] ss:$24 sps:$4 sm:$0xff]  }
 0x265   :  { %4217 = vmatpush1.bf16.msra.mxu1 %v7133_v44  ;;  %4177 = vmatprep.subr.bf16.mxu0 %v7138_v15  ;;  %v7214_v44 = vld [vmem:[#allocation8 + $0x6f8] ss:$24 sps:$4 sm:$0xff]  }
 0x266   :  { %4218 = vmatprep.subr.bf16.mxu1 %v7141_v45  ;;  %v7217_v15 = vld [vmem:[#allocation8 + $0x100] ss:$24 sps:$4 sm:$0xff]   ;;  %v7222_v45 = vld [vmem:[#allocation8 + $0x72c] ss:$24 sps:$4 sm:$0xff]  }
 0x268   :  { %4178 = vmatpush1.bf16.msra.mxu0 %v7136_v48  ;;  %v7225_v48 = vld [vmem:[#allocation8 + $0x134] ss:$24 sps:$4 sm:$0xff]  }
 0x269   :  { %4219 = vmatpush1.bf16.msra.mxu1 %v7139_v50  ;;  %4179 = vmatprep.subr.bf16.mxu0 %v7144_v51 }
 0x26a   :  { %4220 = vmatprep.subr.bf16.mxu1 %v7147_v53 }
 0x26c   :  { %4180 = vmatpush1.bf16.msra.mxu0 %v7142_v54 }
 0x26d   :  { %4221 = vmatpush1.bf16.msra.mxu1 %v7145_v55  ;;  %4181 = vmatprep.subr.bf16.mxu0 %v7150_v17 }
 0x26e   :  { %4222 = vmatprep.subr.bf16.mxu1 %v7153_v57 }
 0x270   :  { %4182 = vmatpush1.bf16.msra.mxu0 %v7148_v58 }
 0x271   :  { %4223 = vmatpush1.bf16.msra.mxu1 %v7151_v60  ;;  %4183 = vmatprep.subr.bf16.mxu0 %v7156_v61  ;;  %v7220_v60 = vld [vmem:[#allocation8 + $0x728] ss:$24 sps:$4 sm:$0xff]  }
 0x272   :  { %4224 = vmatprep.subr.bf16.mxu1 %v7159_v62  ;;  %v7223_v61 = vld [vmem:[#allocation8 + $0x130] ss:$24 sps:$4 sm:$0xff]  }
 0x274   :  { %4184 = vmatpush1.bf16.msra.mxu0 %v7154_v63 }
 0x275   :  { %4225 = vmatpush1.bf16.msra.mxu1 %v7157_v0  ;;  %4185 = vmatprep.subr.bf16.mxu0 %v7162_v3  ;;  %v7228_v0 = vld [vmem:[#allocation8 + $0x75c] ss:$24 sps:$4 sm:$0xff]  }
 0x276   :  { %4226 = vmatprep.subr.bf16.mxu1 %v7165_v4  ;;  %v7231_v3 = vld [vmem:[#allocation8 + $0x164] ss:$24 sps:$4 sm:$0xff]   ;;  %v7226_v4 = vld [vmem:[#allocation8 + $0x758] ss:$24 sps:$4 sm:$0xff]  }
 0x278   :  { %4186 = vmatpush1.bf16.msra.mxu0 %v7160_v5  ;;  %v7229_v5 = vld [vmem:[#allocation8 + $0x160] ss:$24 sps:$4 sm:$0xff]  }
 0x279   :  { %4227 = vmatpush1.bf16.msra.mxu1 %v7163_v6  ;;  %4187 = vmatprep.subr.bf16.mxu0 %v7168_v7  ;;  %v7234_v6 = vld [vmem:[#allocation8 + $0x78c] ss:$24 sps:$4 sm:$0xff]  }
 0x27a   :  { %4228 = vmatprep.subr.bf16.mxu1 %v7171_v11  ;;  %v7237_v7 = vld [vmem:[#allocation8 + $0x194] ss:$24 sps:$4 sm:$0xff]   ;;  %v7232_v11 = vld [vmem:[#allocation8 + $0x788] ss:$24 sps:$4 sm:$0xff]  }
 0x27c   :  { %4188 = vmatpush1.bf16.msra.mxu0 %v7166_v12  ;;  %v7235_v12 = vld [vmem:[#allocation8 + $0x190] ss:$24 sps:$4 sm:$0xff]  }
 0x27d   :  { %4229 = vmatpush1.bf16.msra.mxu1 %v7169_v14  ;;  %4189 = vmatprep.subr.bf16.mxu0 %v7174_v18  ;;  %v7240_v14 = vld [vmem:[#allocation8 + $0x7bc] ss:$24 sps:$4 sm:$0xff]  }
 0x27e   :  { %4230 = vmatprep.subr.bf16.mxu1 %v7177_v19  ;;  %v7243_v18 = vld [vmem:[#allocation8 + $0x1c4] ss:$24 sps:$4 sm:$0xff]   ;;  %v7238_v19 = vld [vmem:[#allocation8 + $0x7b8] ss:$24 sps:$4 sm:$0xff]  }
 0x280   :  { %4190 = vmatpush1.bf16.msra.mxu0 %v7172_v20  ;;  %v7241_v20 = vld [vmem:[#allocation8 + $0x1c0] ss:$24 sps:$4 sm:$0xff]  }
 0x281   :  { %4231 = vmatpush1.bf16.msra.mxu1 %v7175_v21  ;;  %4191 = vmatprep.subr.bf16.mxu0 %v7180_v22  ;;  %v7246_v21 = vld [vmem:[#allocation8 + $0x7ec] ss:$24 sps:$4 sm:$0xff]  }
 0x282   :  { %4232 = vmatprep.subr.bf16.mxu1 %v7183_v23  ;;  %v7249_v22 = vld [vmem:[#allocation8 + $0x1f4] ss:$24 sps:$4 sm:$0xff]   ;;  %v7244_v23 = vld [vmem:[#allocation8 + $0x7e8] ss:$24 sps:$4 sm:$0xff]  }
 0x284   :  { %4192 = vmatpush1.bf16.msra.mxu0 %v7178_v56  ;;  %v7247_v56 = vld [vmem:[#allocation8 + $0x1f0] ss:$24 sps:$4 sm:$0xff]  }
 0x285   :  { %4233 = vmatpush1.bf16.msra.mxu1 %v7181_v24  ;;  %4243 = vmatprep.subr.bf16.mxu0 %v7186_v25  ;;  %v7252_v24 = vld [vmem:[#allocation8 + $0x81c] ss:$24 sps:$4 sm:$0xff]  }
 0x286   :  { %4284 = vmatprep.subr.bf16.mxu1 %v7189_v26  ;;  %v7255_v25 = vld [vmem:[#allocation8 + $0x224] ss:$24 sps:$4 sm:$0xff]   ;;  %v7250_v26 = vld [vmem:[#allocation8 + $0x818] ss:$24 sps:$4 sm:$0xff]  }
 0x287   :  { %4194 = vmatmul.mubr.bf16.vlgmr.msra.gmra.mrb[24].mxu0 %v8022_v43 }
 0x288   :  { %4235 = vmatmul.mubr.bf16.vlgmr.msra.gmra.mrb[24].mxu1 %v8042_v1  ;;  %4244 = vmatpush1.bf16.msra.mxu0 %v7184_v59  ;;  %v7253_v59 = vld [vmem:[#allocation8 + $0x220] ss:$24 sps:$4 sm:$0xff]  }
 0x289   :  { %4285 = vmatpush1.bf16.msra.mxu1 %v7187_v27  ;;  %4245 = vmatprep.subr.bf16.mxu0 %v7192_v28  ;;  %v7258_v27 = vld [vmem:[#allocation8 + $0x84c] ss:$24 sps:$4 sm:$0xff]  }
 0x28a   :  { %4286 = vmatprep.subr.bf16.mxu1 %v7195_v29  ;;  %4275 = vmatprep.mubr.bf16.mxu0 %v8026_v47  ;;  %v7261_v28 = vld [vmem:[#allocation8 + $0x254] ss:$24 sps:$4 sm:$0xff]   ;;  %v7256_v29 = vld [vmem:[#allocation8 + $0x848] ss:$24 sps:$4 sm:$0xff]  }
 0x28b   :  { %4316 = vmatprep.mubr.bf16.mxu1 %v8012_v33  ;;  %v7211_v33 = vld [vmem:[#allocation8 + $0xd0] ss:$24 sps:$4 sm:$0xff]  }
 0x28c   :  { %4246 = vmatpush1.bf16.msra.mxu0 %v7190_v30  ;;  %v7259_v30 = vld [vmem:[#allocation8 + $0x250] ss:$24 sps:$4 sm:$0xff]  }
 0x28d   :  { %4287 = vmatpush1.bf16.msra.mxu1 %v7193_v31  ;;  %4247 = vmatprep.subr.bf16.mxu0 %v7198_v32  ;;  %v7264_v31 = vld [vmem:[#allocation8 + $0x87c] ss:$24 sps:$4 sm:$0xff]  }
 0x28e   :  { %4288 = vmatprep.subr.bf16.mxu1 %v7201_v34  ;;  %v7267_v32 = vld [vmem:[#allocation8 + $0x284] ss:$24 sps:$4 sm:$0xff]   ;;  %v7262_v34 = vld [vmem:[#allocation8 + $0x878] ss:$24 sps:$4 sm:$0xff]  }
 0x290   :  { %4248 = vmatpush1.bf16.msra.mxu0 %v7196_v36  ;;  %v7265_v36 = vld [vmem:[#allocation8 + $0x280] ss:$24 sps:$4 sm:$0xff]  }
 0x291   :  { %4289 = vmatpush1.bf16.msra.mxu1 %v7199_v37  ;;  %4249 = vmatprep.subr.bf16.mxu0 %v7204_v38  ;;  %v7270_v37 = vld [vmem:[#allocation8 + $0x8ac] ss:$24 sps:$4 sm:$0xff]  }
 0x292   :  { %4290 = vmatprep.subr.bf16.mxu1 %v7207_v39  ;;  %v7273_v38 = vld [vmem:[#allocation8 + $0x2b4] ss:$24 sps:$4 sm:$0xff]   ;;  %v7268_v39 = vld [vmem:[#allocation8 + $0x8a8] ss:$24 sps:$4 sm:$0xff]  }
 0x294   :  { %4250 = vmatpush1.bf16.msra.mxu0 %v7202_v40  ;;  %v7271_v40 = vld [vmem:[#allocation8 + $0x2b0] ss:$24 sps:$4 sm:$0xff]  }
 0x295   :  { %4291 = vmatpush1.bf16.msra.mxu1 %v7205_v49  ;;  %4251 = vmatprep.subr.bf16.mxu0 %v7210_v9  ;;  %v7276_v49 = vld [vmem:[#allocation8 + $0x8dc] ss:$24 sps:$4 sm:$0xff]  }
 0x296   :  { %4292 = vmatprep.subr.bf16.mxu1 %v7213_v52  ;;  %v7279_v9 = vld [vmem:[#allocation8 + $0x2e4] ss:$24 sps:$4 sm:$0xff]   ;;  %v7274_v52 = vld [vmem:[#allocation8 + $0x8d8] ss:$24 sps:$4 sm:$0xff]  }
 0x298   :  { %4252 = vmatpush1.bf16.msra.mxu0 %v7208_v41  ;;  %v7277_v41 = vld [vmem:[#allocation8 + $0x2e0] ss:$24 sps:$4 sm:$0xff]  }
 0x299   :  { %4293 = vmatpush1.bf16.msra.mxu1 %v7211_v33  ;;  %4253 = vmatprep.subr.bf16.mxu0 %v7216_v42  ;;  %v7282_v33 = vld [vmem:[#allocation8 + $0x314] ss:$24 sps:$4 sm:$0xff]  }
 0x29a   :  { %4294 = vmatprep.subr.bf16.mxu1 %v7219_v10  ;;  %v2509_v50 = vpop.f32.mrb[12].mxu0  ;;  %v7285_v42 = vld [vmem:[#allocation8 + $0x614] ss:$24 sps:$4 sm:$0xff]   ;;  %v7280_v10 = vld [vmem:[#allocation8 + $0x310] ss:$24 sps:$4 sm:$0xff]  }
 0x29b   :  { %v2550_v51 = vpop.f32.mrb[12].mxu1  ;;  %v2511_v54 = vpop.f32.mrb[13].mxu0 }
 0x29c   :  { %v8060_v53 = vadd.f32 %v2550_v51, %v2509_v50  ;;  %v2552_v55 = vpop.f32.mrb[13].mxu1  ;;  %v2513_v57 = vpop.f32.mrb[14].mxu0  ;;  %4254 = vmatpush1.bf16.msra.mxu0 %v7214_v44  ;;  %v7283_v44 = vld [vmem:[#allocation8 + $0x610] ss:$24 sps:$4 sm:$0xff]   ;;  %v7289_v50 = vld [vmem:[#allocation8 + $0x640] ss:$24 sps:$4 sm:$0xff]  }
 0x29d   :  { %v8062_v17 = vadd.f32 %v2552_v55, %v2511_v54  ;;  %v2554_v58 = vpop.f32.mrb[14].mxu1  ;;  %4295 = vmatpush1.bf16.msra.mxu1 %v7217_v15  ;;  %v2514_v62 = vpop.f32.mrb[15].mxu0  ;;  %4255 = vmatprep.subr.bf16.mxu0 %v7222_v45  ;;  %v7288_v15 = vld [vmem:[#allocation8 + $0x344] ss:$24 sps:$4 sm:$0xff]   ;;  %v7294_v51 = vld [vmem:[#allocation8 + $0x374] ss:$24 sps:$4 sm:$0xff]  }
 0x29e   :  { %v2555_v63 = vpop.f32.mrb[15].mxu1  ;;  %4296 = vmatprep.subr.bf16.mxu1 %v7225_v48  ;;  %v7291_v45 = vld [vmem:[#allocation8 + $0x644] ss:$24 sps:$4 sm:$0xff]   ;;  %v7286_v48 = vld [vmem:[#allocation8 + $0x340] ss:$24 sps:$4 sm:$0xff]  }
 0x29f   :  { %v7297_v54 = vld [vmem:[#allocation8 + $0x674] ss:$24 sps:$4 sm:$0xff]   ;;  %v7292_v55 = vld [vmem:[#allocation8 + $0x370] ss:$24 sps:$4 sm:$0xff]   ;;  %v7300_v58 = vld [vmem:[#allocation8 + $0x3a4] ss:$24 sps:$4 sm:$0xff]  }
 0x2a0   :  { %4256 = vmatpush1.bf16.msra.mxu0 %v7220_v60  ;;  %v7295_v57 = vld [vmem:[#allocation8 + $0x670] ss:$24 sps:$4 sm:$0xff]   ;;  %v7298_v60 = vld [vmem:[#allocation8 + $0x3a0] ss:$24 sps:$4 sm:$0xff]   ;;  %v7306_v62 = vld [vmem:[#allocation8 + $0x3d4] ss:$24 sps:$4 sm:$0xff]  }
 0x2a1   :  { %4297 = vmatpush1.bf16.msra.mxu1 %v7223_v61  ;;  %4257 = vmatprep.subr.bf16.mxu0 %v7228_v0  ;;  %v7301_v61 = vld [vmem:[#allocation8 + $0x6a0] ss:$24 sps:$4 sm:$0xff]   ;;  %v7309_v63 = vld [vmem:[#allocation8 + $0x6d4] ss:$24 sps:$4 sm:$0xff]   ;;  %v7312_v0 = vld [vmem:[#allocation8 + $0x404] ss:$24 sps:$4 sm:$0xff]  }
 0x2a2   :  { %4298 = vmatprep.subr.bf16.mxu1 %v7231_v3  ;;  %v7315_v3 = vld [vmem:[#allocation8 + $0x704] ss:$24 sps:$4 sm:$0xff]  }
 0x2a4   :  { %4258 = vmatpush1.bf16.msra.mxu0 %v7226_v4  ;;  %v7310_v4 = vld [vmem:[#allocation8 + $0x400] ss:$24 sps:$4 sm:$0xff]  }
 0x2a5   :  { %4299 = vmatpush1.bf16.msra.mxu1 %v7229_v5  ;;  %4259 = vmatprep.subr.bf16.mxu0 %v7234_v6  ;;  %v7313_v5 = vld [vmem:[#allocation8 + $0x700] ss:$24 sps:$4 sm:$0xff]   ;;  %v7318_v6 = vld [vmem:[#allocation8 + $0x434] ss:$24 sps:$4 sm:$0xff]  }
 0x2a6   :  { %4300 = vmatprep.subr.bf16.mxu1 %v7237_v7  ;;  %v7321_v7 = vld [vmem:[#allocation8 + $0x734] ss:$24 sps:$4 sm:$0xff]  }
 0x2a8   :  { %4260 = vmatpush1.bf16.msra.mxu0 %v7232_v11 }
 0x2a9   :  { %4301 = vmatpush1.bf16.msra.mxu1 %v7235_v12  ;;  %4261 = vmatprep.subr.bf16.mxu0 %v7240_v14 }
 0x2aa   :  { %4302 = vmatprep.subr.bf16.mxu1 %v7243_v18 }
 0x2ac   :  { %4262 = vmatpush1.bf16.msra.mxu0 %v7238_v19 }
 0x2ad   :  { %4303 = vmatpush1.bf16.msra.mxu1 %v7241_v20  ;;  %4263 = vmatprep.subr.bf16.mxu0 %v7246_v21 }
 0x2ae   :  { %4304 = vmatprep.subr.bf16.mxu1 %v7249_v22 }
 0x2b0   :  { %4264 = vmatpush1.bf16.msra.mxu0 %v7244_v23 }
 0x2b1   :  { %4305 = vmatpush1.bf16.msra.mxu1 %v7247_v56  ;;  %4265 = vmatprep.subr.bf16.mxu0 %v7252_v24  ;;  %v7316_v24 = vld [vmem:[#allocation8 + $0x430] ss:$24 sps:$4 sm:$0xff]  }
 0x2b2   :  { %4306 = vmatprep.subr.bf16.mxu1 %v7255_v25  ;;  %v7319_v25 = vld [vmem:[#allocation8 + $0x730] ss:$24 sps:$4 sm:$0xff]  }
 0x2b4   :  { %4266 = vmatpush1.bf16.msra.mxu0 %v7250_v26 }
 0x2b5   :  { %4307 = vmatpush1.bf16.msra.mxu1 %v7253_v59  ;;  %4267 = vmatprep.subr.bf16.mxu0 %v7258_v27  ;;  %v7327_v59 = vld [vmem:[#allocation8 + $0x764] ss:$24 sps:$4 sm:$0xff]   ;;  %v7322_v27 = vld [vmem:[#allocation8 + $0x460] ss:$24 sps:$4 sm:$0xff]  }
 0x2b6   :  { %4308 = vmatprep.subr.bf16.mxu1 %v7261_v28  ;;  %v7333_v28 = vld [vmem:[#allocation8 + $0x794] ss:$24 sps:$4 sm:$0xff]  }
 0x2b8   :  { %4268 = vmatpush1.bf16.msra.mxu0 %v7256_v29  ;;  %v7328_v29 = vld [vmem:[#allocation8 + $0x490] ss:$24 sps:$4 sm:$0xff]  }
 0x2b9   :  { %4309 = vmatpush1.bf16.msra.mxu1 %v7259_v30  ;;  %4269 = vmatprep.subr.bf16.mxu0 %v7264_v31  ;;  %v7331_v30 = vld [vmem:[#allocation8 + $0x790] ss:$24 sps:$4 sm:$0xff]   ;;  %v7336_v31 = vld [vmem:[#allocation8 + $0x4c4] ss:$24 sps:$4 sm:$0xff]  }
 0x2ba   :  { %4310 = vmatprep.subr.bf16.mxu1 %v7267_v32  ;;  %v7339_v32 = vld [vmem:[#allocation8 + $0x7c4] ss:$24 sps:$4 sm:$0xff]  }
 0x2bc   :  { %4270 = vmatpush1.bf16.msra.mxu0 %v7262_v34  ;;  %v7334_v34 = vld [vmem:[#allocation8 + $0x4c0] ss:$24 sps:$4 sm:$0xff]  }
 0x2bd   :  { %4311 = vmatpush1.bf16.msra.mxu1 %v7265_v36  ;;  %4271 = vmatprep.subr.bf16.mxu0 %v7270_v37  ;;  %v7337_v36 = vld [vmem:[#allocation8 + $0x7c0] ss:$24 sps:$4 sm:$0xff]   ;;  %v7342_v37 = vld [vmem:[#allocation8 + $0x4f4] ss:$24 sps:$4 sm:$0xff]  }
 0x2be   :  { %4312 = vmatprep.subr.bf16.mxu1 %v7273_v38  ;;  %v7345_v38 = vld [vmem:[#allocation8 + $0x7f4] ss:$24 sps:$4 sm:$0xff]  }
 0x2c0   :  { %4272 = vmatpush1.bf16.msra.mxu0 %v7268_v39  ;;  %v7340_v39 = vld [vmem:[#allocation8 + $0x4f0] ss:$24 sps:$4 sm:$0xff]  }
 0x2c1   :  { %4313 = vmatpush1.bf16.msra.mxu1 %v7271_v40  ;;  %4273 = vmatprep.subr.bf16.mxu0 %v7276_v49  ;;  %v7343_v40 = vld [vmem:[#allocation8 + $0x7f0] ss:$24 sps:$4 sm:$0xff]   ;;  %v7348_v49 = vld [vmem:[#allocation8 + $0x524] ss:$24 sps:$4 sm:$0xff]  }
 0x2c2   :  { %4314 = vmatprep.subr.bf16.mxu1 %v7279_v9  ;;  %v7351_v9 = vld [vmem:[#allocation8 + $0x824] ss:$24 sps:$4 sm:$0xff]  }
 0x2c4   :  { %4274 = vmatpush1.bf16.msra.mxu0 %v7274_v52  ;;  %v7346_v52 = vld [vmem:[#allocation8 + $0x520] ss:$24 sps:$4 sm:$0xff]  }
 0x2c5   :  { %4315 = vmatpush1.bf16.msra.mxu1 %v7277_v41  ;;  %4325 = vmatprep.subr.bf16.mxu0 %v7282_v33  ;;  %v7349_v41 = vld [vmem:[#allocation8 + $0x820] ss:$24 sps:$4 sm:$0xff]   ;;  %v7354_v33 = vld [vmem:[#allocation8 + $0x554] ss:$24 sps:$4 sm:$0xff]  }
 0x2c6   :  { %4366 = vmatprep.subr.bf16.mxu1 %v7285_v42  ;;  %v7357_v42 = vld [vmem:[#allocation8 + $0x854] ss:$24 sps:$4 sm:$0xff]  }
 0x2c7   :  { %4276 = vmatmul.mubr.bf16.vlgmr.msra.gmra.mrb[28].mxu0 %v8044_v2 }
 0x2c8   :  { %4317 = vmatmul.mubr.bf16.vlgmr.msra.gmra.mrb[28].mxu1 %v8022_v43  ;;  %4326 = vmatpush1.bf16.msra.mxu0 %v7280_v10  ;;  %v7303_v43 = vld [vmem:[#allocation8 + $0x6a4] ss:$24 sps:$4 sm:$0xff]   ;;  %v7352_v10 = vld [vmem:[#allocation8 + $0x550] ss:$24 sps:$4 sm:$0xff]  }
 0x2c9   :  { %4367 = vmatpush1.bf16.msra.mxu1 %v7283_v44  ;;  %4327 = vmatprep.subr.bf16.mxu0 %v7288_v15  ;;  %v7355_v44 = vld [vmem:[#allocation8 + $0x850] ss:$24 sps:$4 sm:$0xff]   ;;  %v7360_v15 = vld [vmem:[#allocation8 + $0x584] ss:$24 sps:$4 sm:$0xff]  }
 0x2ca   :  { %4368 = vmatprep.subr.bf16.mxu1 %v7291_v45  ;;  %4357 = vmatprep.mubr.bf16.mxu0 %v8024_v46  ;;  %v7304_v46 = vld [vmem:[#allocation8 + $0x3d0] ss:$24 sps:$4 sm:$0xff]   ;;  %v7363_v45 = vld [vmem:[#allocation8 + $0x884] ss:$24 sps:$4 sm:$0xff]  }
 0x2cb   :  { %4398 = vmatprep.mubr.bf16.mxu1 %v8026_v47  ;;  %v7307_v47 = vld [vmem:[#allocation8 + $0x6d0] ss:$24 sps:$4 sm:$0xff]  }
 0x2cc   :  { %4328 = vmatpush1.bf16.msra.mxu0 %v7286_v48  ;;  %v7358_v48 = vld [vmem:[#allocation8 + $0x580] ss:$24 sps:$4 sm:$0xff]  }
 0x2cd   :  { %4369 = vmatpush1.bf16.msra.mxu1 %v7289_v50  ;;  %4329 = vmatprep.subr.bf16.mxu0 %v7294_v51  ;;  %v7361_v50 = vld [vmem:[#allocation8 + $0x880] ss:$24 sps:$4 sm:$0xff]   ;;  %v7366_v51 = vld [vmem:[#allocation8 + $0x5b4] ss:$24 sps:$4 sm:$0xff]  }
 0x2ce   :  { %4370 = vmatprep.subr.bf16.mxu1 %v7297_v54  ;;  %v7369_v54 = vld [vmem:[#allocation8 + $0x8b4] ss:$24 sps:$4 sm:$0xff]  }
 0x2d0   :  { %4330 = vmatpush1.bf16.msra.mxu0 %v7292_v55  ;;  %v7364_v55 = vld [vmem:[#allocation8 + $0x5b0] ss:$24 sps:$4 sm:$0xff]  }
 0x2d1   :  { %4371 = vmatpush1.bf16.msra.mxu1 %v7295_v57  ;;  %4331 = vmatprep.subr.bf16.mxu0 %v7300_v58  ;;  %v7367_v57 = vld [vmem:[#allocation8 + $0x8b0] ss:$24 sps:$4 sm:$0xff]   ;;  %v7372_v58 = vld [vmem:[#allocation8 + $0x5e4] ss:$24 sps:$4 sm:$0xff]  }
 0x2d2   :  { %4372 = vmatprep.subr.bf16.mxu1 %v7303_v43  ;;  %v7375_v43 = vld [vmem:[#allocation8 + $0x8e4] ss:$24 sps:$4 sm:$0xff]  }
 0x2d4   :  { %4332 = vmatpush1.bf16.msra.mxu0 %v7298_v60  ;;  %v7370_v60 = vld [vmem:[#allocation8 + $0x5e0] ss:$24 sps:$4 sm:$0xff]  }
 0x2d5   :  { %4373 = vmatpush1.bf16.msra.mxu1 %v7301_v61  ;;  %4333 = vmatprep.subr.bf16.mxu0 %v7306_v62  ;;  %v7373_v61 = vld [vmem:[#allocation8 + $0x8e0] ss:$24 sps:$4 sm:$0xff]   ;;  %v7376_v62 = vld [vmem:[#allocation14 + $0x40] sm:$0xff]  }
 0x2d6   :  { %4374 = vmatprep.subr.bf16.mxu1 %v7309_v63  ;;  %v7392_v63 = vld [vmem:[#allocation14 + $0xc0] sm:$0xff]  }
 0x2d8   :  { %4334 = vmatpush1.bf16.msra.mxu0 %v7304_v46  ;;  %v7377_v46 = vld [vmem:[#allocation14] sm:$0xff]  }
 0x2d9   :  { %4375 = vmatpush1.bf16.msra.mxu1 %v7307_v47  ;;  %4335 = vmatprep.subr.bf16.mxu0 %v7312_v0  ;;  %v7393_v47 = vld [vmem:[#allocation14 + $0x80] sm:$0xff]   ;;  %v7378_v0 = vld [vmem:[#allocation14 + $0x48] sm:$0xff]  }
 0x2da   :  { %4376 = vmatprep.subr.bf16.mxu1 %v7315_v3  ;;  %v2591_v11 = vpop.f32.mrb[16].mxu0  ;;  %v7394_v3 = vld [vmem:[#allocation14 + $0xc8] sm:$0xff]  }
 0x2db   :  { %v4072_v12 = vpop.f32.mrb[16].mxu1  ;;  %v8069_v14 = vadd.f32 %v2591_v11, %v8060_v53  ;;  %v2593_v19 = vpop.f32.mrb[17].mxu0  ;;  %v7381_v11 = vld [vmem:[#allocation14 + $0x10] sm:$0xff]  }
 0x2dc   :  { %v8072_v18 = vadd.f32 %v4072_v12, %v8035_v13  ;;  %v4074_v20 = vpop.f32.mrb[17].mxu1  ;;  %v8075_v21 = vadd.f32 %v2593_v19, %v8062_v17  ;;  %v2595_v23 = vpop.f32.mrb[18].mxu0  ;;  %4336 = vmatpush1.bf16.msra.mxu0 %v7310_v4  ;;  %v7324_v13 = vld [vmem:[#allocation8 + $0x464] ss:$24 sps:$4 sm:$0xff]   ;;  %v7325_v17 = vld [vmem:[#allocation8 + $0x760] ss:$24 sps:$4 sm:$0xff]  }
 0x2dd   :  { %v8078_v22 = vadd.f32 %v4074_v20, %v8040_v16  ;;  %v4076_v56 = vpop.f32.mrb[18].mxu1  ;;  %4377 = vmatpush1.bf16.msra.mxu1 %v7313_v5  ;;  %v2596_v26 = vpop.f32.mrb[19].mxu0  ;;  %4337 = vmatprep.subr.bf16.mxu0 %v7318_v6  ;;  %v7330_v16 = vld [vmem:[#allocation8 + $0x494] ss:$24 sps:$4 sm:$0xff]   ;;  %v7382_v19 = vld [vmem:[#allocation14 + $0x58] sm:$0xff]   ;;  %v4409_v23 = vlaneseq }
 0x2de   :  { %v4077_v53 = vpop.f32.mrb[19].mxu1  ;;  %4378 = vmatprep.subr.bf16.mxu1 %v7321_v7  ;;  %v7379_v4 = vld [vmem:[#allocation14 + $0x8] sm:$0xff]   ;;  %v7380_v6 = vld [vmem:[#allocation14 + $0x50] sm:$0xff]   ;;  %v7398_v20 = vld [vmem:[#allocation14 + $0xd8] sm:$0xff]  }
 0x2df   :  { %v7395_v5 = vld [vmem:[#allocation14 + $0x88] sm:$0xff]   ;;  %v7396_v7 = vld [vmem:[#allocation14 + $0xd0] sm:$0xff]   ;;  %v7384_v56 = vld [vmem:[#allocation14 + $0x60] sm:$0xff]  }
 0x2e0   :  { %4338 = vmatpush1.bf16.msra.mxu0 %v7316_v24  ;;  %v7397_v12 = vld [vmem:[#allocation14 + $0x90] sm:$0xff]   ;;  %v7400_v24 = vld [vmem:[#allocation14 + $0xe0] sm:$0xff]  }
 0x2e1   :  { %4379 = vmatpush1.bf16.msra.mxu1 %v7319_v25  ;;  %4339 = vmatprep.subr.bf16.mxu0 %v7324_v13  ;;  %v8082_v25 = vshrl.u32 %v4409_v23, 7  ;;  %v7385_v26 = vld [vmem:[#allocation14 + $0x20] sm:$0xff]   ;;  %v7386_v13 = vld [vmem:[#allocation14 + $0x68] sm:$0xff]  }
 0x2e2   :  { %4380 = vmatprep.subr.bf16.mxu1 %v7327_v59  ;;  %v7401_v53 = vld [vmem:[#allocation14 + $0xa0] sm:$0xff]  }
 0x2e3   :  { %v4411_v59 = vsub.s32 0, %v8082_v25 }
 0x2e4   :  { %4340 = vmatpush1.bf16.msra.mxu0 %v7322_v27  ;;  %v8085_v27 = vld [vmem:[#allocation11] sm:$0x3f] }
 0x2e5   :  { %4381 = vmatpush1.bf16.msra.mxu1 %v7325_v17  ;;  %4341 = vmatprep.subr.bf16.mxu0 %v7330_v16  ;;  %v4415_v17 = vsub.s32 1, %v8082_v25  ;;  %v7387_v16 = vld [vmem:[#allocation14 + $0x28] sm:$0xff]  }
 0x2e6   :  { %4382 = vmatprep.subr.bf16.mxu1 %v7333_v28  ;;  %v7402_v28 = vld [vmem:[#allocation14 + $0xe8] sm:$0xff]  }
 0x2e8   :  { %4342 = vmatpush1.bf16.msra.mxu0 %v7328_v29  ;;  %v7388_v29 = vld [vmem:[#allocation14 + $0x70] sm:$0xff]  }
 0x2e9   :  { %4383 = vmatpush1.bf16.msra.mxu1 %v7331_v30  ;;  %4343 = vmatprep.subr.bf16.mxu0 %v7336_v31  ;;  %v7403_v30 = vld [vmem:[#allocation14 + $0xa8] sm:$0xff]  }
 0x2ea   :  { %4384 = vmatprep.subr.bf16.mxu1 %v7339_v32 }
 0x2ec   :  { %4344 = vmatpush1.bf16.msra.mxu0 %v7334_v34 }
 0x2ed   :  { %4385 = vmatpush1.bf16.msra.mxu1 %v7337_v36  ;;  %4345 = vmatprep.subr.bf16.mxu0 %v7342_v37  ;;  %v4412_v36 = vrot.slane %v8085_v27, %v4411_v59 }
 0x2ee   :  { %4386 = vmatprep.subr.bf16.mxu1 %v7345_v38 }
 0x2f0   :  { %4346 = vmatpush1.bf16.msra.mxu0 %v7340_v39 }
 0x2f1   :  { %4387 = vmatpush1.bf16.msra.mxu1 %v7343_v40  ;;  %4347 = vmatprep.subr.bf16.mxu0 %v7348_v49  ;;  %v4416_v40 = vrot.slane %v8085_v27, %v4415_v17  ;;  %v7433_v17 = vld [vmem:[#allocation14 + $0x170] sm:$0xff]  }
 0x2f2   :  { %4388 = vmatprep.subr.bf16.mxu1 %v7351_v9 }
 0x2f4   :  { %4348 = vmatpush1.bf16.msra.mxu0 %v7346_v52  ;;  %v7389_v52 = vld [vmem:[#allocation14 + $0x30] sm:$0xff]  }
 0x2f5   :  { %4389 = vmatpush1.bf16.msra.mxu1 %v7349_v41  ;;  %4349 = vmatprep.subr.bf16.mxu0 %v7354_v33  ;;  %v7404_v41 = vld [vmem:[#allocation14 + $0xf0] sm:$0xff]  }
 0x2f6   :  { %4390 = vmatprep.subr.bf16.mxu1 %v7357_v42 }
 0x2f8   :  { %4350 = vmatpush1.bf16.msra.mxu0 %v7352_v10 }
 0x2f9   :  { %4391 = vmatpush1.bf16.msra.mxu1 %v7355_v44  ;;  %4351 = vmatprep.subr.bf16.mxu0 %v7360_v15  ;;  %v7390_v44 = vld [vmem:[#allocation14 + $0x78] sm:$0xff]  }
 0x2fa   :  { %4392 = vmatprep.subr.bf16.mxu1 %v7363_v45 }
 0x2fc   :  { %4352 = vmatpush1.bf16.msra.mxu0 %v7358_v48 }
 0x2fd   :  { %4393 = vmatpush1.bf16.msra.mxu1 %v7361_v50  ;;  %4353 = vmatprep.subr.bf16.mxu0 %v7366_v51  ;;  %v7406_v50 = vld [vmem:[#allocation14 + $0xf8] sm:$0xff]  }
 0x2fe   :  { %4394 = vmatprep.subr.bf16.mxu1 %v7369_v54  ;;  %v7407_v54 = vld [vmem:[#allocation14 + $0xb8] sm:$0xff]  }
 0x300   :  { %4354 = vmatpush1.bf16.msra.mxu0 %v7364_v55 }
 0x301   :  { %4395 = vmatpush1.bf16.msra.mxu1 %v7367_v57  ;;  %4355 = vmatprep.subr.bf16.mxu0 %v7372_v58 }
 0x302   :  { %4396 = vmatprep.subr.bf16.mxu1 %v7375_v43 }
 0x304   :  { %4356 = vmatpush1.bf16.msra.mxu0 %v7370_v60 }
 0x305   :  { %4397 = vmatpush1.bf16.msra.mxu1 %v7373_v61  ;;  %6283 = vmatprep.subr.bf16.mxu0 %v7376_v62  ;;  %v7408_v61 = vld [vmem:[#allocation13 + $0x40] sm:$0xff]  }
 0x306   :  { %6305 = vmatprep.subr.bf16.mxu1 %v7392_v63  ;;  %v7409_v62 = vld [vmem:[#allocation14 + $0x140] sm:$0xff]  }
 0x307   :  { %4358 = vmatmul.mubr.bf16.vlgmr.msra.gmra.mrb[32].mxu0 %v8042_v1  ;;  %v7383_v1 = vld [vmem:[#allocation14 + $0x18] sm:$0xff]   ;;  %v7411_v63 = vld [vmem:[#allocation14 + $0x100] sm:$0xff]  }
 0x308   :  { %4399 = vmatmul.mubr.bf16.vlgmr.msra.gmra.mrb[32].mxu1 %v8044_v2  ;;  %6284 = vmatpush3.bf16.msra.mxu0 %v7377_v46  ;;  %v7399_v2 = vld [vmem:[#allocation14 + $0x98] sm:$0xff]   ;;  %v7413_v46 = vld [vmem:[#allocation14 + $0x148] sm:$0xff]  }
 0x309   :  { %6306 = vmatpush3.bf16.msra.mxu1 %v7393_v47  ;;  %6285 = vmatprep.subr.bf16.mxu0 %v7378_v0  ;;  %v7415_v47 = vld [vmem:[#allocation14 + $0x108] sm:$0xff]   ;;  %v7417_v0 = vld [vmem:[#allocation14 + $0x150] sm:$0xff]  }
 0x30a   :  { %6307 = vmatprep.subr.bf16.mxu1 %v7394_v3  ;;  %v7419_v3 = vld [vmem:[#allocation14 + $0x110] sm:$0xff]  }
 0x30c   :  { %6286 = vmatpush3.bf16.msra.mxu0 %v7379_v4  ;;  %v7421_v4 = vld [vmem:[#allocation14 + $0x158] sm:$0xff]  }
 0x30d   :  { %6308 = vmatpush3.bf16.msra.mxu1 %v7395_v5  ;;  %6287 = vmatprep.subr.bf16.mxu0 %v7380_v6  ;;  %v7423_v5 = vld [vmem:[#allocation14 + $0x118] sm:$0xff]   ;;  %v7425_v6 = vld [vmem:[#allocation14 + $0x160] sm:$0xff]  }
 0x30e   :  { %6309 = vmatprep.subr.bf16.mxu1 %v7396_v7  ;;  %v7427_v7 = vld [vmem:[#allocation14 + $0x120] sm:$0xff]  }
 0x310   :  { %6288 = vmatpush3.bf16.msra.mxu0 %v7381_v11  ;;  %v7429_v11 = vld [vmem:[#allocation14 + $0x168] sm:$0xff]  }
 0x311   :  { %6310 = vmatpush3.bf16.msra.mxu1 %v7397_v12  ;;  %6289 = vmatprep.subr.bf16.mxu0 %v7382_v19 }
 0x312   :  { %6311 = vmatprep.subr.bf16.mxu1 %v7398_v20  ;;  %v7431_v20 = vld [vmem:[#allocation14 + $0x128] sm:$0xff]  }
 0x314   :  { %6290 = vmatpush3.bf16.msra.mxu0 %v7383_v1 }
 0x315   :  { %6312 = vmatpush3.bf16.msra.mxu1 %v7399_v2  ;;  %6291 = vmatprep.subr.bf16.mxu0 %v7384_v56 }
 0x316   :  { %6313 = vmatprep.subr.bf16.mxu1 %v7400_v24 }
 0x318   :  { %6292 = vmatpush3.bf16.msra.mxu0 %v7385_v26 }
 0x319   :  { %6314 = vmatpush3.bf16.msra.mxu1 %v7401_v53  ;;  %6293 = vmatprep.subr.bf16.mxu0 %v7386_v13 }
 0x31a   :  { %v4113_v31 = vpop.f32.mrb[20].mxu0  ;;  %6315 = vmatprep.subr.bf16.mxu1 %v7402_v28  ;;  %v7435_v28 = vld [vmem:[#allocation14 + $0x130] sm:$0xff]  }
 0x31b   :  { %v4154_v32 = vpop.f32.mrb[20].mxu1  ;;  %v4114_v34 = vadd.f32 %v4113_v31, %v8072_v18  ;;  %v4115_v37 = vpop.f32.mrb[21].mxu0  ;;  %v7405_v18 = vld [vmem:[#allocation14 + $0xb0] sm:$0xff]   ;;  %v4419_v31 = vsub.s32 2, %v8082_v25 }
 0x31c   :  { %v4156_v38 = vpop.f32.mrb[21].mxu1  ;;  %v4116_v39 = vadd.f32 %v4115_v37, %v8078_v22  ;;  %v4117_v49 = vpop.f32.mrb[22].mxu0  ;;  %6294 = vmatpush3.bf16.msra.mxu0 %v7387_v16  ;;  %v7391_v22 = vld [vmem:[#allocation14 + $0x38] sm:$0xff]  }
 0x31d   :  { %v4158_v9 = vpop.f32.mrb[22].mxu1  ;;  %6316 = vmatpush3.bf16.msra.mxu1 %v7403_v30  ;;  %v4155_v33 = vadd.f32 %v4154_v32, %v4114_v34  ;;  %v4118_v42 = vpop.f32.mrb[23].mxu0  ;;  %6295 = vmatprep.subr.bf16.mxu0 %v7388_v29  ;;  %v7437_v29 = vld [vmem:[#allocation14 + $0x178] sm:$0xff]   ;;  %v4420_v32 = vrot.slane %v8085_v27, %v4419_v31 }
 0x31e   :  { %v4159_v10 = vpop.f32.mrb[23].mxu1  ;;  %v4157_v15 = vadd.f32 %v4156_v38, %v4116_v39  ;;  %6317 = vmatprep.subr.bf16.mxu1 %v7404_v41  ;;  %v7439_v30 = vld [vmem:[#allocation14 + $0x138] sm:$0xff]  }
 0x31f   :  { %v4439_v45 = vadd.f32 %v4412_v36, %v4155_v33 }
 0x320   :  { %v4440_v48 = vadd.f32 %v4416_v40, %v4157_v15  ;;  %6296 = vmatpush3.bf16.msra.mxu0 %v7389_v52 }
 0x321   :  { %6318 = vmatpush3.bf16.msra.mxu1 %v7405_v18  ;;  %vm4445_vm0 = vcmp.gt.f32.partialorder %v4439_v45, 0.0  ;;  %v4451_v51 = vmul.f32 0.01, %v4439_v45  ;;  %6297 = vmatprep.subr.bf16.mxu0 %v7390_v44 }
 0x322   :  { %v4452_v55 = vmul.f32 0.01, %v4440_v48  ;;  %vm4446_vm1 = vcmp.gt.f32.partialorder %v4440_v48, 0.0  ;;  %6319 = vmatprep.subr.bf16.mxu1 %v7406_v50 }
 0x323   :  { %v4457_v57 = vsel %vm4445_vm0, %v4439_v45, %v4451_v51  ;;  %v7410_v51 = vld [vmem:[#allocation13] sm:$0xff]  }
 0x324   :  { %6298 = vmatpush3.bf16.msra.mxu0 %v7391_v22  ;;  %v4458_v58 = vsel %vm4446_vm1, %v4440_v48, %v4452_v55  ;;  %v4559_v60 = vpack.c.bf16 %v4457_v57, %v4457_v57  ;;  %v178_v48 = vld [vmem:[#allocation2 + $0x8] sm:$0xff]  ;;  %v7412_v57 = vld [vmem:[#allocation13 + $0x48] sm:$0xff]  }
 0x325   :  { %6320 = vmatpush3.bf16.msra.mxu1 %v7407_v54  ;;  %v4560_v43 = vpack.c.bf16 %v4458_v58, %v4458_v58  ;;  %6327 = vmatprep.subr.bf16.mxu0 %v7409_v62  ;;  %v184_v54 = vpack.c.bf16 %v178_v48, %v178_v48  ;;  %v7416_v58 = vld [vmem:[#allocation13 + $0x50] sm:$0xff]   ;;  %v7424_v62 = vld [vmem:[#allocation13 + $0x60] sm:$0xff]  }
 0x326   :  { %6349 = vmatprep.subr.bf16.mxu1 %v7408_v61  ;;  %v7422_v61 = vld [vmem:[#allocation13 + $0x18] sm:$0xff]  }
 0x327   :  { %4981 = vmatprep.mubr.bf16.mxu0 %v4560_v43  ;;  %v7418_v43 = vld [vmem:[#allocation13 + $0x10] sm:$0xff]  }
 0x328   :  { %4982 = vmatmul.mubr.bf16.vlgmr.msra.gmra.mrb[36].mxu0 %v4559_v60  ;;  %v7420_v60 = vld [vmem:[#allocation13 + $0x58] sm:$0xff]  }
 0x329   :  { %6328 = vmatpush3.bf16.msra.mxu0 %v7411_v63  ;;  %v7426_v63 = vld [vmem:[#allocation13 + $0x20] sm:$0xff]  }
 0x32a   :  { %6329 = vmatprep.subr.bf16.mxu0 %v7413_v46  ;;  %v7428_v46 = vld [vmem:[#allocation13 + $0x68] sm:$0xff]  }
 0x32d   :  { %6330 = vmatpush3.bf16.msra.mxu0 %v7415_v47  ;;  %v7430_v47 = vld [vmem:[#allocation13 + $0x28] sm:$0xff]  }
 0x32e   :  { %6331 = vmatprep.subr.bf16.mxu0 %v7417_v0  ;;  %v7432_v0 = vld [vmem:[#allocation13 + $0x70] sm:$0xff]  }
 0x331   :  { %6332 = vmatpush3.bf16.msra.mxu0 %v7419_v3  ;;  %v7434_v3 = vld [vmem:[#allocation13 + $0x30] sm:$0xff]  }
 0x332   :  { %6333 = vmatprep.subr.bf16.mxu0 %v7421_v4  ;;  %v7436_v4 = vld [vmem:[#allocation13 + $0x78] sm:$0xff]  }
 0x335   :  { %6334 = vmatpush3.bf16.msra.mxu0 %v7423_v5  ;;  %v7438_v5 = vld [vmem:[#allocation13 + $0x38] sm:$0xff]  }
 0x336   :  { %6335 = vmatprep.subr.bf16.mxu0 %v7425_v6  ;;  %v177_v6 = vld [vmem:[#allocation2] sm:$0xff] }
 0x339   :  { %6336 = vmatpush3.bf16.msra.mxu0 %v7427_v7  ;;  %v7440_v7 = vld [vmem:[#allocation13 + $0x140] sm:$0xff]  }
 0x33a   :  { %6337 = vmatprep.subr.bf16.mxu0 %v7429_v11  ;;  %v182_v11 = vld [vmem:[#allocation2 + $0x28] sm:$0xff] }
 0x33d   :  { %6338 = vmatpush3.bf16.msra.mxu0 %v7431_v20  ;;  %v188_v20 = vpack.c.bf16 %v182_v11, %v182_v11  ;;  %v7469_v11 = vld [vmem:[#allocation13 + $0xf8] sm:$0xff]  }
 0x33e   :  { %6339 = vmatprep.subr.bf16.mxu0 %v7433_v17  ;;  %v4427_v17 = vsub.s32 4, %v8082_v25 }
 0x341   :  { %6340 = vmatpush3.bf16.msra.mxu0 %v7435_v28  ;;  %v4431_v28 = vsub.s32 5, %v8082_v25 }
 0x342   :  { %6341 = vmatprep.subr.bf16.mxu0 %v7437_v29  ;;  %v7464_v29 = vld [vmem:[#allocation13 + $0x170] sm:$0xff]  }
 0x345   :  { %6342 = vmatpush3.bf16.msra.mxu0 %v7439_v30 }
 0x35a   :  { %v4195_v12 = vpop.f32.mrb[24].mxu0 }
 0x35b   :  { %v4236_v19 = vpop.f32.mrb[24].mxu1  ;;  %v4196_v23 = vadd.f32 %v4195_v12, %v8052_v8  ;;  %v4197_v1 = vpop.f32.mrb[25].mxu0  ;;  %v7441_v8 = vld [vmem:[#allocation13 + $0xc0] sm:$0xff]   ;;  %v183_v12 = vpack.c.bf16 %v177_v6, %v177_v6  ;;  %v7467_v6 = vld [vmem:[#allocation13 + $0xb0] sm:$0xff]  }
 0x35c   :  { %v4238_v2 = vpop.f32.mrb[25].mxu1  ;;  %v4198_v56 = vadd.f32 %v4197_v1, %v8054_v35  ;;  %v4199_v24 = vpop.f32.mrb[26].mxu0  ;;  %6371 = vmatprep.subr.bf16.mxu0 %v7441_v8  ;;  %v4423_v35 = vsub.s32 3, %v8082_v25  ;;  %v7446_v1 = vld [vmem:[#allocation13 + $0x108] sm:$0xff]   ;;  %v7468_v25 = vld [vmem:[#allocation13 + $0x178] sm:$0xff]  }
 0x35d   :  { %v4240_v26 = vpop.f32.mrb[26].mxu1  ;;  %v4237_v53 = vadd.f32 %v4236_v19, %v4196_v23  ;;  %v4200_v13 = vpop.f32.mrb[27].mxu0  ;;  %v7442_v19 = vld [vmem:[#allocation13 + $0x100] sm:$0xff]   ;;  %v7444_v23 = vld [vmem:[#allocation13 + $0x148] sm:$0xff]   ;;  %v7452_v24 = vld [vmem:[#allocation13 + $0x158] sm:$0xff]  }
 0x35e   :  { %v4241_v59 = vpop.f32.mrb[27].mxu1  ;;  %v4239_v16 = vadd.f32 %v4238_v2, %v4198_v56  ;;  %v4424_v37 = vrot.slane %v8085_v27, %v4423_v35  ;;  %v7448_v2 = vld [vmem:[#allocation13 + $0x150] sm:$0xff]   ;;  %v7454_v26 = vld [vmem:[#allocation13 + $0x118] sm:$0xff]   ;;  %v7458_v13 = vld [vmem:[#allocation13 + $0x120] sm:$0xff]   ;;  %v4428_v35 = vrot.slane %v8085_v27, %v4427_v17 }
 0x35f   :  { %v7450_v56 = vld [vmem:[#allocation13 + $0x110] sm:$0xff]   ;;  %v7460_v59 = vld [vmem:[#allocation13 + $0x168] sm:$0xff]  }
 0x39a   :  { %v4277_v34 = vpop.f32.mrb[28].mxu0 }
 0x39b   :  { %v4318_v36 = vpop.f32.mrb[28].mxu1  ;;  %v4278_v38 = vadd.f32 %v4277_v34, %v4237_v53  ;;  %v4279_v40 = vpop.f32.mrb[29].mxu0  ;;  %v7456_v53 = vld [vmem:[#allocation13 + $0x160] sm:$0xff]  }
 0x39c   :  { %v8099_v39 = vadd.f32 %v4318_v36, %v8069_v14  ;;  %v4320_v49 = vpop.f32.mrb[29].mxu1  ;;  %v4280_v9 = vadd.f32 %v4279_v40, %v4239_v16  ;;  %v4281_v41 = vpop.f32.mrb[30].mxu0  ;;  %v7462_v16 = vld [vmem:[#allocation13 + $0x128] sm:$0xff]   ;;  %v7466_v36 = vld [vmem:[#allocation13 + $0x130] sm:$0xff]  }
 0x39d   :  { %v8102_v52 = vadd.f32 %v4320_v49, %v8075_v21  ;;  %v4322_v33 = vpop.f32.mrb[30].mxu1  ;;  %v4441_v42 = vadd.f32 %v4420_v32, %v4278_v38  ;;  %v4282_v10 = vpop.f32.mrb[31].mxu0  ;;  %v7414_v21 = vld [vmem:[#allocation13 + $0x8] sm:$0xff]   ;;  %v4432_v38 = vrot.slane %v8085_v27, %v4431_v28  ;;  %v5495_v28 = vld [vmem:[#allocation17 + $0x38] sm:$0xff] }
 0x39e   :  { %v4323_v44 = vpop.f32.mrb[31].mxu1  ;;  %v4442_v18 = vadd.f32 %v4424_v37, %v4280_v9 }
 0x39f   :  { %vm4447_vm2 = vcmp.gt.f32.partialorder %v4441_v42, 0.0  ;;  %v4453_v15 = vmul.f32 0.01, %v4441_v42  ;;  %v181_v44 = vld [vmem:[#allocation2 + $0x20] sm:$0xff] }
 0x3a0   :  { %v4454_v45 = vmul.f32 0.01, %v4442_v18  ;;  %vm4448_vm3 = vcmp.gt.f32.partialorder %v4442_v18, 0.0  ;;  %v187_v27 = vpack.c.bf16 %v181_v44, %v181_v44 }
 0x3a1   :  { %v4459_v22 = vsel %vm4447_vm2, %v4441_v42, %v4453_v15 }
 0x3a2   :  { %v4460_v14 = vsel %vm4448_vm3, %v4442_v18, %v4454_v45  ;;  %v4561_v55 = vpack.c.bf16 %v4459_v22, %v4459_v22 }
 0x3a3   :  { %v4562_v50 = vpack.c.bf16 %v4460_v14, %v4460_v14 }
 0x3a5   :  { %5021 = vmatprep.mubr.bf16.mxu1 %v4562_v50  ;;  %v7443_v50 = vld [vmem:[#allocation13 + $0x80] sm:$0xff]  }
 0x3a6   :  { %5022 = vmatmul.mubr.bf16.vlgmr.msra.gmra.mrb[36].mxu1 %v4561_v55  ;;  %v7445_v55 = vld [vmem:[#allocation13 + $0xc8] sm:$0xff]  }
 0x3a7   :  { %6350 = vmatpush3.bf16.msra.mxu1 %v7410_v51  ;;  %5389 = vmatprep.mubr.bf16.mxu1 %v184_v54 }
 0x3a8   :  { %6351 = vmatprep.subr.bf16.mxu1 %v7412_v57  ;;  %v7447_v57 = vld [vmem:[#allocation13 + $0x88] sm:$0xff]  }
 0x3ab   :  { %6352 = vmatpush3.bf16.msra.mxu1 %v7414_v21  ;;  %v7449_v21 = vld [vmem:[#allocation13 + $0xd0] sm:$0xff]  }
 0x3ac   :  { %6353 = vmatprep.subr.bf16.mxu1 %v7416_v58  ;;  %v7451_v58 = vld [vmem:[#allocation13 + $0x90] sm:$0xff]  }
 0x3af   :  { %6354 = vmatpush3.bf16.msra.mxu1 %v7418_v43  ;;  %v7453_v43 = vld [vmem:[#allocation13 + $0xd8] sm:$0xff]  }
 0x3b0   :  { %6355 = vmatprep.subr.bf16.mxu1 %v7420_v60  ;;  %v7455_v60 = vld [vmem:[#allocation13 + $0x98] sm:$0xff]  }
 0x3b3   :  { %6356 = vmatpush3.bf16.msra.mxu1 %v7422_v61  ;;  %v7457_v61 = vld [vmem:[#allocation13 + $0xe0] sm:$0xff]  }
 0x3b4   :  { %6357 = vmatprep.subr.bf16.mxu1 %v7424_v62  ;;  %v7459_v62 = vld [vmem:[#allocation13 + $0xa0] sm:$0xff]  }
 0x3b7   :  { %6358 = vmatpush3.bf16.msra.mxu1 %v7426_v63  ;;  %v7461_v63 = vld [vmem:[#allocation13 + $0xe8] sm:$0xff]  }
 0x3b8   :  { %6359 = vmatprep.subr.bf16.mxu1 %v7428_v46  ;;  %v7463_v46 = vld [vmem:[#allocation13 + $0xa8] sm:$0xff]  }
 0x3bb   :  { %6360 = vmatpush3.bf16.msra.mxu1 %v7430_v47  ;;  %v7465_v47 = vld [vmem:[#allocation13 + $0xf0] sm:$0xff]  }
 0x3bc   :  { %6361 = vmatprep.subr.bf16.mxu1 %v7432_v0 }
 0x3bf   :  { %6362 = vmatpush3.bf16.msra.mxu1 %v7434_v3 }
 0x3c0   :  { %6363 = vmatprep.subr.bf16.mxu1 %v7436_v4 }
 0x3c3   :  { %6364 = vmatpush3.bf16.msra.mxu1 %v7438_v5 }
 0x3c4   :  { %6393 = vmatprep.subr.bf16.mxu1 %v7440_v7 }
 0x3c6   :  { %5390 = vmatmul.mubr.bf16.vlgmr.msra.gmra.mrb[40].mxu1 %v183_v12  ;;  %v7471_v12 = vld [vmem:[#allocation13 + $0xb8] sm:$0xff]  }
 0x3c7   :  { %6394 = vmatpush3.bf16.msra.mxu1 %v7442_v19  ;;  %5469 = vmatprep.mubr.bf16.mxu1 %v188_v20  ;;  %v179_v19 = vld [vmem:[#allocation2 + $0x10] sm:$0xff] }
 0x3c8   :  { %6395 = vmatprep.subr.bf16.mxu1 %v7444_v23  ;;  %v185_v20 = vpack.c.bf16 %v179_v19, %v179_v19  ;;  %v5488_v23 = vld [vmem:[#allocation17] sm:$0xff] }
 0x3cb   :  { %6396 = vmatpush3.bf16.msra.mxu1 %v7446_v1  ;;  %v5489_v1 = vld [vmem:[#allocation17 + $0x8] sm:$0xff] }
 0x3cc   :  { %6397 = vmatprep.subr.bf16.mxu1 %v7448_v2  ;;  %v5490_v2 = vld [vmem:[#allocation17 + $0x10] sm:$0xff] }
 0x3cf   :  { %6398 = vmatpush3.bf16.msra.mxu1 %v7450_v56  ;;  %v7771_v56 = vmov 0.0|0.0  }
 0x3d0   :  { %6399 = vmatprep.subr.bf16.mxu1 %v7452_v24  ;;  %v6468_v24 = vpack.c.bf16 %v5489_v1, %v5488_v23 }
 0x3d3   :  { %6400 = vmatpush3.bf16.msra.mxu1 %v7454_v26  ;;  %v5491_v26 = vld [vmem:[#allocation17 + $0x18] sm:$0xff] }
 0x3d4   :  { %6401 = vmatprep.subr.bf16.mxu1 %v7456_v53  ;;  %v6471_v53 = vpack.c.bf16 %v5491_v26, %v5490_v2 }
 0x3d7   :  { %6402 = vmatpush3.bf16.msra.mxu1 %v7458_v13  ;;  %v5492_v13 = vld [vmem:[#allocation17 + $0x20] sm:$0xff] }
 0x3d8   :  { %6403 = vmatprep.subr.bf16.mxu1 %v7460_v59  ;;  %v5493_v59 = vld [vmem:[#allocation17 + $0x28] sm:$0xff] }
 0x3d9   :  { %v6474_v17 = vpack.c.bf16 %v5493_v59, %v5492_v13 }
 0x3da   :  { %v4359_v30 = vpop.f32.mrb[32].mxu0 }
 0x3db   :  { %v4400_v8 = vpop.f32.mrb[32].mxu1  ;;  %v4360_v31 = vadd.f32 %v4359_v30, %v8099_v39  ;;  %v4361_v32 = vpop.f32.mrb[33].mxu0  ;;  %6404 = vmatpush3.bf16.msra.mxu1 %v7462_v16  ;;  %v7470_v39 = vld [vmem:[#allocation13 + $0x138] sm:$0xff]   ;;  %v5496_v30 = vld [vmem:[#allocation17 + $0x40] sm:$0xff] }
 0x3dc   :  { %v4402_v34 = vpop.f32.mrb[33].mxu1  ;;  %v4362_v37 = vadd.f32 %v4361_v32, %v8102_v52  ;;  %v4363_v40 = vpop.f32.mrb[34].mxu0  ;;  %6405 = vmatprep.subr.bf16.mxu1 %v7464_v29  ;;  %v180_v52 = vld [vmem:[#allocation2 + $0x18] sm:$0xff]  ;;  %v5494_v16 = vld [vmem:[#allocation17 + $0x30] sm:$0xff]  ;;  %v5499_v32 = vld [vmem:[#allocation17 + $0x58] sm:$0xff] }
 0x3dd   :  { %v4404_v49 = vpop.f32.mrb[34].mxu1  ;;  %v4401_v9 = vadd.f32 %v4400_v8, %v4360_v31  ;;  %v4364_v41 = vpop.f32.mrb[35].mxu0  ;;  %v186_v51 = vpack.c.bf16 %v180_v52, %v180_v52  ;;  %v6477_v29 = vpack.c.bf16 %v5495_v28, %v5494_v16  ;;  %v5497_v8 = vld [vmem:[#allocation17 + $0x48] sm:$0xff]  ;;  %v5502_v40 = vld [vmem:[#allocation17 + $0x70] sm:$0xff] }
 0x3de   :  { %v4405_v33 = vpop.f32.mrb[35].mxu1  ;;  %v4403_v42 = vadd.f32 %v4402_v34, %v4362_v37  ;;  %v6480_v31 = vpack.c.bf16 %v5497_v8, %v5496_v30  ;;  %v5501_v37 = vld [vmem:[#allocation17 + $0x68] sm:$0xff]  ;;  %v5503_v49 = vld [vmem:[#allocation17 + $0x78] sm:$0xff] }
 0x3df   :  { %v4443_v10 = vadd.f32 %v4428_v35, %v4401_v9  ;;  %6406 = vmatpush3.bf16.msra.mxu1 %v7466_v36  ;;  %v5498_v35 = vld [vmem:[#allocation17 + $0x50] sm:$0xff]  ;;  %v5500_v36 = vld [vmem:[#allocation17 + $0x60] sm:$0xff]  ;;  %v7773_v9 = vmov 0.0  }
 0x3e0   :  { %v4444_v18 = vadd.f32 %v4432_v38, %v4403_v42  ;;  %6407 = vmatprep.subr.bf16.mxu1 %v7468_v25  ;;  %v6483_v34 = vpack.c.bf16 %v5499_v32, %v5498_v35  ;;  %v6486_v38 = vpack.c.bf16 %v5501_v37, %v5500_v36  ;;  %v6489_v25 = vpack.c.bf16 %v5503_v49, %v5502_v40 }
 0x3e1   :  { %vm4449_vm4 = vcmp.gt.f32.partialorder %v4443_v10, 0.0  ;;  %v4455_v15 = vmul.f32 0.01, %v4443_v10 }
 0x3e2   :  { %v4456_v45 = vmul.f32 0.01, %v4444_v18  ;;  %vm4450_vm5 = vcmp.gt.f32.partialorder %v4444_v18, 0.0 }
 0x3e3   :  { %v4461_v48 = vsel %vm4449_vm4, %v4443_v10, %v4455_v15  ;;  %6408 = vmatpush3.bf16.msra.mxu1 %v7470_v39 }
 0x3e4   :  { %v4462_v22 = vsel %vm4450_vm5, %v4444_v18, %v4456_v45  ;;  %v4563_v54 = vpack.c.bf16 %v4461_v48, %v4461_v48 }
 0x3e5   :  { %v4564_v14 = vpack.c.bf16 %v4462_v22, %v4462_v22 }
 0x3e6   :  { %5470 = vmatmul.mubr.bf16.vlgmr.msra.gmra.mrb[44].mxu1 %v187_v27 }
 0x3e7   :  { %5061 = vmatprep.mubr.bf16.mxu0 %v4564_v14 }
 0x3e8   :  { %5062 = vmatmul.mubr.bf16.vlgmr.msra.gmra.mrb[40].mxu0 %v4563_v54 }
 0x3e9   :  { %6372 = vmatpush3.bf16.msra.mxu0 %v7443_v50  ;;  %5429 = vmatprep.mubr.bf16.mxu0 %v186_v51 }
 0x3ea   :  { %6373 = vmatprep.subr.bf16.mxu0 %v7445_v55 }
 0x3ed   :  { %6374 = vmatpush3.bf16.msra.mxu0 %v7447_v57 }
 0x3ee   :  { %6375 = vmatprep.subr.bf16.mxu0 %v7449_v21 }
 0x3f1   :  { %6376 = vmatpush3.bf16.msra.mxu0 %v7451_v58 }
 0x3f2   :  { %6377 = vmatprep.subr.bf16.mxu0 %v7453_v43 }
 0x3f5   :  { %6378 = vmatpush3.bf16.msra.mxu0 %v7455_v60 }
 0x3f6   :  { %6379 = vmatprep.subr.bf16.mxu0 %v7457_v61 }
 0x3f9   :  { %6380 = vmatpush3.bf16.msra.mxu0 %v7459_v62 }
 0x3fa   :  { %6381 = vmatprep.subr.bf16.mxu0 %v7461_v63 }
 0x3fb   :  { %v6299_v0 = vpop.f32.mrb[36].mxu0 }
 0x3fc   :  { %v6300_v3 = vpop.f32.mrb[37].mxu0 }
 0x3fd   :  { %v8110_v4 = vadd.f32 %v6300_v3, %v6299_v0  ;;  %6382 = vmatpush3.bf16.msra.mxu0 %v7463_v46  ;;  %v6302_v5 = vpop.f32.mrb[38].mxu0  ;;  %v6280_v3 = vld [vmem:[#allocation16] ss:$0 sm:$0xff] }
 0x3fe   :  { %v6303_v7 = vpop.f32.mrb[39].mxu0  ;;  %6383 = vmatprep.subr.bf16.mxu0 %v7465_v47 }
 0x401   :  { %6384 = vmatpush3.bf16.msra.mxu0 %v7467_v6 }
 0x402   :  { %6385 = vmatprep.subr.bf16.mxu0 %v7469_v11  ;;  %v6281_v11 = vld [vmem:[#allocation19] ss:$0 sm:$0xff] }
 0x405   :  { %6386 = vmatpush3.bf16.msra.mxu0 %v7471_v12 }
 0x406   :  { %6467 = vmatprep.subr.bf16.mxu0 %v7771_v56 }
 0x408   :  { %5430 = vmatmul.mubr.bf16.vlgmr.msra.gmra.mrb[44].mxu0 %v185_v20 }
 0x409   :  { %6469 = vmatpush3.bf16.msra.mxu0 %v6468_v24  ;;  %6464 = vmatprep.mubr.msk.f32.mxu0 %vm7772_vm6, %v7773_v9 }
 0x40a   :  { %6470 = vmatprep.subr.bf16.mxu0 %v7771_v56 }
 0x40d   :  { %6472 = vmatpush3.bf16.msra.mxu0 %v6471_v53 }
 0x40e   :  { %6473 = vmatprep.subr.bf16.mxu0 %v7771_v56 }
 0x411   :  { %6475 = vmatpush3.bf16.msra.mxu0 %v6474_v17 }
 0x412   :  { %6476 = vmatprep.subr.bf16.mxu0 %v7771_v56 }
 0x415   :  { %6478 = vmatpush3.bf16.msra.mxu0 %v6477_v29 }
 0x416   :  { %6479 = vmatprep.subr.bf16.mxu0 %v7771_v56 }
 0x419   :  { %6481 = vmatpush3.bf16.msra.mxu0 %v6480_v31 }
 0x41a   :  { %6482 = vmatprep.subr.bf16.mxu0 %v7771_v56 }
 0x41d   :  { %6484 = vmatpush3.bf16.msra.mxu0 %v6483_v34 }
 0x41e   :  { %6485 = vmatprep.subr.bf16.mxu0 %v7771_v56 }
 0x421   :  { %6487 = vmatpush3.bf16.msra.mxu0 %v6486_v38 }
 0x422   :  { %6488 = vmatprep.subr.bf16.mxu0 %v7771_v56 }
 0x425   :  { %6490 = vmatpush3.bf16.msra.mxu0 %v6489_v25 }
 0x479   :  { %v6321_v41 = vpop.f32.mrb[36].mxu1 }
 0x47a   :  { %v6322_v33 = vpop.f32.mrb[37].mxu1 }
 0x47b   :  { %v6323_v42 = vadd.f32 %v6322_v33, %v6321_v41  ;;  %v6324_v10 = vpop.f32.mrb[38].mxu1 }
 0x47c   :  { %v6325_v39 = vpop.f32.mrb[39].mxu1 }
 0x47d   :  { %v5024_v44 = vadd.f32 %v6323_v42, %v8110_v4 }
 0x499   :  { %v6365_v18 = vpop.f32.mrb[40].mxu1 }
 0x49a   :  { %v6366_v15 = vpop.f32.mrb[41].mxu1 }
 0x49b   :  { %v6367_v45 = vadd.f32 %v6366_v15, %v6365_v18  ;;  %v6368_v52 = vpop.f32.mrb[42].mxu1 }
 0x49c   :  { %v6369_v27 = vpop.f32.mrb[43].mxu1 }
 0x4b9   :  { %v6409_v48 = vpop.f32.mrb[44].mxu1 }
 0x4ba   :  { %v6410_v22 = vpop.f32.mrb[45].mxu1 }
 0x4bb   :  { %v6343_v14 = vpop.f32.mrb[40].mxu0  ;;  %v6411_v50 = vadd.f32 %v6410_v22, %v6409_v48  ;;  %v6412_v51 = vpop.f32.mrb[46].mxu1 }
 0x4bc   :  { %v6344_v54 = vpop.f32.mrb[41].mxu0  ;;  %v6413_v55 = vpop.f32.mrb[47].mxu1 }
 0x4bd   :  { %v6345_v57 = vadd.f32 %v6344_v54, %v6343_v14  ;;  %v6346_v21 = vpop.f32.mrb[42].mxu0 }
 0x4be   :  { %v6347_v58 = vpop.f32.mrb[43].mxu0 }
 0x4bf   :  { %v5064_v43 = vadd.f32 %v6345_v57, %v5024_v44 }
 0x4c1   :  { %v5392_v60 = vadd.f32 %v6367_v45, %v5064_v43 }
 0x4db   :  { %v6387_v61 = vpop.f32.mrb[44].mxu0 }
 0x4dc   :  { %v6388_v62 = vpop.f32.mrb[45].mxu0 }
 0x4dd   :  { %v6389_v63 = vadd.f32 %v6388_v62, %v6387_v61  ;;  %v6390_v46 = vpop.f32.mrb[46].mxu0 }
 0x4de   :  { %v6391_v47 = vpop.f32.mrb[47].mxu0 }
 0x4df   :  { %v5432_v0 = vadd.f32 %v6389_v63, %v5392_v60 }
 0x4e1   :  { %v5472_v4 = vadd.f32 %v6411_v50, %v5432_v0 }
 0x4e3   :  { %v5484_v5 = vadd.f32 %v6280_v3, %v5472_v4 }
 0x4e5   :  { %vm5485_vm7 = vcmp.gt.f32.partialorder %v5484_v5, 0.0  ;;  %v5486_v6 = vmul.f32 0.01, %v5484_v5 }
 0x4e7   :  { %v5487_v7 = vsel %vm5485_vm7, %v5484_v5, %v5486_v6 }
 0x4e8   :  { %6465 = vmatmul.mubr.f32.vlgmr.msra.gmra.mrb[48].mxu0 %v5487_v7 }
 0x5bb   :  { %v5577_v12 = vpop.f32.mrb[48].mxu0 }
 0x5bc   :  { %v5578_v19 = vadd.f32 %v6281_v11, %v5577_v12  ;;  %v6466_v20 = vpop.f32.mrb[49].mxu0 }
 0x5be   :  { %v6282_v23 = vmul.f32 -1.442695, %v5578_v19 }
 0x5c0   :  { %7472 = vpow2.f32 %v6282_v23 }
 0x5ca   :  { %v7473_v1 = vpop.eup %7472 }
 0x5cb   :  { %v5584_v2 = vadd.f32 1.0, %v7473_v1 }
 0x5cd   :  { %7474 = vrcp.f32 %v5584_v2 }
 0x5d7   :  { %v7475_v56 = vpop.eup %7474 }
 0x5d8   :  { %5587 = vst [vmem:[#allocation20] sm:$0xff] %v7475_v56 }
 0x5d9   :  { %7729 = shalt.err (!%p7726_p8)
}
 0x5da   :  { %s7730_s30 = scalar_lea.hbm %s8136_s11, 128 }
 0x5db   :  { %p7731_p9 = scmp.ne.s32.totalorder %s8136_s11, %s7730_s30  ;;  %p7734_p10 = scmp.lt.u32.totalorder %s7730_s30, %s8136_s11 }
 0x5dd   :  { %p7736_p11 = pnand %p7734_p10, %p7731_p9 }
 0x5df   :  { %7739 = shalt.err (!%p7736_p11)
}
 0x5e0   :  { %5597 = dma.vmem_to_hbm [thread:$0]  %s5595_s27, 128, %s8136_s11, [#allocation4]  }
 0x5e1   :  { %7752 = dma.done.wait [#allocation4], 128  }
 0x5e2   :  { %7753 = vsyncadd [#allocation4], 4294967168 }
 0x5e3   :  { %5601 = vsyncpa [#allocation3], 1 }
 0x5e4   :  { %5602 = vsyncpa [#allocation6], 1 }
 0x5e5   :  { %5603 = vsyncpa [#allocation9], 1 }
 0x5e6   :  { %5604 = vsyncpa [#allocation12], 1 }
 0x5e7   :  { %5605 = vsyncpa [#allocation15], 1 }
 0x5e8   :  { %5606 = vsyncpa [#allocation18], 1 }
 0x5e9   :  { %5607 = vsyncpa [#allocation4], 1 }

</bundles_post_ra>
